<compile_context>
chip_gen: v6e
topology: v6e:2x2x1
jax: 0.10.0
libtpu: 0.0.40
codegen_flags: <defaults>
</compile_context>

<pallas_src>
import numpy as np
import jax
import jax.numpy as jnp
from jax import lax
from jax.experimental import pallas as pl
from jax.experimental.pallas import tpu as pltpu


def _round_up(x, m):
    return ((x + m - 1) // m) * m


# ---------------------------------------------------------------------------
# Fused energy + force kernel
# ---------------------------------------------------------------------------
def _property_kernel(v_ref, u_ref, ef_ref, cs_ref, na_ref,
                     alpha_ref, gamma_ref, w1_ref, w1t_ref, gw1_ref,
                     b1_ref, w2c_ref, w2r_ref,
                     ene_ref, f_ref, p_scr):
    f32 = jnp.float32
    V = v_ref[...]                      # (Bt, 5, Np)  rows: x, y, z, 1, |p|^2
    U = u_ref[...]                      # (Bt, 5, Np)  rows: -2x,-2y,-2z,|p|^2,1
    Bt, _, Np = V.shape
    F = w1_ref.shape[0]

    # ---- masks built in-kernel from numatoms (no big mask operands) --------
    na = na_ref[...]                                            # (Bt,1,1) i32
    ii = lax.broadcasted_iota(jnp.int32, (Bt, Np, Np), 1)
    jj = lax.broadcasted_iota(jnp.int32, (Bt, Np, Np), 2)
    pm = ((ii < na) & (jj < na) & (ii != jj)).astype(f32)       # (Bt,Np,Np)
    icol = lax.broadcasted_iota(jnp.int32, (Bt, Np, 1), 1)
    mcol = (icol < na).astype(f32)                              # (Bt,Np,1)
    mflat = mcol.reshape(Bt * Np, 1)

    bdn = (((1,), (1,)), ((0,), (0,)))          # contract sublane dim, batch 0

    # ---- pairwise squared distances: single batched MXU matmul -------------
    d2 = lax.dot_general(U, V, bdn, preferred_element_type=f32)  # (Bt,Np,Np)

    # ---- electric-field projection folded into the MLP pre-activation ------
    efdot = lax.dot_general(V, ef_ref[...], bdn,
                            preferred_element_type=f32)          # (Bt,Np,1)
    preact = efdot.reshape(Bt * Np, 1) * gw1_ref[...] + b1_ref[...]  # (Bt*Np,H)

    ones_col = jnp.ones((Np, 1), f32)

    # ---- pass 1 over features: gaussian slab + density projection ----------
    # slab layout (F, Bt, Np_i, Np_j): atoms on lanes, feature is a major dim.
    # rho never materializes: sum_j Pf goes through an MXU ones-matvec and is
    # applied as a rank-1 update of the pre-activation.
    for f in range(F):
        af = alpha_ref[0:1, f:f + 1]                            # (1,1)
        Ef = jnp.exp(d2 * (-af))                                # (Bt,Np,Np) EUP
        Pf = pm * Ef * cs_ref[f]                                # cs_ref[f]:(Bt,1,Np)
        p_scr[f] = Pf
        rcol = jnp.dot(Pf.reshape(Bt * Np, Np), ones_col,
                       preferred_element_type=f32)              # (Bt*Np,1)
        preact = preact + rcol * w1_ref[f:f + 1, :]             # rank-1 update

    # ---- per-atom MLP (atoms stacked on sublanes, MXU matvec not XLU) ------
    a = jnp.tanh(preact)                                        # (Bt*Np,H)
    eat = jnp.dot(a, w2c_ref[...], preferred_element_type=f32)  # (Bt*Np,1)
    ene_ref[...] = jnp.sum((eat * mflat).reshape(Bt, Np, 1), axis=1,
                           keepdims=True)                       # (Bt,1,1)

    # ---- analytic force (reuses stored P slab; no exp recompute) -----------
    gh = (1.0 - a * a) * w2r_ref[...]                           # (Bt*Np,H)
    g2 = jnp.dot(gh, w1t_ref[...],
                 preferred_element_type=f32) * mflat            # (Bt*Np,F)
    g3 = g2.reshape(Bt, Np, F)

    # electric-field term emitted lane-dense (Bt,3,Np) via one batched matmul
    efg = ef_ref[...][:, :3, :] * gamma_ref[...][None]          # (Bt,3,F)
    grad = lax.dot_general(efg, g3, (((2,), (2,)), ((0,), (0,))),
                           preferred_element_type=f32)          # (Bt,3,Np)

    # pair term: Q[i,j] = 2*sum_f g[i,f]*alpha_f*P[f,i,j], accumulated per
    # feature from major-axis slab slices -> no second full-size temporary.
    Q = jnp.zeros((Bt, Np, Np), f32)
    for f in range(F):
        gcol = g3[:, :, f:f + 1] * (2.0 * alpha_ref[0:1, f:f + 1])  # (Bt,Np,1)
        Q = Q + gcol * p_scr[f]

    # ones row of posext folds the row/col sums of Q into the same matmuls
    posext = V[:, :4, :]                                        # (Bt,4,Np)
    AT = lax.dot_general(posext, Q, (((2,), (2,)), ((0,), (0,))),
                         preferred_element_type=f32)            # (Bt,4,Np)
    BT = lax.dot_general(posext, Q, (((2,), (1,)), ((0,), (0,))),
                         preferred_element_type=f32)            # (Bt,4,Np)
    grad = grad + AT[:, :3, :] + BT[:, :3, :] \
        - V[:, :3, :] * (AT[:, 3:4, :] + BT[:, 3:4, :])

    f_ref[...] = -grad                                          # (Bt,3,Np)


# ---------------------------------------------------------------------------
# Device-aware sizing
# ---------------------------------------------------------------------------
def _device_info():
    vmem_phys = 128 * 1024 * 1024
    try:
        info = pltpu.get_tpu_info()
        vmem_phys = int(getattr(info, "vmem_capacity_bytes", vmem_phys))
    except Exception:
        pass
    multi_tc = False
    try:
        kind = jax.devices()[0].device_kind.lower()
        multi_tc = any(t in kind for t in ("v4", "v5p", "v7", "7x"))
    except Exception:
        pass
    return vmem_phys, multi_tc


# ---------------------------------------------------------------------------
# Wrapper (equivalent of Property.forward)
# ---------------------------------------------------------------------------
def property_forward(params, cart, ef, numatoms, species, atom_index, shifts,
                     batch_tile=None):
    del atom_index, shifts  # see TODO(synk) at top of file
    B, N, _ = cart.shape
    F = params["alpha"].shape[-1]
    H = params["w1"].shape[-1]
    dt = cart.dtype

    Np = max(8, _round_up(N, 8))            # sublane-aligned atom count
    Np128 = _round_up(Np, 128)

    # --- generation-aware VMEM budget / tile size ---------------------------
    vmem_phys, multi_tc = _device_info()
    vmem_budget = min(max(vmem_phys - 28 * 2**20, 32 * 2**20), 100 * 2**20)

    if batch_tile is None:
        pair = Np * Np128 * 4
        per_mol = (F + 8) * pair                 # P slab + live (N,N) temps
        per_mol += 2 * F * 8 * Np128 * 4         # double-buffered cs blocks
        per_mol += 2 * 16 * 8 * Np128 * 4        # V/U/ef/force buffers
        per_mol += 6 * Np * 128 * 4              # per-atom (H/F wide) temps
        bt = max(1, int((vmem_budget * 4 // 5 - 4 * 2**20) // per_mol))
        bt = max(1, min(bt, B))
        if multi_tc and B >= 2:
            bt = min(bt, -(-B // 2))             # >=2 grid steps only on 2-TC
        batch_tile = bt
    Bt = max(1, int(batch_tile))
    nblk = -(-B // Bt)
    if multi_tc and nblk > 1 and nblk % 2:
        nblk += 1                                # even split across TCs
    B_pad = nblk * Bt

    # --- glue (constant w.r.t. cart) ----------------------------------------
    species_flat = species.reshape(-1)
    cs = params["c"][species_flat].reshape(B, N, F).astype(dt)
    espa = params["esp"][species_flat].reshape(B, N).astype(dt)
    mask = (jnp.arange(N)[None, :] < numatoms[:, None]).astype(dt)
    # cart-independent energy terms (no force contribution) stay in the wrapper
    e_const = jnp.sum(espa * mask, axis=1) + numatoms.astype(dt) * params["b2"]

    def pad_to(x, axis, size):
        if x.shape[axis] == size:
            return x
        pad = [(0, 0)] * x.ndim
        pad[axis] = (0, size - x.shape[axis])
        return jnp.pad(x, pad)

    cart_p = pad_to(cart, 1, Np)                            # (B,Np,3)
    cs_p = pad_to(cs, 1, Np)                                # (B,Np,F)

    cartT = jnp.transpose(cart_p, (0, 2, 1))                # (B,3,Np)
    r2row = jnp.sum(cart_p * cart_p, axis=2)[:, None, :]    # (B,1,Np)
    ones_row = jnp.ones((B, 1, Np), dt)
    V = jnp.concatenate([cartT, ones_row, r2row], axis=1)   # (B,5,Np)
    U = jnp.concatenate([-2.0 * cartT, r2row, ones_row], axis=1)
    ef5 = jnp.concatenate([ef, jnp.zeros((B, 2), dt)], axis=1)[:, :, None]
    na = numatoms.astype(jnp.int32).reshape(B, 1, 1)

    V = pad_to(V, 0, B_pad)
    U = pad_to(U, 0, B_pad)
    ef5 = pad_to(ef5, 0, B_pad)
    na = pad_to(na, 0, B_pad)
    csF = jnp.transpose(pad_to(cs_p, 0, B_pad), (2, 0, 1))[:, :, None, :]
    # csF: (F, B_pad, 1, Np) -- lane-dense in atoms, no in-kernel relayout

    alpha = params["alpha"].astype(dt).reshape(1, F)
    gamma = params["gamma"].astype(dt).reshape(1, F)
    w1 = params["w1"].astype(dt)                            # (F,H)
    w1T = jnp.transpose(w1)                                 # (H,F)
    gw1 = jnp.dot(gamma, w1)                                # (1,H)
    b1 = params["b1"].astype(dt).reshape(1, H)
    w2c = params["w2"].astype(dt).reshape(H, 1)
    w2r = params["w2"].astype(dt).reshape(1, H)

    bmap = lambda g: (g, 0, 0)
    smap = lambda g: (0, 0)
    in_specs = [
        pl.BlockSpec((Bt, 5, Np), bmap),                    # V (x,y,z,1,r2)
        pl.BlockSpec((Bt, 5, Np), bmap),                    # U (-2x,-2y,-2z,r2,1)
        pl.BlockSpec((Bt, 5, 1), bmap),                     # electric field
        pl.BlockSpec((F, Bt, 1, Np), lambda g: (0, g, 0, 0)),  # species coeffs
        pl.BlockSpec((Bt, 1, 1), bmap),                     # numatoms
        pl.BlockSpec((1, F), smap),                         # alpha
        pl.BlockSpec((1, F), smap),                         # gamma
        pl.BlockSpec((F, H), smap),                         # W1
        pl.BlockSpec((H, F), smap),                         # W1^T
        pl.BlockSpec((1, H), smap),                         # gamma @ W1
        pl.BlockSpec((1, H), smap),                         # b1
        pl.BlockSpec((H, 1), smap),                         # W2 column
        pl.BlockSpec((1, H), smap),                         # W2 row
    ]
    out_specs = (pl.BlockSpec((Bt, 1, 1), bmap),
                 pl.BlockSpec((Bt, 3, Np), bmap))
    out_shape = (jax.ShapeDtypeStruct((B_pad, 1, 1), dt),
                 jax.ShapeDtypeStruct((B_pad, 3, Np), dt))

    cost = pl.CostEstimate(
        flops=int(B_pad * (8 * Np * Np * F + 4 * Np * F * H
                           + 40 * Np * Np + 8 * Np * H)),
        transcendentals=int(B_pad * (Np * Np * F + Np * H)),
        bytes_accessed=int(B_pad * (10 + F + 4) * Np * 4 + (2 * F * H) * 4),
    )

    ene, forceT = pl.pallas_call(
        _property_kernel,
        grid=(nblk,),
        in_specs=in_specs,
        out_specs=out_specs,
        out_shape=out_shape,
        scratch_shapes=[pltpu.VMEM((F, Bt, Np, Np), jnp.float32)],
        compiler_params=pltpu.CompilerParams(
            dimension_semantics=("parallel",),
            vmem_limit_bytes=int(vmem_budget),
        ),
        cost_estimate=cost,
    )(V, U, ef5, csF, na, alpha, gamma, w1, w1T, gw1, b1, w2c, w2r)

    # varene.view(-1, 1), force.view(numatoms.shape[0], -1)
    varene = ene[:B].reshape(B, 1) + e_const.reshape(B, 1)
    force = jnp.transpose(forceT[:B, :, :N], (0, 2, 1)).reshape(B, N * 3)
    return varene, force


# ---------------------------------------------------------------------------
# Pure-JAX reference (same math) for validation of energy and autograd force
# ---------------------------------------------------------------------------
def _energy_ref(params, cart, ef, numatoms, species):
    B, N, _ = cart.shape
    F = params["alpha"].shape[-1]
    sf = species.reshape(-1)
    cs = params["c"][sf].reshape(B, N, F)
    espa = params["esp"][sf].reshape(B, N)
    mask = (jnp.arange(N)[None, :] < numatoms[:, None]).astype(cart.dtype)
    pm = mask[:, :, None] * mask[:, None, :] * (1.0 - jnp.eye(N, dtype=cart.dtype))[None]
    diff = cart[:, :, None, :] - cart[:, None, :, :]
    d2 = jnp.sum(diff * diff, axis=-1)
    G = jnp.exp(-d2[..., None] * params["alpha"][None, None, None, :])
    rho = jnp.sum(pm[..., None] * cs[:, None, :, :] * G, axis=2)
    efdot = jnp.sum(cart * ef[:, None, :], axis=-1)
    rho = rho + efdot[..., None] * params["gamma"][None, None, :]
    a = jnp.tanh(jnp.einsum("bnf,fh->bnh", rho, params["w1"]) + params["b1"])
    eat = jnp.einsum("bnh,h->bn", a, params["w2"]) + params["b2"] + espa
    return jnp.sum(eat * mask, axis=1)


# ---------------------------------------------------------------------------
if __name__ == "__main__":
    key = jax.random.PRNGKey(0)
    B, N, F, H, S = 2, 8, 16, 32, 3
    ks = jax.random.split(key, 12)

    params = dict(
        c=0.5 + 0.5 * jax.random.uniform(ks[0], (S, F), jnp.float32),
        esp=0.1 * jax.random.normal(ks[1], (S,), jnp.float32),
        alpha=0.3 + 0.2 * jax.random.uniform(ks[2], (F,), jnp.float32),
        gamma=0.1 * jax.random.normal(ks[3], (F,), jnp.float32),
        w1=jax.random.normal(ks[4], (F, H), jnp.float32) / jnp.sqrt(F),
        b1=0.1 * jax.random.normal(ks[5], (H,), jnp.float32),
        w2=jax.random.normal(ks[6], (H,), jnp.float32) / jnp.sqrt(H),
        b2=jnp.asarray(0.05, jnp.float32),
    )

    cart = 3.0 * jax.random.uniform(ks[7], (B, N, 3), jnp.float32)
    ef = 0.1 * jax.random.normal(ks[8], (B, 3), jnp.float32)
    numatoms = jnp.array([N, N - 2], dtype=jnp.int32)
    species = jax.random.randint(ks[9], (B, N), 0, S)
    npairs = N * (N - 1)
    atom_index = jnp.zeros((2, B, npairs), dtype=jnp.int32)
    shifts = jnp.zeros((B, npairs, 3), dtype=jnp.float32)

    varene, force = jax.block_until_ready(
        property_forward(params, cart, ef, numatoms, species, atom_index, shifts)
    )

    # validate against pure-JAX energy and autograd force
    ene_ref = _energy_ref(params, cart, ef, numatoms, species).reshape(B, 1)
    force_ref = -jax.grad(
        lambda c: jnp.sum(_energy_ref(params, c, ef, numatoms, species))
    )(cart).reshape(B, N * 3)

    np.testing.assert_allclose(np.asarray(varene), np.asarray(ene_ref),
                               rtol=5e-3, atol=5e-4)
    np.testing.assert_allclose(np.asarray(force), np.asarray(force_ref),
                               rtol=5e-3, atol=5e-4)

    print("KERNEL_OK")
</pallas_src>

<mosaic_0001>
module attributes {stable_mosaic.version = 11 : i64} {
  func.func @_property_kernel(%arg0: i32, %arg1: memref<2x5x8xf32, #tpu.memory_space<vmem>>, %arg2: memref<2x5x8xf32, #tpu.memory_space<vmem>>, %arg3: memref<2x5x1xf32, #tpu.memory_space<vmem>>, %arg4: memref<16x2x1x8xf32, #tpu.memory_space<vmem>>, %arg5: memref<2x1x1xi32, #tpu.memory_space<vmem>>, %arg6: memref<1x16xf32, #tpu.memory_space<vmem>>, %arg7: memref<1x16xf32, #tpu.memory_space<vmem>>, %arg8: memref<16x32xf32, #tpu.memory_space<vmem>>, %arg9: memref<32x16xf32, #tpu.memory_space<vmem>>, %arg10: memref<1x32xf32, #tpu.memory_space<vmem>>, %arg11: memref<1x32xf32, #tpu.memory_space<vmem>>, %arg12: memref<32x1xf32, #tpu.memory_space<vmem>>, %arg13: memref<1x32xf32, #tpu.memory_space<vmem>>, %arg14: memref<2x1x1xf32, #tpu.memory_space<vmem>>, %arg15: memref<2x3x8xf32, #tpu.memory_space<vmem>>, %arg16: memref<16x2x8x8xf32, #tpu.memory_space<vmem>>) attributes {dimension_semantics = [#tpu.dimension_semantics<parallel>], iteration_bounds = array<i64: 1>, scalar_prefetch = 0 : i64, scratch_operands = 1 : i64, tpu.core_type = #tpu.core_type<tc>, window_params = [{transform_indices = @transform_0, window_bounds = array<i64: 2, 5, 8>}, {transform_indices = @transform_1, window_bounds = array<i64: 2, 5, 8>}, {transform_indices = @transform_2, window_bounds = array<i64: 2, 5, 1>}, {transform_indices = @transform_3, window_bounds = array<i64: 16, 2, 1, 8>}, {transform_indices = @transform_4, window_bounds = array<i64: 2, 1, 1>}, {pipeline_mode = #tpu.pipeline_mode<synchronous>, transform_indices = @transform_5, window_bounds = array<i64: 1, 16>}, {pipeline_mode = #tpu.pipeline_mode<synchronous>, transform_indices = @transform_6, window_bounds = array<i64: 1, 16>}, {pipeline_mode = #tpu.pipeline_mode<synchronous>, transform_indices = @transform_7, window_bounds = array<i64: 16, 32>}, {pipeline_mode = #tpu.pipeline_mode<synchronous>, transform_indices = @transform_8, window_bounds = array<i64: 32, 16>}, {pipeline_mode = #tpu.pipeline_mode<synchronous>, transform_indices = @transform_9, window_bounds = array<i64: 1, 32>}, {pipeline_mode = #tpu.pipeline_mode<synchronous>, transform_indices = @transform_10, window_bounds = array<i64: 1, 32>}, {pipeline_mode = #tpu.pipeline_mode<synchronous>, transform_indices = @transform_11, window_bounds = array<i64: 32, 1>}, {pipeline_mode = #tpu.pipeline_mode<synchronous>, transform_indices = @transform_12, window_bounds = array<i64: 1, 32>}, {transform_indices = @transform_13, window_bounds = array<i64: 2, 1, 1>}, {transform_indices = @transform_14, window_bounds = array<i64: 2, 3, 8>}]} {
    %c0 = arith.constant 0 : index
    %c0_0 = arith.constant 0 : index
    %c0_1 = arith.constant 0 : index
    %0 = vector.load %arg1[%c0, %c0_0, %c0_1] : memref<2x5x8xf32, #tpu.memory_space<vmem>>, vector<2x5x8xf32>
    %c0_2 = arith.constant 0 : index
    %c0_3 = arith.constant 0 : index
    %c0_4 = arith.constant 0 : index
    %1 = vector.load %arg2[%c0_2, %c0_3, %c0_4] : memref<2x5x8xf32, #tpu.memory_space<vmem>>, vector<2x5x8xf32>
    %c0_5 = arith.constant 0 : index
    %c0_6 = arith.constant 0 : index
    %c0_7 = arith.constant 0 : index
    %2 = vector.load %arg5[%c0_5, %c0_6, %c0_7] : memref<2x1x1xi32, #tpu.memory_space<vmem>>, vector<2x1x1xi32>
    %3 = tpu.iota {dimensions = array<i32: 1>} : vector<2x8x8xi32>
    %4 = tpu.iota {dimensions = array<i32: 2>} : vector<2x8x8xi32>
    %5 = vector.broadcast %2 : vector<2x1x1xi32> to vector<2x8x8xi32>
    %6 = arith.cmpi slt, %3, %5 : vector<2x8x8xi32>
    %7 = vector.broadcast %2 : vector<2x1x1xi32> to vector<2x8x8xi32>
    %8 = arith.cmpi slt, %4, %7 : vector<2x8x8xi32>
    %9 = arith.andi %6, %8 : vector<2x8x8xi1>
    %10 = arith.cmpi ne, %3, %4 : vector<2x8x8xi32>
    %11 = arith.andi %9, %10 : vector<2x8x8xi1>
    %12 = arith.extui %11 : vector<2x8x8xi1> to vector<2x8x8xi32>
    %13 = arith.sitofp %12 : vector<2x8x8xi32> to vector<2x8x8xf32>
    %14 = tpu.iota {dimensions = array<i32: 1>} : vector<2x8x1xi32>
    %15 = vector.broadcast %2 : vector<2x1x1xi32> to vector<2x8x1xi32>
    %16 = arith.cmpi slt, %14, %15 : vector<2x8x1xi32>
    %17 = arith.extui %16 : vector<2x8x1xi1> to vector<2x8x1xi32>
    %18 = arith.sitofp %17 : vector<2x8x1xi32> to vector<2x8x1xf32>
    %19 = vector.shape_cast %18 : vector<2x8x1xf32> to vector<16x1xf32>
    %cst = arith.constant dense<0.000000e+00> : vector<2x8x8xf32>
    %20 = tpu.matmul %1, %0, %cst {dimension_numbers = #tpu.dot_dimension_numbers<[1], [1], [2], [2], [0, 0, 0, 2, 1, 2], [0], [0]>} : vector<2x5x8xf32>, vector<2x5x8xf32>, vector<2x8x8xf32> -> vector<2x8x8xf32>
    %c0_8 = arith.constant 0 : index
    %c0_9 = arith.constant 0 : index
    %c0_10 = arith.constant 0 : index
    %21 = vector.load %arg3[%c0_8, %c0_9, %c0_10] : memref<2x5x1xf32, #tpu.memory_space<vmem>>, vector<2x5x1xf32>
    %cst_11 = arith.constant dense<0.000000e+00> : vector<2x8x1xf32>
    %22 = tpu.matmul %0, %21, %cst_11 {dimension_numbers = #tpu.dot_dimension_numbers<[1], [1], [2], [2], [0, 0, 0, 2, 1, 2], [0], [0]>} : vector<2x5x8xf32>, vector<2x5x1xf32>, vector<2x8x1xf32> -> vector<2x8x1xf32>
    %23 = vector.shape_cast %22 : vector<2x8x1xf32> to vector<16x1xf32>
    %c0_12 = arith.constant 0 : index
    %c0_13 = arith.constant 0 : index
    %24 = vector.load %arg10[%c0_12, %c0_13] : memref<1x32xf32, #tpu.memory_space<vmem>>, vector<1x32xf32>
    %25 = vector.broadcast %23 : vector<16x1xf32> to vector<16x32xf32>
    %26 = vector.broadcast %24 : vector<1x32xf32> to vector<16x32xf32>
    %27 = arith.mulf %25, %26 : vector<16x32xf32>
    %c0_14 = arith.constant 0 : index
    %c0_15 = arith.constant 0 : index
    %28 = vector.load %arg11[%c0_14, %c0_15] : memref<1x32xf32, #tpu.memory_space<vmem>>, vector<1x32xf32>
    %29 = vector.broadcast %28 : vector<1x32xf32> to vector<16x32xf32>
    %30 = arith.addf %27, %29 : vector<16x32xf32>
    %cst_16 = arith.constant 1.000000e+00 : f32
    %31 = vector.broadcast %cst_16 : f32 to vector<8x1xf32>
    %c0_17 = arith.constant 0 : index
    %c0_18 = arith.constant 0 : index
    %32 = vector.load %arg6[%c0_17, %c0_18] : memref<1x16xf32, #tpu.memory_space<vmem>>, vector<1x1xf32>
    %cst_19 = arith.constant 0.000000e+00 : f32
    %33 = vector.broadcast %cst_19 : f32 to vector<1x1xf32>
    %34 = arith.subf %33, %32 : vector<1x1xf32>
    %35 = vector.shape_cast %34 : vector<1x1xf32> to vector<1x1x1xf32>
    %36 = vector.broadcast %35 : vector<1x1x1xf32> to vector<2x8x8xf32>
    %37 = arith.mulf %20, %36 : vector<2x8x8xf32>
    %38 = math.exp %37 : vector<2x8x8xf32>
    %39 = arith.mulf %13, %38 : vector<2x8x8xf32>
    %c0_20 = arith.constant 0 : index
    %c0_21 = arith.constant 0 : index
    %c0_22 = arith.constant 0 : index
    %c0_23 = arith.constant 0 : index
    %40 = vector.load %arg4[%c0_20, %c0_21, %c0_22, %c0_23] : memref<16x2x1x8xf32, #tpu.memory_space<vmem>>, vector<1x2x1x8xf32>
    %41 = vector.shape_cast %40 : vector<1x2x1x8xf32> to vector<2x1x8xf32>
    %42 = vector.broadcast %41 : vector<2x1x8xf32> to vector<2x8x8xf32>
    %43 = arith.mulf %39, %42 : vector<2x8x8xf32>
    %c0_24 = arith.constant 0 : index
    %c0_25 = arith.constant 0 : index
    %c0_26 = arith.constant 0 : index
    %c0_27 = arith.constant 0 : index
    %44 = vector.load %arg16[%c0_24, %c0_25, %c0_26, %c0_27] : memref<16x2x8x8xf32, #tpu.memory_space<vmem>>, vector<1x2x8x8xf32>
    %45 = vector.shape_cast %44 : vector<1x2x8x8xf32> to vector<2x8x8xf32>
    %46 = vector.shape_cast %43 : vector<2x8x8xf32> to vector<1x2x8x8xf32>
    tpu.vector_store %arg16[%c0_24, %c0_25, %c0_26, %c0_27], %46 {strides = array<i32>} : memref<16x2x8x8xf32, #tpu.memory_space<vmem>>, vector<1x2x8x8xf32>,
    %47 = vector.shape_cast %43 : vector<2x8x8xf32> to vector<16x8xf32>
    %cst_28 = arith.constant dense<0.000000e+00> : vector<16x1xf32>
    %48 = tpu.matmul %47, %31, %cst_28 {dimension_numbers = #tpu.dot_dimension_numbers<[1], [0], [0], [1], [0, 0, 1, 1], [], []>} : vector<16x8xf32>, vector<8x1xf32>, vector<16x1xf32> -> vector<16x1xf32>
    %c0_29 = arith.constant 0 : index
    %c0_30 = arith.constant 0 : index
    %49 = vector.load %arg8[%c0_29, %c0_30] : memref<16x32xf32, #tpu.memory_space<vmem>>, vector<1x32xf32>
    %50 = vector.broadcast %48 : vector<16x1xf32> to vector<16x32xf32>
    %51 = vector.broadcast %49 : vector<1x32xf32> to vector<16x32xf32>
    %52 = arith.mulf %50, %51 : vector<16x32xf32>
    %53 = arith.addf %30, %52 : vector<16x32xf32>
    %c0_31 = arith.constant 0 : index
    %c1 = arith.constant 1 : index
    %54 = vector.load %arg6[%c0_31, %c1] : memref<1x16xf32, #tpu.memory_space<vmem>>, vector<1x1xf32>
    %cst_32 = arith.constant 0.000000e+00 : f32
    %55 = vector.broadcast %cst_32 : f32 to vector<1x1xf32>
    %56 = arith.subf %55, %54 : vector<1x1xf32>
    %57 = vector.shape_cast %56 : vector<1x1xf32> to vector<1x1x1xf32>
    %58 = vector.broadcast %57 : vector<1x1x1xf32> to vector<2x8x8xf32>
    %59 = arith.mulf %20, %58 : vector<2x8x8xf32>
    %60 = math.exp %59 : vector<2x8x8xf32>
    %61 = arith.mulf %13, %60 : vector<2x8x8xf32>
    %c1_33 = arith.constant 1 : index
    %c0_34 = arith.constant 0 : index
    %c0_35 = arith.constant 0 : index
    %c0_36 = arith.constant 0 : index
    %62 = vector.load %arg4[%c1_33, %c0_34, %c0_35, %c0_36] : memref<16x2x1x8xf32, #tpu.memory_space<vmem>>, vector<1x2x1x8xf32>
    %63 = vector.shape_cast %62 : vector<1x2x1x8xf32> to vector<2x1x8xf32>
    %64 = vector.broadcast %63 : vector<2x1x8xf32> to vector<2x8x8xf32>
    %65 = arith.mulf %61, %64 : vector<2x8x8xf32>
    %c1_37 = arith.constant 1 : index
    %c0_38 = arith.constant 0 : index
    %c0_39 = arith.constant 0 : index
    %c0_40 = arith.constant 0 : index
    %66 = vector.load %arg16[%c1_37, %c0_38, %c0_39, %c0_40] : memref<16x2x8x8xf32, #tpu.memory_space<vmem>>, vector<1x2x8x8xf32>
    %67 = vector.shape_cast %66 : vector<1x2x8x8xf32> to vector<2x8x8xf32>
    %68 = vector.shape_cast %65 : vector<2x8x8xf32> to vector<1x2x8x8xf32>
    tpu.vector_store %arg16[%c1_37, %c0_38, %c0_39, %c0_40], %68 {strides = array<i32>} : memref<16x2x8x8xf32, #tpu.memory_space<vmem>>, vector<1x2x8x8xf32>,
    %69 = vector.shape_cast %65 : vector<2x8x8xf32> to vector<16x8xf32>
    %cst_41 = arith.constant dense<0.000000e+00> : vector<16x1xf32>
    %70 = tpu.matmul %69, %31, %cst_41 {dimension_numbers = #tpu.dot_dimension_numbers<[1], [0], [0], [1], [0, 0, 1, 1], [], []>} : vector<16x8xf32>, vector<8x1xf32>, vector<16x1xf32> -> vector<16x1xf32>
    %c1_42 = arith.constant 1 : index
    %c0_43 = arith.constant 0 : index
    %71 = vector.load %arg8[%c1_42, %c0_43] : memref<16x32xf32, #tpu.memory_space<vmem>>, vector<1x32xf32>
    %72 = vector.broadcast %70 : vector<16x1xf32> to vector<16x32xf32>
    %73 = vector.broadcast %71 : vector<1x32xf32> to vector<16x32xf32>
    %74 = arith.mulf %72, %73 : vector<16x32xf32>
    %75 = arith.addf %53, %74 : vector<16x32xf32>
    %c0_44 = arith.constant 0 : index
    %c2 = arith.constant 2 : index
    %76 = vector.load %arg6[%c0_44, %c2] : memref<1x16xf32, #tpu.memory_space<vmem>>, vector<1x1xf32>
    %cst_45 = arith.constant 0.000000e+00 : f32
    %77 = vector.broadcast %cst_45 : f32 to vector<1x1xf32>
    %78 = arith.subf %77, %76 : vector<1x1xf32>
    %79 = vector.shape_cast %78 : vector<1x1xf32> to vector<1x1x1xf32>
    %80 = vector.broadcast %79 : vector<1x1x1xf32> to vector<2x8x8xf32>
    %81 = arith.mulf %20, %80 : vector<2x8x8xf32>
    %82 = math.exp %81 : vector<2x8x8xf32>
    %83 = arith.mulf %13, %82 : vector<2x8x8xf32>
    %c2_46 = arith.constant 2 : index
    %c0_47 = arith.constant 0 : index
    %c0_48 = arith.constant 0 : index
    %c0_49 = arith.constant 0 : index
    %84 = vector.load %arg4[%c2_46, %c0_47, %c0_48, %c0_49] : memref<16x2x1x8xf32, #tpu.memory_space<vmem>>, vector<1x2x1x8xf32>
    %85 = vector.shape_cast %84 : vector<1x2x1x8xf32> to vector<2x1x8xf32>
    %86 = vector.broadcast %85 : vector<2x1x8xf32> to vector<2x8x8xf32>
    %87 = arith.mulf %83, %86 : vector<2x8x8xf32>
    %c2_50 = arith.constant 2 : index
    %c0_51 = arith.constant 0 : index
    %c0_52 = arith.constant 0 : index
    %c0_53 = arith.constant 0 : index
    %88 = vector.load %arg16[%c2_50, %c0_51, %c0_52, %c0_53] : memref<16x2x8x8xf32, #tpu.memory_space<vmem>>, vector<1x2x8x8xf32>
    %89 = vector.shape_cast %88 : vector<1x2x8x8xf32> to vector<2x8x8xf32>
    %90 = vector.shape_cast %87 : vector<2x8x8xf32> to vector<1x2x8x8xf32>
    tpu.vector_store %arg16[%c2_50, %c0_51, %c0_52, %c0_53], %90 {strides = array<i32>} : memref<16x2x8x8xf32, #tpu.memory_space<vmem>>, vector<1x2x8x8xf32>,
    %91 = vector.shape_cast %87 : vector<2x8x8xf32> to vector<16x8xf32>
    %cst_54 = arith.constant dense<0.000000e+00> : vector<16x1xf32>
    %92 = tpu.matmul %91, %31, %cst_54 {dimension_numbers = #tpu.dot_dimension_numbers<[1], [0], [0], [1], [0, 0, 1, 1], [], []>} : vector<16x8xf32>, vector<8x1xf32>, vector<16x1xf32> -> vector<16x1xf32>
    %c2_55 = arith.constant 2 : index
    %c0_56 = arith.constant 0 : index
    %93 = vector.load %arg8[%c2_55, %c0_56] : memref<16x32xf32, #tpu.memory_space<vmem>>, vector<1x32xf32>
    %94 = vector.broadcast %92 : vector<16x1xf32> to vector<16x32xf32>
    %95 = vector.broadcast %93 : vector<1x32xf32> to vector<16x32xf32>
    %96 = arith.mulf %94, %95 : vector<16x32xf32>
    %97 = arith.addf %75, %96 : vector<16x32xf32>
    %c0_57 = arith.constant 0 : index
    %c3 = arith.constant 3 : index
    %98 = vector.load %arg6[%c0_57, %c3] : memref<1x16xf32, #tpu.memory_space<vmem>>, vector<1x1xf32>
    %cst_58 = arith.constant 0.000000e+00 : f32
    %99 = vector.broadcast %cst_58 : f32 to vector<1x1xf32>
    %100 = arith.subf %99, %98 : vector<1x1xf32>
    %101 = vector.shape_cast %100 : vector<1x1xf32> to vector<1x1x1xf32>
    %102 = vector.broadcast %101 : vector<1x1x1xf32> to vector<2x8x8xf32>
    %103 = arith.mulf %20, %102 : vector<2x8x8xf32>
    %104 = math.exp %103 : vector<2x8x8xf32>
    %105 = arith.mulf %13, %104 : vector<2x8x8xf32>
    %c3_59 = arith.constant 3 : index
    %c0_60 = arith.constant 0 : index
    %c0_61 = arith.constant 0 : index
    %c0_62 = arith.constant 0 : index
    %106 = vector.load %arg4[%c3_59, %c0_60, %c0_61, %c0_62] : memref<16x2x1x8xf32, #tpu.memory_space<vmem>>, vector<1x2x1x8xf32>
    %107 = vector.shape_cast %106 : vector<1x2x1x8xf32> to vector<2x1x8xf32>
    %108 = vector.broadcast %107 : vector<2x1x8xf32> to vector<2x8x8xf32>
    %109 = arith.mulf %105, %108 : vector<2x8x8xf32>
    %c3_63 = arith.constant 3 : index
    %c0_64 = arith.constant 0 : index
    %c0_65 = arith.constant 0 : index
    %c0_66 = arith.constant 0 : index
    %110 = vector.load %arg16[%c3_63, %c0_64, %c0_65, %c0_66] : memref<16x2x8x8xf32, #tpu.memory_space<vmem>>, vector<1x2x8x8xf32>
    %111 = vector.shape_cast %110 : vector<1x2x8x8xf32> to vector<2x8x8xf32>
    %112 = vector.shape_cast %109 : vector<2x8x8xf32> to vector<1x2x8x8xf32>
    tpu.vector_store %arg16[%c3_63, %c0_64, %c0_65, %c0_66], %112 {strides = array<i32>} : memref<16x2x8x8xf32, #tpu.memory_space<vmem>>, vector<1x2x8x8xf32>,
    %113 = vector.shape_cast %109 : vector<2x8x8xf32> to vector<16x8xf32>
    %cst_67 = arith.constant dense<0.000000e+00> : vector<16x1xf32>
    %114 = tpu.matmul %113, %31, %cst_67 {dimension_numbers = #tpu.dot_dimension_numbers<[1], [0], [0], [1], [0, 0, 1, 1], [], []>} : vector<16x8xf32>, vector<8x1xf32>, vector<16x1xf32> -> vector<16x1xf32>
    %c3_68 = arith.constant 3 : index
    %c0_69 = arith.constant 0 : index
    %115 = vector.load %arg8[%c3_68, %c0_69] : memref<16x32xf32, #tpu.memory_space<vmem>>, vector<1x32xf32>
    %116 = vector.broadcast %114 : vector<16x1xf32> to vector<16x32xf32>
    %117 = vector.broadcast %115 : vector<1x32xf32> to vector<16x32xf32>
    %118 = arith.mulf %116, %117 : vector<16x32xf32>
    %119 = arith.addf %97, %118 : vector<16x32xf32>
    %c0_70 = arith.constant 0 : index
    %c4 = arith.constant 4 : index
    %120 = vector.load %arg6[%c0_70, %c4] : memref<1x16xf32, #tpu.memory_space<vmem>>, vector<1x1xf32>
    %cst_71 = arith.constant 0.000000e+00 : f32
    %121 = vector.broadcast %cst_71 : f32 to vector<1x1xf32>
    %122 = arith.subf %121, %120 : vector<1x1xf32>
    %123 = vector.shape_cast %122 : vector<1x1xf32> to vector<1x1x1xf32>
    %124 = vector.broadcast %123 : vector<1x1x1xf32> to vector<2x8x8xf32>
    %125 = arith.mulf %20, %124 : vector<2x8x8xf32>
    %126 = math.exp %125 : vector<2x8x8xf32>
    %127 = arith.mulf %13, %126 : vector<2x8x8xf32>
    %c4_72 = arith.constant 4 : index
    %c0_73 = arith.constant 0 : index
    %c0_74 = arith.constant 0 : index
    %c0_75 = arith.constant 0 : index
    %128 = vector.load %arg4[%c4_72, %c0_73, %c0_74, %c0_75] : memref<16x2x1x8xf32, #tpu.memory_space<vmem>>, vector<1x2x1x8xf32>
    %129 = vector.shape_cast %128 : vector<1x2x1x8xf32> to vector<2x1x8xf32>
    %130 = vector.broadcast %129 : vector<2x1x8xf32> to vector<2x8x8xf32>
    %131 = arith.mulf %127, %130 : vector<2x8x8xf32>
    %c4_76 = arith.constant 4 : index
    %c0_77 = arith.constant 0 : index
    %c0_78 = arith.constant 0 : index
    %c0_79 = arith.constant 0 : index
    %132 = vector.load %arg16[%c4_76, %c0_77, %c0_78, %c0_79] : memref<16x2x8x8xf32, #tpu.memory_space<vmem>>, vector<1x2x8x8xf32>
    %133 = vector.shape_cast %132 : vector<1x2x8x8xf32> to vector<2x8x8xf32>
    %134 = vector.shape_cast %131 : vector<2x8x8xf32> to vector<1x2x8x8xf32>
    tpu.vector_store %arg16[%c4_76, %c0_77, %c0_78, %c0_79], %134 {strides = array<i32>} : memref<16x2x8x8xf32, #tpu.memory_space<vmem>>, vector<1x2x8x8xf32>,
    %135 = vector.shape_cast %131 : vector<2x8x8xf32> to vector<16x8xf32>
    %cst_80 = arith.constant dense<0.000000e+00> : vector<16x1xf32>
    %136 = tpu.matmul %135, %31, %cst_80 {dimension_numbers = #tpu.dot_dimension_numbers<[1], [0], [0], [1], [0, 0, 1, 1], [], []>} : vector<16x8xf32>, vector<8x1xf32>, vector<16x1xf32> -> vector<16x1xf32>
    %c4_81 = arith.constant 4 : index
    %c0_82 = arith.constant 0 : index
    %137 = vector.load %arg8[%c4_81, %c0_82] : memref<16x32xf32, #tpu.memory_space<vmem>>, vector<1x32xf32>
    %138 = vector.broadcast %136 : vector<16x1xf32> to vector<16x32xf32>
    %139 = vector.broadcast %137 : vector<1x32xf32> to vector<16x32xf32>
    %140 = arith.mulf %138, %139 : vector<16x32xf32>
    %141 = arith.addf %119, %140 : vector<16x32xf32>
    %c0_83 = arith.constant 0 : index
    %c5 = arith.constant 5 : index
    %142 = vector.load %arg6[%c0_83, %c5] : memref<1x16xf32, #tpu.memory_space<vmem>>, vector<1x1xf32>
    %cst_84 = arith.constant 0.000000e+00 : f32
    %143 = vector.broadcast %cst_84 : f32 to vector<1x1xf32>
    %144 = arith.subf %143, %142 : vector<1x1xf32>
    %145 = vector.shape_cast %144 : vector<1x1xf32> to vector<1x1x1xf32>
    %146 = vector.broadcast %145 : vector<1x1x1xf32> to vector<2x8x8xf32>
    %147 = arith.mulf %20, %146 : vector<2x8x8xf32>
    %148 = math.exp %147 : vector<2x8x8xf32>
    %149 = arith.mulf %13, %148 : vector<2x8x8xf32>
    %c5_85 = arith.constant 5 : index
    %c0_86 = arith.constant 0 : index
    %c0_87 = arith.constant 0 : index
    %c0_88 = arith.constant 0 : index
    %150 = vector.load %arg4[%c5_85, %c0_86, %c0_87, %c0_88] : memref<16x2x1x8xf32, #tpu.memory_space<vmem>>, vector<1x2x1x8xf32>
    %151 = vector.shape_cast %150 : vector<1x2x1x8xf32> to vector<2x1x8xf32>
    %152 = vector.broadcast %151 : vector<2x1x8xf32> to vector<2x8x8xf32>
    %153 = arith.mulf %149, %152 : vector<2x8x8xf32>
    %c5_89 = arith.constant 5 : index
    %c0_90 = arith.constant 0 : index
    %c0_91 = arith.constant 0 : index
    %c0_92 = arith.constant 0 : index
    %154 = vector.load %arg16[%c5_89, %c0_90, %c0_91, %c0_92] : memref<16x2x8x8xf32, #tpu.memory_space<vmem>>, vector<1x2x8x8xf32>
    %155 = vector.shape_cast %154 : vector<1x2x8x8xf32> to vector<2x8x8xf32>
    %156 = vector.shape_cast %153 : vector<2x8x8xf32> to vector<1x2x8x8xf32>
    tpu.vector_store %arg16[%c5_89, %c0_90, %c0_91, %c0_92], %156 {strides = array<i32>} : memref<16x2x8x8xf32, #tpu.memory_space<vmem>>, vector<1x2x8x8xf32>,
    %157 = vector.shape_cast %153 : vector<2x8x8xf32> to vector<16x8xf32>
    %cst_93 = arith.constant dense<0.000000e+00> : vector<16x1xf32>
    %158 = tpu.matmul %157, %31, %cst_93 {dimension_numbers = #tpu.dot_dimension_numbers<[1], [0], [0], [1], [0, 0, 1, 1], [], []>} : vector<16x8xf32>, vector<8x1xf32>, vector<16x1xf32> -> vector<16x1xf32>
    %c5_94 = arith.constant 5 : index
    %c0_95 = arith.constant 0 : index
    %159 = vector.load %arg8[%c5_94, %c0_95] : memref<16x32xf32, #tpu.memory_space<vmem>>, vector<1x32xf32>
    %160 = vector.broadcast %158 : vector<16x1xf32> to vector<16x32xf32>
    %161 = vector.broadcast %159 : vector<1x32xf32> to vector<16x32xf32>
    %162 = arith.mulf %160, %161 : vector<16x32xf32>
    %163 = arith.addf %141, %162 : vector<16x32xf32>
    %c0_96 = arith.constant 0 : index
    %c6 = arith.constant 6 : index
    %164 = vector.load %arg6[%c0_96, %c6] : memref<1x16xf32, #tpu.memory_space<vmem>>, vector<1x1xf32>
    %cst_97 = arith.constant 0.000000e+00 : f32
    %165 = vector.broadcast %cst_97 : f32 to vector<1x1xf32>
    %166 = arith.subf %165, %164 : vector<1x1xf32>
    %167 = vector.shape_cast %166 : vector<1x1xf32> to vector<1x1x1xf32>
    %168 = vector.broadcast %167 : vector<1x1x1xf32> to vector<2x8x8xf32>
    %169 = arith.mulf %20, %168 : vector<2x8x8xf32>
    %170 = math.exp %169 : vector<2x8x8xf32>
    %171 = arith.mulf %13, %170 : vector<2x8x8xf32>
    %c6_98 = arith.constant 6 : index
    %c0_99 = arith.constant 0 : index
    %c0_100 = arith.constant 0 : index
    %c0_101 = arith.constant 0 : index
    %172 = vector.load %arg4[%c6_98, %c0_99, %c0_100, %c0_101] : memref<16x2x1x8xf32, #tpu.memory_space<vmem>>, vector<1x2x1x8xf32>
    %173 = vector.shape_cast %172 : vector<1x2x1x8xf32> to vector<2x1x8xf32>
    %174 = vector.broadcast %173 : vector<2x1x8xf32> to vector<2x8x8xf32>
    %175 = arith.mulf %171, %174 : vector<2x8x8xf32>
    %c6_102 = arith.constant 6 : index
    %c0_103 = arith.constant 0 : index
    %c0_104 = arith.constant 0 : index
    %c0_105 = arith.constant 0 : index
    %176 = vector.load %arg16[%c6_102, %c0_103, %c0_104, %c0_105] : memref<16x2x8x8xf32, #tpu.memory_space<vmem>>, vector<1x2x8x8xf32>
    %177 = vector.shape_cast %176 : vector<1x2x8x8xf32> to vector<2x8x8xf32>
    %178 = vector.shape_cast %175 : vector<2x8x8xf32> to vector<1x2x8x8xf32>
    tpu.vector_store %arg16[%c6_102, %c0_103, %c0_104, %c0_105], %178 {strides = array<i32>} : memref<16x2x8x8xf32, #tpu.memory_space<vmem>>, vector<1x2x8x8xf32>,
    %179 = vector.shape_cast %175 : vector<2x8x8xf32> to vector<16x8xf32>
    %cst_106 = arith.constant dense<0.000000e+00> : vector<16x1xf32>
    %180 = tpu.matmul %179, %31, %cst_106 {dimension_numbers = #tpu.dot_dimension_numbers<[1], [0], [0], [1], [0, 0, 1, 1], [], []>} : vector<16x8xf32>, vector<8x1xf32>, vector<16x1xf32> -> vector<16x1xf32>
    %c6_107 = arith.constant 6 : index
    %c0_108 = arith.constant 0 : index
    %181 = vector.load %arg8[%c6_107, %c0_108] : memref<16x32xf32, #tpu.memory_space<vmem>>, vector<1x32xf32>
    %182 = vector.broadcast %180 : vector<16x1xf32> to vector<16x32xf32>
    %183 = vector.broadcast %181 : vector<1x32xf32> to vector<16x32xf32>
    %184 = arith.mulf %182, %183 : vector<16x32xf32>
    %185 = arith.addf %163, %184 : vector<16x32xf32>
    %c0_109 = arith.constant 0 : index
    %c7 = arith.constant 7 : index
    %186 = vector.load %arg6[%c0_109, %c7] : memref<1x16xf32, #tpu.memory_space<vmem>>, vector<1x1xf32>
    %cst_110 = arith.constant 0.000000e+00 : f32
    %187 = vector.broadcast %cst_110 : f32 to vector<1x1xf32>
    %188 = arith.subf %187, %186 : vector<1x1xf32>
    %189 = vector.shape_cast %188 : vector<1x1xf32> to vector<1x1x1xf32>
    %190 = vector.broadcast %189 : vector<1x1x1xf32> to vector<2x8x8xf32>
    %191 = arith.mulf %20, %190 : vector<2x8x8xf32>
    %192 = math.exp %191 : vector<2x8x8xf32>
    %193 = arith.mulf %13, %192 : vector<2x8x8xf32>
    %c7_111 = arith.constant 7 : index
    %c0_112 = arith.constant 0 : index
    %c0_113 = arith.constant 0 : index
    %c0_114 = arith.constant 0 : index
    %194 = vector.load %arg4[%c7_111, %c0_112, %c0_113, %c0_114] : memref<16x2x1x8xf32, #tpu.memory_space<vmem>>, vector<1x2x1x8xf32>
    %195 = vector.shape_cast %194 : vector<1x2x1x8xf32> to vector<2x1x8xf32>
    %196 = vector.broadcast %195 : vector<2x1x8xf32> to vector<2x8x8xf32>
    %197 = arith.mulf %193, %196 : vector<2x8x8xf32>
    %c7_115 = arith.constant 7 : index
    %c0_116 = arith.constant 0 : index
    %c0_117 = arith.constant 0 : index
    %c0_118 = arith.constant 0 : index
    %198 = vector.load %arg16[%c7_115, %c0_116, %c0_117, %c0_118] : memref<16x2x8x8xf32, #tpu.memory_space<vmem>>, vector<1x2x8x8xf32>
    %199 = vector.shape_cast %198 : vector<1x2x8x8xf32> to vector<2x8x8xf32>
    %200 = vector.shape_cast %197 : vector<2x8x8xf32> to vector<1x2x8x8xf32>
    tpu.vector_store %arg16[%c7_115, %c0_116, %c0_117, %c0_118], %200 {strides = array<i32>} : memref<16x2x8x8xf32, #tpu.memory_space<vmem>>, vector<1x2x8x8xf32>,
    %201 = vector.shape_cast %197 : vector<2x8x8xf32> to vector<16x8xf32>
    %cst_119 = arith.constant dense<0.000000e+00> : vector<16x1xf32>
    %202 = tpu.matmul %201, %31, %cst_119 {dimension_numbers = #tpu.dot_dimension_numbers<[1], [0], [0], [1], [0, 0, 1, 1], [], []>} : vector<16x8xf32>, vector<8x1xf32>, vector<16x1xf32> -> vector<16x1xf32>
    %c7_120 = arith.constant 7 : index
    %c0_121 = arith.constant 0 : index
    %203 = vector.load %arg8[%c7_120, %c0_121] : memref<16x32xf32, #tpu.memory_space<vmem>>, vector<1x32xf32>
    %204 = vector.broadcast %202 : vector<16x1xf32> to vector<16x32xf32>
    %205 = vector.broadcast %203 : vector<1x32xf32> to vector<16x32xf32>
    %206 = arith.mulf %204, %205 : vector<16x32xf32>
    %207 = arith.addf %185, %206 : vector<16x32xf32>
    %c0_122 = arith.constant 0 : index
    %c8 = arith.constant 8 : index
    %208 = vector.load %arg6[%c0_122, %c8] : memref<1x16xf32, #tpu.memory_space<vmem>>, vector<1x1xf32>
    %cst_123 = arith.constant 0.000000e+00 : f32
    %209 = vector.broadcast %cst_123 : f32 to vector<1x1xf32>
    %210 = arith.subf %209, %208 : vector<1x1xf32>
    %211 = vector.shape_cast %210 : vector<1x1xf32> to vector<1x1x1xf32>
    %212 = vector.broadcast %211 : vector<1x1x1xf32> to vector<2x8x8xf32>
    %213 = arith.mulf %20, %212 : vector<2x8x8xf32>
    %214 = math.exp %213 : vector<2x8x8xf32>
    %215 = arith.mulf %13, %214 : vector<2x8x8xf32>
    %c8_124 = arith.constant 8 : index
    %c0_125 = arith.constant 0 : index
    %c0_126 = arith.constant 0 : index
    %c0_127 = arith.constant 0 : index
    %216 = vector.load %arg4[%c8_124, %c0_125, %c0_126, %c0_127] : memref<16x2x1x8xf32, #tpu.memory_space<vmem>>, vector<1x2x1x8xf32>
    %217 = vector.shape_cast %216 : vector<1x2x1x8xf32> to vector<2x1x8xf32>
    %218 = vector.broadcast %217 : vector<2x1x8xf32> to vector<2x8x8xf32>
    %219 = arith.mulf %215, %218 : vector<2x8x8xf32>
    %c8_128 = arith.constant 8 : index
    %c0_129 = arith.constant 0 : index
    %c0_130 = arith.constant 0 : index
    %c0_131 = arith.constant 0 : index
    %220 = vector.load %arg16[%c8_128, %c0_129, %c0_130, %c0_131] : memref<16x2x8x8xf32, #tpu.memory_space<vmem>>, vector<1x2x8x8xf32>
    %221 = vector.shape_cast %220 : vector<1x2x8x8xf32> to vector<2x8x8xf32>
    %222 = vector.shape_cast %219 : vector<2x8x8xf32> to vector<1x2x8x8xf32>
    tpu.vector_store %arg16[%c8_128, %c0_129, %c0_130, %c0_131], %222 {strides = array<i32>} : memref<16x2x8x8xf32, #tpu.memory_space<vmem>>, vector<1x2x8x8xf32>,
    %223 = vector.shape_cast %219 : vector<2x8x8xf32> to vector<16x8xf32>
    %cst_132 = arith.constant dense<0.000000e+00> : vector<16x1xf32>
    %224 = tpu.matmul %223, %31, %cst_132 {dimension_numbers = #tpu.dot_dimension_numbers<[1], [0], [0], [1], [0, 0, 1, 1], [], []>} : vector<16x8xf32>, vector<8x1xf32>, vector<16x1xf32> -> vector<16x1xf32>
    %c8_133 = arith.constant 8 : index
    %c0_134 = arith.constant 0 : index
    %225 = vector.load %arg8[%c8_133, %c0_134] : memref<16x32xf32, #tpu.memory_space<vmem>>, vector<1x32xf32>
    %226 = vector.broadcast %224 : vector<16x1xf32> to vector<16x32xf32>
    %227 = vector.broadcast %225 : vector<1x32xf32> to vector<16x32xf32>
    %228 = arith.mulf %226, %227 : vector<16x32xf32>
    %229 = arith.addf %207, %228 : vector<16x32xf32>
    %c0_135 = arith.constant 0 : index
    %c9 = arith.constant 9 : index
    %230 = vector.load %arg6[%c0_135, %c9] : memref<1x16xf32, #tpu.memory_space<vmem>>, vector<1x1xf32>
    %cst_136 = arith.constant 0.000000e+00 : f32
    %231 = vector.broadcast %cst_136 : f32 to vector<1x1xf32>
    %232 = arith.subf %231, %230 : vector<1x1xf32>
    %233 = vector.shape_cast %232 : vector<1x1xf32> to vector<1x1x1xf32>
    %234 = vector.broadcast %233 : vector<1x1x1xf32> to vector<2x8x8xf32>
    %235 = arith.mulf %20, %234 : vector<2x8x8xf32>
    %236 = math.exp %235 : vector<2x8x8xf32>
    %237 = arith.mulf %13, %236 : vector<2x8x8xf32>
    %c9_137 = arith.constant 9 : index
    %c0_138 = arith.constant 0 : index
    %c0_139 = arith.constant 0 : index
    %c0_140 = arith.constant 0 : index
    %238 = vector.load %arg4[%c9_137, %c0_138, %c0_139, %c0_140] : memref<16x2x1x8xf32, #tpu.memory_space<vmem>>, vector<1x2x1x8xf32>
    %239 = vector.shape_cast %238 : vector<1x2x1x8xf32> to vector<2x1x8xf32>
    %240 = vector.broadcast %239 : vector<2x1x8xf32> to vector<2x8x8xf32>
    %241 = arith.mulf %237, %240 : vector<2x8x8xf32>
    %c9_141 = arith.constant 9 : index
    %c0_142 = arith.constant 0 : index
    %c0_143 = arith.constant 0 : index
    %c0_144 = arith.constant 0 : index
    %242 = vector.load %arg16[%c9_141, %c0_142, %c0_143, %c0_144] : memref<16x2x8x8xf32, #tpu.memory_space<vmem>>, vector<1x2x8x8xf32>
    %243 = vector.shape_cast %242 : vector<1x2x8x8xf32> to vector<2x8x8xf32>
    %244 = vector.shape_cast %241 : vector<2x8x8xf32> to vector<1x2x8x8xf32>
    tpu.vector_store %arg16[%c9_141, %c0_142, %c0_143, %c0_144], %244 {strides = array<i32>} : memref<16x2x8x8xf32, #tpu.memory_space<vmem>>, vector<1x2x8x8xf32>,
    %245 = vector.shape_cast %241 : vector<2x8x8xf32> to vector<16x8xf32>
    %cst_145 = arith.constant dense<0.000000e+00> : vector<16x1xf32>
    %246 = tpu.matmul %245, %31, %cst_145 {dimension_numbers = #tpu.dot_dimension_numbers<[1], [0], [0], [1], [0, 0, 1, 1], [], []>} : vector<16x8xf32>, vector<8x1xf32>, vector<16x1xf32> -> vector<16x1xf32>
    %c9_146 = arith.constant 9 : index
    %c0_147 = arith.constant 0 : index
    %247 = vector.load %arg8[%c9_146, %c0_147] : memref<16x32xf32, #tpu.memory_space<vmem>>, vector<1x32xf32>
    %248 = vector.broadcast %246 : vector<16x1xf32> to vector<16x32xf32>
    %249 = vector.broadcast %247 : vector<1x32xf32> to vector<16x32xf32>
    %250 = arith.mulf %248, %249 : vector<16x32xf32>
    %251 = arith.addf %229, %250 : vector<16x32xf32>
    %c0_148 = arith.constant 0 : index
    %c10 = arith.constant 10 : index
    %252 = vector.load %arg6[%c0_148, %c10] : memref<1x16xf32, #tpu.memory_space<vmem>>, vector<1x1xf32>
    %cst_149 = arith.constant 0.000000e+00 : f32
    %253 = vector.broadcast %cst_149 : f32 to vector<1x1xf32>
    %254 = arith.subf %253, %252 : vector<1x1xf32>
    %255 = vector.shape_cast %254 : vector<1x1xf32> to vector<1x1x1xf32>
    %256 = vector.broadcast %255 : vector<1x1x1xf32> to vector<2x8x8xf32>
    %257 = arith.mulf %20, %256 : vector<2x8x8xf32>
    %258 = math.exp %257 : vector<2x8x8xf32>
    %259 = arith.mulf %13, %258 : vector<2x8x8xf32>
    %c10_150 = arith.constant 10 : index
    %c0_151 = arith.constant 0 : index
    %c0_152 = arith.constant 0 : index
    %c0_153 = arith.constant 0 : index
    %260 = vector.load %arg4[%c10_150, %c0_151, %c0_152, %c0_153] : memref<16x2x1x8xf32, #tpu.memory_space<vmem>>, vector<1x2x1x8xf32>
    %261 = vector.shape_cast %260 : vector<1x2x1x8xf32> to vector<2x1x8xf32>
    %262 = vector.broadcast %261 : vector<2x1x8xf32> to vector<2x8x8xf32>
    %263 = arith.mulf %259, %262 : vector<2x8x8xf32>
    %c10_154 = arith.constant 10 : index
    %c0_155 = arith.constant 0 : index
    %c0_156 = arith.constant 0 : index
    %c0_157 = arith.constant 0 : index
    %264 = vector.load %arg16[%c10_154, %c0_155, %c0_156, %c0_157] : memref<16x2x8x8xf32, #tpu.memory_space<vmem>>, vector<1x2x8x8xf32>
    %265 = vector.shape_cast %264 : vector<1x2x8x8xf32> to vector<2x8x8xf32>
    %266 = vector.shape_cast %263 : vector<2x8x8xf32> to vector<1x2x8x8xf32>
    tpu.vector_store %arg16[%c10_154, %c0_155, %c0_156, %c0_157], %266 {strides = array<i32>} : memref<16x2x8x8xf32, #tpu.memory_space<vmem>>, vector<1x2x8x8xf32>,
    %267 = vector.shape_cast %263 : vector<2x8x8xf32> to vector<16x8xf32>
    %cst_158 = arith.constant dense<0.000000e+00> : vector<16x1xf32>
    %268 = tpu.matmul %267, %31, %cst_158 {dimension_numbers = #tpu.dot_dimension_numbers<[1], [0], [0], [1], [0, 0, 1, 1], [], []>} : vector<16x8xf32>, vector<8x1xf32>, vector<16x1xf32> -> vector<16x1xf32>
    %c10_159 = arith.constant 10 : index
    %c0_160 = arith.constant 0 : index
    %269 = vector.load %arg8[%c10_159, %c0_160] : memref<16x32xf32, #tpu.memory_space<vmem>>, vector<1x32xf32>
    %270 = vector.broadcast %268 : vector<16x1xf32> to vector<16x32xf32>
    %271 = vector.broadcast %269 : vector<1x32xf32> to vector<16x32xf32>
    %272 = arith.mulf %270, %271 : vector<16x32xf32>
    %273 = arith.addf %251, %272 : vector<16x32xf32>
    %c0_161 = arith.constant 0 : index
    %c11 = arith.constant 11 : index
    %274 = vector.load %arg6[%c0_161, %c11] : memref<1x16xf32, #tpu.memory_space<vmem>>, vector<1x1xf32>
    %cst_162 = arith.constant 0.000000e+00 : f32
    %275 = vector.broadcast %cst_162 : f32 to vector<1x1xf32>
    %276 = arith.subf %275, %274 : vector<1x1xf32>
    %277 = vector.shape_cast %276 : vector<1x1xf32> to vector<1x1x1xf32>
    %278 = vector.broadcast %277 : vector<1x1x1xf32> to vector<2x8x8xf32>
    %279 = arith.mulf %20, %278 : vector<2x8x8xf32>
    %280 = math.exp %279 : vector<2x8x8xf32>
    %281 = arith.mulf %13, %280 : vector<2x8x8xf32>
    %c11_163 = arith.constant 11 : index
    %c0_164 = arith.constant 0 : index
    %c0_165 = arith.constant 0 : index
    %c0_166 = arith.constant 0 : index
    %282 = vector.load %arg4[%c11_163, %c0_164, %c0_165, %c0_166] : memref<16x2x1x8xf32, #tpu.memory_space<vmem>>, vector<1x2x1x8xf32>
    %283 = vector.shape_cast %282 : vector<1x2x1x8xf32> to vector<2x1x8xf32>
    %284 = vector.broadcast %283 : vector<2x1x8xf32> to vector<2x8x8xf32>
    %285 = arith.mulf %281, %284 : vector<2x8x8xf32>
    %c11_167 = arith.constant 11 : index
    %c0_168 = arith.constant 0 : index
    %c0_169 = arith.constant 0 : index
    %c0_170 = arith.constant 0 : index
    %286 = vector.load %arg16[%c11_167, %c0_168, %c0_169, %c0_170] : memref<16x2x8x8xf32, #tpu.memory_space<vmem>>, vector<1x2x8x8xf32>
    %287 = vector.shape_cast %286 : vector<1x2x8x8xf32> to vector<2x8x8xf32>
    %288 = vector.shape_cast %285 : vector<2x8x8xf32> to vector<1x2x8x8xf32>
    tpu.vector_store %arg16[%c11_167, %c0_168, %c0_169, %c0_170], %288 {strides = array<i32>} : memref<16x2x8x8xf32, #tpu.memory_space<vmem>>, vector<1x2x8x8xf32>,
    %289 = vector.shape_cast %285 : vector<2x8x8xf32> to vector<16x8xf32>
    %cst_171 = arith.constant dense<0.000000e+00> : vector<16x1xf32>
    %290 = tpu.matmul %289, %31, %cst_171 {dimension_numbers = #tpu.dot_dimension_numbers<[1], [0], [0], [1], [0, 0, 1, 1], [], []>} : vector<16x8xf32>, vector<8x1xf32>, vector<16x1xf32> -> vector<16x1xf32>
    %c11_172 = arith.constant 11 : index
    %c0_173 = arith.constant 0 : index
    %291 = vector.load %arg8[%c11_172, %c0_173] : memref<16x32xf32, #tpu.memory_space<vmem>>, vector<1x32xf32>
    %292 = vector.broadcast %290 : vector<16x1xf32> to vector<16x32xf32>
    %293 = vector.broadcast %291 : vector<1x32xf32> to vector<16x32xf32>
    %294 = arith.mulf %292, %293 : vector<16x32xf32>
    %295 = arith.addf %273, %294 : vector<16x32xf32>
    %c0_174 = arith.constant 0 : index
    %c12 = arith.constant 12 : index
    %296 = vector.load %arg6[%c0_174, %c12] : memref<1x16xf32, #tpu.memory_space<vmem>>, vector<1x1xf32>
    %cst_175 = arith.constant 0.000000e+00 : f32
    %297 = vector.broadcast %cst_175 : f32 to vector<1x1xf32>
    %298 = arith.subf %297, %296 : vector<1x1xf32>
    %299 = vector.shape_cast %298 : vector<1x1xf32> to vector<1x1x1xf32>
    %300 = vector.broadcast %299 : vector<1x1x1xf32> to vector<2x8x8xf32>
    %301 = arith.mulf %20, %300 : vector<2x8x8xf32>
    %302 = math.exp %301 : vector<2x8x8xf32>
    %303 = arith.mulf %13, %302 : vector<2x8x8xf32>
    %c12_176 = arith.constant 12 : index
    %c0_177 = arith.constant 0 : index
    %c0_178 = arith.constant 0 : index
    %c0_179 = arith.constant 0 : index
    %304 = vector.load %arg4[%c12_176, %c0_177, %c0_178, %c0_179] : memref<16x2x1x8xf32, #tpu.memory_space<vmem>>, vector<1x2x1x8xf32>
    %305 = vector.shape_cast %304 : vector<1x2x1x8xf32> to vector<2x1x8xf32>
    %306 = vector.broadcast %305 : vector<2x1x8xf32> to vector<2x8x8xf32>
    %307 = arith.mulf %303, %306 : vector<2x8x8xf32>
    %c12_180 = arith.constant 12 : index
    %c0_181 = arith.constant 0 : index
    %c0_182 = arith.constant 0 : index
    %c0_183 = arith.constant 0 : index
    %308 = vector.load %arg16[%c12_180, %c0_181, %c0_182, %c0_183] : memref<16x2x8x8xf32, #tpu.memory_space<vmem>>, vector<1x2x8x8xf32>
    %309 = vector.shape_cast %308 : vector<1x2x8x8xf32> to vector<2x8x8xf32>
    %310 = vector.shape_cast %307 : vector<2x8x8xf32> to vector<1x2x8x8xf32>
    tpu.vector_store %arg16[%c12_180, %c0_181, %c0_182, %c0_183], %310 {strides = array<i32>} : memref<16x2x8x8xf32, #tpu.memory_space<vmem>>, vector<1x2x8x8xf32>,
    %311 = vector.shape_cast %307 : vector<2x8x8xf32> to vector<16x8xf32>
    %cst_184 = arith.constant dense<0.000000e+00> : vector<16x1xf32>
    %312 = tpu.matmul %311, %31, %cst_184 {dimension_numbers = #tpu.dot_dimension_numbers<[1], [0], [0], [1], [0, 0, 1, 1], [], []>} : vector<16x8xf32>, vector<8x1xf32>, vector<16x1xf32> -> vector<16x1xf32>
    %c12_185 = arith.constant 12 : index
    %c0_186 = arith.constant 0 : index
    %313 = vector.load %arg8[%c12_185, %c0_186] : memref<16x32xf32, #tpu.memory_space<vmem>>, vector<1x32xf32>
    %314 = vector.broadcast %312 : vector<16x1xf32> to vector<16x32xf32>
    %315 = vector.broadcast %313 : vector<1x32xf32> to vector<16x32xf32>
    %316 = arith.mulf %314, %315 : vector<16x32xf32>
    %317 = arith.addf %295, %316 : vector<16x32xf32>
    %c0_187 = arith.constant 0 : index
    %c13 = arith.constant 13 : index
    %318 = vector.load %arg6[%c0_187, %c13] : memref<1x16xf32, #tpu.memory_space<vmem>>, vector<1x1xf32>
    %cst_188 = arith.constant 0.000000e+00 : f32
    %319 = vector.broadcast %cst_188 : f32 to vector<1x1xf32>
    %320 = arith.subf %319, %318 : vector<1x1xf32>
    %321 = vector.shape_cast %320 : vector<1x1xf32> to vector<1x1x1xf32>
    %322 = vector.broadcast %321 : vector<1x1x1xf32> to vector<2x8x8xf32>
    %323 = arith.mulf %20, %322 : vector<2x8x8xf32>
    %324 = math.exp %323 : vector<2x8x8xf32>
    %325 = arith.mulf %13, %324 : vector<2x8x8xf32>
    %c13_189 = arith.constant 13 : index
    %c0_190 = arith.constant 0 : index
    %c0_191 = arith.constant 0 : index
    %c0_192 = arith.constant 0 : index
    %326 = vector.load %arg4[%c13_189, %c0_190, %c0_191, %c0_192] : memref<16x2x1x8xf32, #tpu.memory_space<vmem>>, vector<1x2x1x8xf32>
    %327 = vector.shape_cast %326 : vector<1x2x1x8xf32> to vector<2x1x8xf32>
    %328 = vector.broadcast %327 : vector<2x1x8xf32> to vector<2x8x8xf32>
    %329 = arith.mulf %325, %328 : vector<2x8x8xf32>
    %c13_193 = arith.constant 13 : index
    %c0_194 = arith.constant 0 : index
    %c0_195 = arith.constant 0 : index
    %c0_196 = arith.constant 0 : index
    %330 = vector.load %arg16[%c13_193, %c0_194, %c0_195, %c0_196] : memref<16x2x8x8xf32, #tpu.memory_space<vmem>>, vector<1x2x8x8xf32>
    %331 = vector.shape_cast %330 : vector<1x2x8x8xf32> to vector<2x8x8xf32>
    %332 = vector.shape_cast %329 : vector<2x8x8xf32> to vector<1x2x8x8xf32>
    tpu.vector_store %arg16[%c13_193, %c0_194, %c0_195, %c0_196], %332 {strides = array<i32>} : memref<16x2x8x8xf32, #tpu.memory_space<vmem>>, vector<1x2x8x8xf32>,
    %333 = vector.shape_cast %329 : vector<2x8x8xf32> to vector<16x8xf32>
    %cst_197 = arith.constant dense<0.000000e+00> : vector<16x1xf32>
    %334 = tpu.matmul %333, %31, %cst_197 {dimension_numbers = #tpu.dot_dimension_numbers<[1], [0], [0], [1], [0, 0, 1, 1], [], []>} : vector<16x8xf32>, vector<8x1xf32>, vector<16x1xf32> -> vector<16x1xf32>
    %c13_198 = arith.constant 13 : index
    %c0_199 = arith.constant 0 : index
    %335 = vector.load %arg8[%c13_198, %c0_199] : memref<16x32xf32, #tpu.memory_space<vmem>>, vector<1x32xf32>
    %336 = vector.broadcast %334 : vector<16x1xf32> to vector<16x32xf32>
    %337 = vector.broadcast %335 : vector<1x32xf32> to vector<16x32xf32>
    %338 = arith.mulf %336, %337 : vector<16x32xf32>
    %339 = arith.addf %317, %338 : vector<16x32xf32>
    %c0_200 = arith.constant 0 : index
    %c14 = arith.constant 14 : index
    %340 = vector.load %arg6[%c0_200, %c14] : memref<1x16xf32, #tpu.memory_space<vmem>>, vector<1x1xf32>
    %cst_201 = arith.constant 0.000000e+00 : f32
    %341 = vector.broadcast %cst_201 : f32 to vector<1x1xf32>
    %342 = arith.subf %341, %340 : vector<1x1xf32>
    %343 = vector.shape_cast %342 : vector<1x1xf32> to vector<1x1x1xf32>
    %344 = vector.broadcast %343 : vector<1x1x1xf32> to vector<2x8x8xf32>
    %345 = arith.mulf %20, %344 : vector<2x8x8xf32>
    %346 = math.exp %345 : vector<2x8x8xf32>
    %347 = arith.mulf %13, %346 : vector<2x8x8xf32>
    %c14_202 = arith.constant 14 : index
    %c0_203 = arith.constant 0 : index
    %c0_204 = arith.constant 0 : index
    %c0_205 = arith.constant 0 : index
    %348 = vector.load %arg4[%c14_202, %c0_203, %c0_204, %c0_205] : memref<16x2x1x8xf32, #tpu.memory_space<vmem>>, vector<1x2x1x8xf32>
    %349 = vector.shape_cast %348 : vector<1x2x1x8xf32> to vector<2x1x8xf32>
    %350 = vector.broadcast %349 : vector<2x1x8xf32> to vector<2x8x8xf32>
    %351 = arith.mulf %347, %350 : vector<2x8x8xf32>
    %c14_206 = arith.constant 14 : index
    %c0_207 = arith.constant 0 : index
    %c0_208 = arith.constant 0 : index
    %c0_209 = arith.constant 0 : index
    %352 = vector.load %arg16[%c14_206, %c0_207, %c0_208, %c0_209] : memref<16x2x8x8xf32, #tpu.memory_space<vmem>>, vector<1x2x8x8xf32>
    %353 = vector.shape_cast %352 : vector<1x2x8x8xf32> to vector<2x8x8xf32>
    %354 = vector.shape_cast %351 : vector<2x8x8xf32> to vector<1x2x8x8xf32>
    tpu.vector_store %arg16[%c14_206, %c0_207, %c0_208, %c0_209], %354 {strides = array<i32>} : memref<16x2x8x8xf32, #tpu.memory_space<vmem>>, vector<1x2x8x8xf32>,
    %355 = vector.shape_cast %351 : vector<2x8x8xf32> to vector<16x8xf32>
    %cst_210 = arith.constant dense<0.000000e+00> : vector<16x1xf32>
    %356 = tpu.matmul %355, %31, %cst_210 {dimension_numbers = #tpu.dot_dimension_numbers<[1], [0], [0], [1], [0, 0, 1, 1], [], []>} : vector<16x8xf32>, vector<8x1xf32>, vector<16x1xf32> -> vector<16x1xf32>
    %c14_211 = arith.constant 14 : index
    %c0_212 = arith.constant 0 : index
    %357 = vector.load %arg8[%c14_211, %c0_212] : memref<16x32xf32, #tpu.memory_space<vmem>>, vector<1x32xf32>
    %358 = vector.broadcast %356 : vector<16x1xf32> to vector<16x32xf32>
    %359 = vector.broadcast %357 : vector<1x32xf32> to vector<16x32xf32>
    %360 = arith.mulf %358, %359 : vector<16x32xf32>
    %361 = arith.addf %339, %360 : vector<16x32xf32>
    %c0_213 = arith.constant 0 : index
    %c15 = arith.constant 15 : index
    %362 = vector.load %arg6[%c0_213, %c15] : memref<1x16xf32, #tpu.memory_space<vmem>>, vector<1x1xf32>
    %cst_214 = arith.constant 0.000000e+00 : f32
    %363 = vector.broadcast %cst_214 : f32 to vector<1x1xf32>
    %364 = arith.subf %363, %362 : vector<1x1xf32>
    %365 = vector.shape_cast %364 : vector<1x1xf32> to vector<1x1x1xf32>
    %366 = vector.broadcast %365 : vector<1x1x1xf32> to vector<2x8x8xf32>
    %367 = arith.mulf %20, %366 : vector<2x8x8xf32>
    %368 = math.exp %367 : vector<2x8x8xf32>
    %369 = arith.mulf %13, %368 : vector<2x8x8xf32>
    %c15_215 = arith.constant 15 : index
    %c0_216 = arith.constant 0 : index
    %c0_217 = arith.constant 0 : index
    %c0_218 = arith.constant 0 : index
    %370 = vector.load %arg4[%c15_215, %c0_216, %c0_217, %c0_218] : memref<16x2x1x8xf32, #tpu.memory_space<vmem>>, vector<1x2x1x8xf32>
    %371 = vector.shape_cast %370 : vector<1x2x1x8xf32> to vector<2x1x8xf32>
    %372 = vector.broadcast %371 : vector<2x1x8xf32> to vector<2x8x8xf32>
    %373 = arith.mulf %369, %372 : vector<2x8x8xf32>
    %c15_219 = arith.constant 15 : index
    %c0_220 = arith.constant 0 : index
    %c0_221 = arith.constant 0 : index
    %c0_222 = arith.constant 0 : index
    %374 = vector.load %arg16[%c15_219, %c0_220, %c0_221, %c0_222] : memref<16x2x8x8xf32, #tpu.memory_space<vmem>>, vector<1x2x8x8xf32>
    %375 = vector.shape_cast %374 : vector<1x2x8x8xf32> to vector<2x8x8xf32>
    %376 = vector.shape_cast %373 : vector<2x8x8xf32> to vector<1x2x8x8xf32>
    tpu.vector_store %arg16[%c15_219, %c0_220, %c0_221, %c0_222], %376 {strides = array<i32>} : memref<16x2x8x8xf32, #tpu.memory_space<vmem>>, vector<1x2x8x8xf32>,
    %377 = vector.shape_cast %373 : vector<2x8x8xf32> to vector<16x8xf32>
    %cst_223 = arith.constant dense<0.000000e+00> : vector<16x1xf32>
    %378 = tpu.matmul %377, %31, %cst_223 {dimension_numbers = #tpu.dot_dimension_numbers<[1], [0], [0], [1], [0, 0, 1, 1], [], []>} : vector<16x8xf32>, vector<8x1xf32>, vector<16x1xf32> -> vector<16x1xf32>
    %c15_224 = arith.constant 15 : index
    %c0_225 = arith.constant 0 : index
    %379 = vector.load %arg8[%c15_224, %c0_225] : memref<16x32xf32, #tpu.memory_space<vmem>>, vector<1x32xf32>
    %380 = vector.broadcast %378 : vector<16x1xf32> to vector<16x32xf32>
    %381 = vector.broadcast %379 : vector<1x32xf32> to vector<16x32xf32>
    %382 = arith.mulf %380, %381 : vector<16x32xf32>
    %383 = arith.addf %361, %382 : vector<16x32xf32>
    %384 = math.tanh %383 : vector<16x32xf32>
    %c0_226 = arith.constant 0 : index
    %c0_227 = arith.constant 0 : index
    %385 = vector.load %arg12[%c0_226, %c0_227] : memref<32x1xf32, #tpu.memory_space<vmem>>, vector<32x1xf32>
    %cst_228 = arith.constant dense<0.000000e+00> : vector<16x1xf32>
    %386 = tpu.matmul %384, %385, %cst_228 {dimension_numbers = #tpu.dot_dimension_numbers<[1], [0], [0], [1], [0, 0, 1, 1], [], []>} : vector<16x32xf32>, vector<32x1xf32>, vector<16x1xf32> -> vector<16x1xf32>
    %387 = arith.mulf %386, %19 : vector<16x1xf32>
    %388 = vector.shape_cast %387 : vector<16x1xf32> to vector<2x8x1xf32>
    %cst_229 = arith.constant dense<0.000000e+00> : vector<2x1xf32>
    %389 = vector.multi_reduction <add>, %388, %cst_229 [1] : vector<2x8x1xf32> to vector<2x1xf32>
    %390 = vector.shape_cast %389 : vector<2x1xf32> to vector<2x1x1xf32>
    %c0_230 = arith.constant 0 : index
    %c0_231 = arith.constant 0 : index
    %c0_232 = arith.constant 0 : index
    %391 = vector.load %arg14[%c0_230, %c0_231, %c0_232] : memref<2x1x1xf32, #tpu.memory_space<vmem>>, vector<2x1x1xf32>
    tpu.vector_store %arg14[%c0_230, %c0_231, %c0_232], %390 {strides = array<i32>} : memref<2x1x1xf32, #tpu.memory_space<vmem>>, vector<2x1x1xf32>,
    %392 = arith.mulf %384, %384 : vector<16x32xf32>
    %cst_233 = arith.constant 1.000000e+00 : f32
    %393 = vector.broadcast %cst_233 : f32 to vector<16x32xf32>
    %394 = arith.subf %393, %392 : vector<16x32xf32>
    %c0_234 = arith.constant 0 : index
    %c0_235 = arith.constant 0 : index
    %395 = vector.load %arg13[%c0_234, %c0_235] : memref<1x32xf32, #tpu.memory_space<vmem>>, vector<1x32xf32>
    %396 = vector.broadcast %395 : vector<1x32xf32> to vector<16x32xf32>
    %397 = arith.mulf %394, %396 : vector<16x32xf32>
    %c0_236 = arith.constant 0 : index
    %c0_237 = arith.constant 0 : index
    %398 = vector.load %arg9[%c0_236, %c0_237] : memref<32x16xf32, #tpu.memory_space<vmem>>, vector<32x16xf32>
    %cst_238 = arith.constant dense<0.000000e+00> : vector<16x16xf32>
    %399 = tpu.matmul %397, %398, %cst_238 {dimension_numbers = #tpu.dot_dimension_numbers<[1], [0], [0], [1], [0, 0, 1, 1], [], []>} : vector<16x32xf32>, vector<32x16xf32>, vector<16x16xf32> -> vector<16x16xf32>
    %400 = vector.broadcast %19 : vector<16x1xf32> to vector<16x16xf32>
    %401 = arith.mulf %399, %400 : vector<16x16xf32>
    %402 = vector.shape_cast %401 : vector<16x16xf32> to vector<2x8x16xf32>
    %c0_239 = arith.constant 0 : index
    %c0_240 = arith.constant 0 : index
    %c0_241 = arith.constant 0 : index
    %403 = vector.load %arg3[%c0_239, %c0_240, %c0_241] : memref<2x5x1xf32, #tpu.memory_space<vmem>>, vector<2x5x1xf32>
    %404 = vector.extract_strided_slice %403 {offsets = [0, 0, 0], sizes = [2, 3, 1], strides = [1, 1, 1]} : vector<2x5x1xf32> to vector<2x3x1xf32>
    %c0_242 = arith.constant 0 : index
    %c0_243 = arith.constant 0 : index
    %405 = vector.load %arg7[%c0_242, %c0_243] : memref<1x16xf32, #tpu.memory_space<vmem>>, vector<1x16xf32>
    %406 = vector.shape_cast %405 : vector<1x16xf32> to vector<1x1x16xf32>
    %407 = vector.broadcast %404 : vector<2x3x1xf32> to vector<2x3x16xf32>
    %408 = vector.broadcast %406 : vector<1x1x16xf32> to vector<2x3x16xf32>
    %409 = arith.mulf %407, %408 : vector<2x3x16xf32>
    %cst_244 = arith.constant dense<0.000000e+00> : vector<2x3x8xf32>
    %410 = tpu.matmul %409, %402, %cst_244 {dimension_numbers = #tpu.dot_dimension_numbers<[2], [2], [1], [1], [0, 0, 0, 1, 1, 1], [0], [0]>} : vector<2x3x16xf32>, vector<2x8x16xf32>, vector<2x3x8xf32> -> vector<2x3x8xf32>
    %cst_245 = arith.constant 0.000000e+00 : f32
    %411 = vector.broadcast %cst_245 : f32 to vector<2x8x8xf32>
    %412 = vector.extract_strided_slice %402 {offsets = [0, 0, 0], sizes = [2, 8, 1], strides = [1, 1, 1]} : vector<2x8x16xf32> to vector<2x8x1xf32>
    %c0_246 = arith.constant 0 : index
    %c0_247 = arith.constant 0 : index
    %413 = vector.load %arg6[%c0_246, %c0_247] : memref<1x16xf32, #tpu.memory_space<vmem>>, vector<1x1xf32>
    %cst_248 = arith.constant 2.000000e+00 : f32
    %414 = vector.broadcast %cst_248 : f32 to vector<1x1xf32>
    %415 = arith.mulf %414, %413 : vector<1x1xf32>
    %416 = vector.shape_cast %415 : vector<1x1xf32> to vector<1x1x1xf32>
    %417 = vector.broadcast %416 : vector<1x1x1xf32> to vector<2x8x1xf32>
    %418 = arith.mulf %412, %417 : vector<2x8x1xf32>
    %c0_249 = arith.constant 0 : index
    %c0_250 = arith.constant 0 : index
    %c0_251 = arith.constant 0 : index
    %c0_252 = arith.constant 0 : index
    %419 = vector.load %arg16[%c0_249, %c0_250, %c0_251, %c0_252] : memref<16x2x8x8xf32, #tpu.memory_space<vmem>>, vector<1x2x8x8xf32>
    %420 = vector.shape_cast %419 : vector<1x2x8x8xf32> to vector<2x8x8xf32>
    %421 = vector.broadcast %418 : vector<2x8x1xf32> to vector<2x8x8xf32>
    %422 = arith.mulf %421, %420 : vector<2x8x8xf32>
    %423 = arith.addf %411, %422 : vector<2x8x8xf32>
    %424 = vector.extract_strided_slice %402 {offsets = [0, 0, 1], sizes = [2, 8, 1], strides = [1, 1, 1]} : vector<2x8x16xf32> to vector<2x8x1xf32>
    %c0_253 = arith.constant 0 : index
    %c1_254 = arith.constant 1 : index
    %425 = vector.load %arg6[%c0_253, %c1_254] : memref<1x16xf32, #tpu.memory_space<vmem>>, vector<1x1xf32>
    %cst_255 = arith.constant 2.000000e+00 : f32
    %426 = vector.broadcast %cst_255 : f32 to vector<1x1xf32>
    %427 = arith.mulf %426, %425 : vector<1x1xf32>
    %428 = vector.shape_cast %427 : vector<1x1xf32> to vector<1x1x1xf32>
    %429 = vector.broadcast %428 : vector<1x1x1xf32> to vector<2x8x1xf32>
    %430 = arith.mulf %424, %429 : vector<2x8x1xf32>
    %c1_256 = arith.constant 1 : index
    %c0_257 = arith.constant 0 : index
    %c0_258 = arith.constant 0 : index
    %c0_259 = arith.constant 0 : index
    %431 = vector.load %arg16[%c1_256, %c0_257, %c0_258, %c0_259] : memref<16x2x8x8xf32, #tpu.memory_space<vmem>>, vector<1x2x8x8xf32>
    %432 = vector.shape_cast %431 : vector<1x2x8x8xf32> to vector<2x8x8xf32>
    %433 = vector.broadcast %430 : vector<2x8x1xf32> to vector<2x8x8xf32>
    %434 = arith.mulf %433, %432 : vector<2x8x8xf32>
    %435 = arith.addf %423, %434 : vector<2x8x8xf32>
    %436 = vector.extract_strided_slice %402 {offsets = [0, 0, 2], sizes = [2, 8, 1], strides = [1, 1, 1]} : vector<2x8x16xf32> to vector<2x8x1xf32>
    %c0_260 = arith.constant 0 : index
    %c2_261 = arith.constant 2 : index
    %437 = vector.load %arg6[%c0_260, %c2_261] : memref<1x16xf32, #tpu.memory_space<vmem>>, vector<1x1xf32>
    %cst_262 = arith.constant 2.000000e+00 : f32
    %438 = vector.broadcast %cst_262 : f32 to vector<1x1xf32>
    %439 = arith.mulf %438, %437 : vector<1x1xf32>
    %440 = vector.shape_cast %439 : vector<1x1xf32> to vector<1x1x1xf32>
    %441 = vector.broadcast %440 : vector<1x1x1xf32> to vector<2x8x1xf32>
    %442 = arith.mulf %436, %441 : vector<2x8x1xf32>
    %c2_263 = arith.constant 2 : index
    %c0_264 = arith.constant 0 : index
    %c0_265 = arith.constant 0 : index
    %c0_266 = arith.constant 0 : index
    %443 = vector.load %arg16[%c2_263, %c0_264, %c0_265, %c0_266] : memref<16x2x8x8xf32, #tpu.memory_space<vmem>>, vector<1x2x8x8xf32>
    %444 = vector.shape_cast %443 : vector<1x2x8x8xf32> to vector<2x8x8xf32>
    %445 = vector.broadcast %442 : vector<2x8x1xf32> to vector<2x8x8xf32>
    %446 = arith.mulf %445, %444 : vector<2x8x8xf32>
    %447 = arith.addf %435, %446 : vector<2x8x8xf32>
    %448 = vector.extract_strided_slice %402 {offsets = [0, 0, 3], sizes = [2, 8, 1], strides = [1, 1, 1]} : vector<2x8x16xf32> to vector<2x8x1xf32>
    %c0_267 = arith.constant 0 : index
    %c3_268 = arith.constant 3 : index
    %449 = vector.load %arg6[%c0_267, %c3_268] : memref<1x16xf32, #tpu.memory_space<vmem>>, vector<1x1xf32>
    %cst_269 = arith.constant 2.000000e+00 : f32
    %450 = vector.broadcast %cst_269 : f32 to vector<1x1xf32>
    %451 = arith.mulf %450, %449 : vector<1x1xf32>
    %452 = vector.shape_cast %451 : vector<1x1xf32> to vector<1x1x1xf32>
    %453 = vector.broadcast %452 : vector<1x1x1xf32> to vector<2x8x1xf32>
    %454 = arith.mulf %448, %453 : vector<2x8x1xf32>
    %c3_270 = arith.constant 3 : index
    %c0_271 = arith.constant 0 : index
    %c0_272 = arith.constant 0 : index
    %c0_273 = arith.constant 0 : index
    %455 = vector.load %arg16[%c3_270, %c0_271, %c0_272, %c0_273] : memref<16x2x8x8xf32, #tpu.memory_space<vmem>>, vector<1x2x8x8xf32>
    %456 = vector.shape_cast %455 : vector<1x2x8x8xf32> to vector<2x8x8xf32>
    %457 = vector.broadcast %454 : vector<2x8x1xf32> to vector<2x8x8xf32>
    %458 = arith.mulf %457, %456 : vector<2x8x8xf32>
    %459 = arith.addf %447, %458 : vector<2x8x8xf32>
    %460 = vector.extract_strided_slice %402 {offsets = [0, 0, 4], sizes = [2, 8, 1], strides = [1, 1, 1]} : vector<2x8x16xf32> to vector<2x8x1xf32>
    %c0_274 = arith.constant 0 : index
    %c4_275 = arith.constant 4 : index
    %461 = vector.load %arg6[%c0_274, %c4_275] : memref<1x16xf32, #tpu.memory_space<vmem>>, vector<1x1xf32>
    %cst_276 = arith.constant 2.000000e+00 : f32
    %462 = vector.broadcast %cst_276 : f32 to vector<1x1xf32>
    %463 = arith.mulf %462, %461 : vector<1x1xf32>
    %464 = vector.shape_cast %463 : vector<1x1xf32> to vector<1x1x1xf32>
    %465 = vector.broadcast %464 : vector<1x1x1xf32> to vector<2x8x1xf32>
    %466 = arith.mulf %460, %465 : vector<2x8x1xf32>
    %c4_277 = arith.constant 4 : index
    %c0_278 = arith.constant 0 : index
    %c0_279 = arith.constant 0 : index
    %c0_280 = arith.constant 0 : index
    %467 = vector.load %arg16[%c4_277, %c0_278, %c0_279, %c0_280] : memref<16x2x8x8xf32, #tpu.memory_space<vmem>>, vector<1x2x8x8xf32>
    %468 = vector.shape_cast %467 : vector<1x2x8x8xf32> to vector<2x8x8xf32>
    %469 = vector.broadcast %466 : vector<2x8x1xf32> to vector<2x8x8xf32>
    %470 = arith.mulf %469, %468 : vector<2x8x8xf32>
    %471 = arith.addf %459, %470 : vector<2x8x8xf32>
    %472 = vector.extract_strided_slice %402 {offsets = [0, 0, 5], sizes = [2, 8, 1], strides = [1, 1, 1]} : vector<2x8x16xf32> to vector<2x8x1xf32>
    %c0_281 = arith.constant 0 : index
    %c5_282 = arith.constant 5 : index
    %473 = vector.load %arg6[%c0_281, %c5_282] : memref<1x16xf32, #tpu.memory_space<vmem>>, vector<1x1xf32>
    %cst_283 = arith.constant 2.000000e+00 : f32
    %474 = vector.broadcast %cst_283 : f32 to vector<1x1xf32>
    %475 = arith.mulf %474, %473 : vector<1x1xf32>
    %476 = vector.shape_cast %475 : vector<1x1xf32> to vector<1x1x1xf32>
    %477 = vector.broadcast %476 : vector<1x1x1xf32> to vector<2x8x1xf32>
    %478 = arith.mulf %472, %477 : vector<2x8x1xf32>
    %c5_284 = arith.constant 5 : index
    %c0_285 = arith.constant 0 : index
    %c0_286 = arith.constant 0 : index
    %c0_287 = arith.constant 0 : index
    %479 = vector.load %arg16[%c5_284, %c0_285, %c0_286, %c0_287] : memref<16x2x8x8xf32, #tpu.memory_space<vmem>>, vector<1x2x8x8xf32>
    %480 = vector.shape_cast %479 : vector<1x2x8x8xf32> to vector<2x8x8xf32>
    %481 = vector.broadcast %478 : vector<2x8x1xf32> to vector<2x8x8xf32>
    %482 = arith.mulf %481, %480 : vector<2x8x8xf32>
    %483 = arith.addf %471, %482 : vector<2x8x8xf32>
    %484 = vector.extract_strided_slice %402 {offsets = [0, 0, 6], sizes = [2, 8, 1], strides = [1, 1, 1]} : vector<2x8x16xf32> to vector<2x8x1xf32>
    %c0_288 = arith.constant 0 : index
    %c6_289 = arith.constant 6 : index
    %485 = vector.load %arg6[%c0_288, %c6_289] : memref<1x16xf32, #tpu.memory_space<vmem>>, vector<1x1xf32>
    %cst_290 = arith.constant 2.000000e+00 : f32
    %486 = vector.broadcast %cst_290 : f32 to vector<1x1xf32>
    %487 = arith.mulf %486, %485 : vector<1x1xf32>
    %488 = vector.shape_cast %487 : vector<1x1xf32> to vector<1x1x1xf32>
    %489 = vector.broadcast %488 : vector<1x1x1xf32> to vector<2x8x1xf32>
    %490 = arith.mulf %484, %489 : vector<2x8x1xf32>
    %c6_291 = arith.constant 6 : index
    %c0_292 = arith.constant 0 : index
    %c0_293 = arith.constant 0 : index
    %c0_294 = arith.constant 0 : index
    %491 = vector.load %arg16[%c6_291, %c0_292, %c0_293, %c0_294] : memref<16x2x8x8xf32, #tpu.memory_space<vmem>>, vector<1x2x8x8xf32>
    %492 = vector.shape_cast %491 : vector<1x2x8x8xf32> to vector<2x8x8xf32>
    %493 = vector.broadcast %490 : vector<2x8x1xf32> to vector<2x8x8xf32>
    %494 = arith.mulf %493, %492 : vector<2x8x8xf32>
    %495 = arith.addf %483, %494 : vector<2x8x8xf32>
    %496 = vector.extract_strided_slice %402 {offsets = [0, 0, 7], sizes = [2, 8, 1], strides = [1, 1, 1]} : vector<2x8x16xf32> to vector<2x8x1xf32>
    %c0_295 = arith.constant 0 : index
    %c7_296 = arith.constant 7 : index
    %497 = vector.load %arg6[%c0_295, %c7_296] : memref<1x16xf32, #tpu.memory_space<vmem>>, vector<1x1xf32>
    %cst_297 = arith.constant 2.000000e+00 : f32
    %498 = vector.broadcast %cst_297 : f32 to vector<1x1xf32>
    %499 = arith.mulf %498, %497 : vector<1x1xf32>
    %500 = vector.shape_cast %499 : vector<1x1xf32> to vector<1x1x1xf32>
    %501 = vector.broadcast %500 : vector<1x1x1xf32> to vector<2x8x1xf32>
    %502 = arith.mulf %496, %501 : vector<2x8x1xf32>
    %c7_298 = arith.constant 7 : index
    %c0_299 = arith.constant 0 : index
    %c0_300 = arith.constant 0 : index
    %c0_301 = arith.constant 0 : index
    %503 = vector.load %arg16[%c7_298, %c0_299, %c0_300, %c0_301] : memref<16x2x8x8xf32, #tpu.memory_space<vmem>>, vector<1x2x8x8xf32>
    %504 = vector.shape_cast %503 : vector<1x2x8x8xf32> to vector<2x8x8xf32>
    %505 = vector.broadcast %502 : vector<2x8x1xf32> to vector<2x8x8xf32>
    %506 = arith.mulf %505, %504 : vector<2x8x8xf32>
    %507 = arith.addf %495, %506 : vector<2x8x8xf32>
    %508 = vector.extract_strided_slice %402 {offsets = [0, 0, 8], sizes = [2, 8, 1], strides = [1, 1, 1]} : vector<2x8x16xf32> to vector<2x8x1xf32>
    %c0_302 = arith.constant 0 : index
    %c8_303 = arith.constant 8 : index
    %509 = vector.load %arg6[%c0_302, %c8_303] : memref<1x16xf32, #tpu.memory_space<vmem>>, vector<1x1xf32>
    %cst_304 = arith.constant 2.000000e+00 : f32
    %510 = vector.broadcast %cst_304 : f32 to vector<1x1xf32>
    %511 = arith.mulf %510, %509 : vector<1x1xf32>
    %512 = vector.shape_cast %511 : vector<1x1xf32> to vector<1x1x1xf32>
    %513 = vector.broadcast %512 : vector<1x1x1xf32> to vector<2x8x1xf32>
    %514 = arith.mulf %508, %513 : vector<2x8x1xf32>
    %c8_305 = arith.constant 8 : index
    %c0_306 = arith.constant 0 : index
    %c0_307 = arith.constant 0 : index
    %c0_308 = arith.constant 0 : index
    %515 = vector.load %arg16[%c8_305, %c0_306, %c0_307, %c0_308] : memref<16x2x8x8xf32, #tpu.memory_space<vmem>>, vector<1x2x8x8xf32>
    %516 = vector.shape_cast %515 : vector<1x2x8x8xf32> to vector<2x8x8xf32>
    %517 = vector.broadcast %514 : vector<2x8x1xf32> to vector<2x8x8xf32>
    %518 = arith.mulf %517, %516 : vector<2x8x8xf32>
    %519 = arith.addf %507, %518 : vector<2x8x8xf32>
    %520 = vector.extract_strided_slice %402 {offsets = [0, 0, 9], sizes = [2, 8, 1], strides = [1, 1, 1]} : vector<2x8x16xf32> to vector<2x8x1xf32>
    %c0_309 = arith.constant 0 : index
    %c9_310 = arith.constant 9 : index
    %521 = vector.load %arg6[%c0_309, %c9_310] : memref<1x16xf32, #tpu.memory_space<vmem>>, vector<1x1xf32>
    %cst_311 = arith.constant 2.000000e+00 : f32
    %522 = vector.broadcast %cst_311 : f32 to vector<1x1xf32>
    %523 = arith.mulf %522, %521 : vector<1x1xf32>
    %524 = vector.shape_cast %523 : vector<1x1xf32> to vector<1x1x1xf32>
    %525 = vector.broadcast %524 : vector<1x1x1xf32> to vector<2x8x1xf32>
    %526 = arith.mulf %520, %525 : vector<2x8x1xf32>
    %c9_312 = arith.constant 9 : index
    %c0_313 = arith.constant 0 : index
    %c0_314 = arith.constant 0 : index
    %c0_315 = arith.constant 0 : index
    %527 = vector.load %arg16[%c9_312, %c0_313, %c0_314, %c0_315] : memref<16x2x8x8xf32, #tpu.memory_space<vmem>>, vector<1x2x8x8xf32>
    %528 = vector.shape_cast %527 : vector<1x2x8x8xf32> to vector<2x8x8xf32>
    %529 = vector.broadcast %526 : vector<2x8x1xf32> to vector<2x8x8xf32>
    %530 = arith.mulf %529, %528 : vector<2x8x8xf32>
    %531 = arith.addf %519, %530 : vector<2x8x8xf32>
    %532 = vector.extract_strided_slice %402 {offsets = [0, 0, 10], sizes = [2, 8, 1], strides = [1, 1, 1]} : vector<2x8x16xf32> to vector<2x8x1xf32>
    %c0_316 = arith.constant 0 : index
    %c10_317 = arith.constant 10 : index
    %533 = vector.load %arg6[%c0_316, %c10_317] : memref<1x16xf32, #tpu.memory_space<vmem>>, vector<1x1xf32>
    %cst_318 = arith.constant 2.000000e+00 : f32
    %534 = vector.broadcast %cst_318 : f32 to vector<1x1xf32>
    %535 = arith.mulf %534, %533 : vector<1x1xf32>
    %536 = vector.shape_cast %535 : vector<1x1xf32> to vector<1x1x1xf32>
    %537 = vector.broadcast %536 : vector<1x1x1xf32> to vector<2x8x1xf32>
    %538 = arith.mulf %532, %537 : vector<2x8x1xf32>
    %c10_319 = arith.constant 10 : index
    %c0_320 = arith.constant 0 : index
    %c0_321 = arith.constant 0 : index
    %c0_322 = arith.constant 0 : index
    %539 = vector.load %arg16[%c10_319, %c0_320, %c0_321, %c0_322] : memref<16x2x8x8xf32, #tpu.memory_space<vmem>>, vector<1x2x8x8xf32>
    %540 = vector.shape_cast %539 : vector<1x2x8x8xf32> to vector<2x8x8xf32>
    %541 = vector.broadcast %538 : vector<2x8x1xf32> to vector<2x8x8xf32>
    %542 = arith.mulf %541, %540 : vector<2x8x8xf32>
    %543 = arith.addf %531, %542 : vector<2x8x8xf32>
    %544 = vector.extract_strided_slice %402 {offsets = [0, 0, 11], sizes = [2, 8, 1], strides = [1, 1, 1]} : vector<2x8x16xf32> to vector<2x8x1xf32>
    %c0_323 = arith.constant 0 : index
    %c11_324 = arith.constant 11 : index
    %545 = vector.load %arg6[%c0_323, %c11_324] : memref<1x16xf32, #tpu.memory_space<vmem>>, vector<1x1xf32>
    %cst_325 = arith.constant 2.000000e+00 : f32
    %546 = vector.broadcast %cst_325 : f32 to vector<1x1xf32>
    %547 = arith.mulf %546, %545 : vector<1x1xf32>
    %548 = vector.shape_cast %547 : vector<1x1xf32> to vector<1x1x1xf32>
    %549 = vector.broadcast %548 : vector<1x1x1xf32> to vector<2x8x1xf32>
    %550 = arith.mulf %544, %549 : vector<2x8x1xf32>
    %c11_326 = arith.constant 11 : index
    %c0_327 = arith.constant 0 : index
    %c0_328 = arith.constant 0 : index
    %c0_329 = arith.constant 0 : index
    %551 = vector.load %arg16[%c11_326, %c0_327, %c0_328, %c0_329] : memref<16x2x8x8xf32, #tpu.memory_space<vmem>>, vector<1x2x8x8xf32>
    %552 = vector.shape_cast %551 : vector<1x2x8x8xf32> to vector<2x8x8xf32>
    %553 = vector.broadcast %550 : vector<2x8x1xf32> to vector<2x8x8xf32>
    %554 = arith.mulf %553, %552 : vector<2x8x8xf32>
    %555 = arith.addf %543, %554 : vector<2x8x8xf32>
    %556 = vector.extract_strided_slice %402 {offsets = [0, 0, 12], sizes = [2, 8, 1], strides = [1, 1, 1]} : vector<2x8x16xf32> to vector<2x8x1xf32>
    %c0_330 = arith.constant 0 : index
    %c12_331 = arith.constant 12 : index
    %557 = vector.load %arg6[%c0_330, %c12_331] : memref<1x16xf32, #tpu.memory_space<vmem>>, vector<1x1xf32>
    %cst_332 = arith.constant 2.000000e+00 : f32
    %558 = vector.broadcast %cst_332 : f32 to vector<1x1xf32>
    %559 = arith.mulf %558, %557 : vector<1x1xf32>
    %560 = vector.shape_cast %559 : vector<1x1xf32> to vector<1x1x1xf32>
    %561 = vector.broadcast %560 : vector<1x1x1xf32> to vector<2x8x1xf32>
    %562 = arith.mulf %556, %561 : vector<2x8x1xf32>
    %c12_333 = arith.constant 12 : index
    %c0_334 = arith.constant 0 : index
    %c0_335 = arith.constant 0 : index
    %c0_336 = arith.constant 0 : index
    %563 = vector.load %arg16[%c12_333, %c0_334, %c0_335, %c0_336] : memref<16x2x8x8xf32, #tpu.memory_space<vmem>>, vector<1x2x8x8xf32>
    %564 = vector.shape_cast %563 : vector<1x2x8x8xf32> to vector<2x8x8xf32>
    %565 = vector.broadcast %562 : vector<2x8x1xf32> to vector<2x8x8xf32>
    %566 = arith.mulf %565, %564 : vector<2x8x8xf32>
    %567 = arith.addf %555, %566 : vector<2x8x8xf32>
    %568 = vector.extract_strided_slice %402 {offsets = [0, 0, 13], sizes = [2, 8, 1], strides = [1, 1, 1]} : vector<2x8x16xf32> to vector<2x8x1xf32>
    %c0_337 = arith.constant 0 : index
    %c13_338 = arith.constant 13 : index
    %569 = vector.load %arg6[%c0_337, %c13_338] : memref<1x16xf32, #tpu.memory_space<vmem>>, vector<1x1xf32>
    %cst_339 = arith.constant 2.000000e+00 : f32
    %570 = vector.broadcast %cst_339 : f32 to vector<1x1xf32>
    %571 = arith.mulf %570, %569 : vector<1x1xf32>
    %572 = vector.shape_cast %571 : vector<1x1xf32> to vector<1x1x1xf32>
    %573 = vector.broadcast %572 : vector<1x1x1xf32> to vector<2x8x1xf32>
    %574 = arith.mulf %568, %573 : vector<2x8x1xf32>
    %c13_340 = arith.constant 13 : index
    %c0_341 = arith.constant 0 : index
    %c0_342 = arith.constant 0 : index
    %c0_343 = arith.constant 0 : index
    %575 = vector.load %arg16[%c13_340, %c0_341, %c0_342, %c0_343] : memref<16x2x8x8xf32, #tpu.memory_space<vmem>>, vector<1x2x8x8xf32>
    %576 = vector.shape_cast %575 : vector<1x2x8x8xf32> to vector<2x8x8xf32>
    %577 = vector.broadcast %574 : vector<2x8x1xf32> to vector<2x8x8xf32>
    %578 = arith.mulf %577, %576 : vector<2x8x8xf32>
    %579 = arith.addf %567, %578 : vector<2x8x8xf32>
    %580 = vector.extract_strided_slice %402 {offsets = [0, 0, 14], sizes = [2, 8, 1], strides = [1, 1, 1]} : vector<2x8x16xf32> to vector<2x8x1xf32>
    %c0_344 = arith.constant 0 : index
    %c14_345 = arith.constant 14 : index
    %581 = vector.load %arg6[%c0_344, %c14_345] : memref<1x16xf32, #tpu.memory_space<vmem>>, vector<1x1xf32>
    %cst_346 = arith.constant 2.000000e+00 : f32
    %582 = vector.broadcast %cst_346 : f32 to vector<1x1xf32>
    %583 = arith.mulf %582, %581 : vector<1x1xf32>
    %584 = vector.shape_cast %583 : vector<1x1xf32> to vector<1x1x1xf32>
    %585 = vector.broadcast %584 : vector<1x1x1xf32> to vector<2x8x1xf32>
    %586 = arith.mulf %580, %585 : vector<2x8x1xf32>
    %c14_347 = arith.constant 14 : index
    %c0_348 = arith.constant 0 : index
    %c0_349 = arith.constant 0 : index
    %c0_350 = arith.constant 0 : index
    %587 = vector.load %arg16[%c14_347, %c0_348, %c0_349, %c0_350] : memref<16x2x8x8xf32, #tpu.memory_space<vmem>>, vector<1x2x8x8xf32>
    %588 = vector.shape_cast %587 : vector<1x2x8x8xf32> to vector<2x8x8xf32>
    %589 = vector.broadcast %586 : vector<2x8x1xf32> to vector<2x8x8xf32>
    %590 = arith.mulf %589, %588 : vector<2x8x8xf32>
    %591 = arith.addf %579, %590 : vector<2x8x8xf32>
    %592 = vector.extract_strided_slice %402 {offsets = [0, 0, 15], sizes = [2, 8, 1], strides = [1, 1, 1]} : vector<2x8x16xf32> to vector<2x8x1xf32>
    %c0_351 = arith.constant 0 : index
    %c15_352 = arith.constant 15 : index
    %593 = vector.load %arg6[%c0_351, %c15_352] : memref<1x16xf32, #tpu.memory_space<vmem>>, vector<1x1xf32>
    %cst_353 = arith.constant 2.000000e+00 : f32
    %594 = vector.broadcast %cst_353 : f32 to vector<1x1xf32>
    %595 = arith.mulf %594, %593 : vector<1x1xf32>
    %596 = vector.shape_cast %595 : vector<1x1xf32> to vector<1x1x1xf32>
    %597 = vector.broadcast %596 : vector<1x1x1xf32> to vector<2x8x1xf32>
    %598 = arith.mulf %592, %597 : vector<2x8x1xf32>
    %c15_354 = arith.constant 15 : index
    %c0_355 = arith.constant 0 : index
    %c0_356 = arith.constant 0 : index
    %c0_357 = arith.constant 0 : index
    %599 = vector.load %arg16[%c15_354, %c0_355, %c0_356, %c0_357] : memref<16x2x8x8xf32, #tpu.memory_space<vmem>>, vector<1x2x8x8xf32>
    %600 = vector.shape_cast %599 : vector<1x2x8x8xf32> to vector<2x8x8xf32>
    %601 = vector.broadcast %598 : vector<2x8x1xf32> to vector<2x8x8xf32>
    %602 = arith.mulf %601, %600 : vector<2x8x8xf32>
    %603 = arith.addf %591, %602 : vector<2x8x8xf32>
    %604 = vector.extract_strided_slice %0 {offsets = [0, 0, 0], sizes = [2, 4, 8], strides = [1, 1, 1]} : vector<2x5x8xf32> to vector<2x4x8xf32>
    %cst_358 = arith.constant dense<0.000000e+00> : vector<2x4x8xf32>
    %605 = tpu.matmul %604, %603, %cst_358 {dimension_numbers = #tpu.dot_dimension_numbers<[2], [2], [1], [1], [0, 0, 0, 1, 1, 1], [0], [0]>} : vector<2x4x8xf32>, vector<2x8x8xf32>, vector<2x4x8xf32> -> vector<2x4x8xf32>
    %cst_359 = arith.constant dense<0.000000e+00> : vector<2x4x8xf32>
    %606 = tpu.matmul %604, %603, %cst_359 {dimension_numbers = #tpu.dot_dimension_numbers<[2], [1], [1], [2], [0, 0, 0, 1, 1, 2], [0], [0]>} : vector<2x4x8xf32>, vector<2x8x8xf32>, vector<2x4x8xf32> -> vector<2x4x8xf32>
    %607 = vector.extract_strided_slice %605 {offsets = [0, 0, 0], sizes = [2, 3, 8], strides = [1, 1, 1]} : vector<2x4x8xf32> to vector<2x3x8xf32>
    %608 = arith.addf %410, %607 : vector<2x3x8xf32>
    %609 = vector.extract_strided_slice %606 {offsets = [0, 0, 0], sizes = [2, 3, 8], strides = [1, 1, 1]} : vector<2x4x8xf32> to vector<2x3x8xf32>
    %610 = arith.addf %608, %609 : vector<2x3x8xf32>
    %611 = vector.extract_strided_slice %0 {offsets = [0, 0, 0], sizes = [2, 3, 8], strides = [1, 1, 1]} : vector<2x5x8xf32> to vector<2x3x8xf32>
    %612 = vector.extract_strided_slice %605 {offsets = [0, 3, 0], sizes = [2, 1, 8], strides = [1, 1, 1]} : vector<2x4x8xf32> to vector<2x1x8xf32>
    %613 = vector.extract_strided_slice %606 {offsets = [0, 3, 0], sizes = [2, 1, 8], strides = [1, 1, 1]} : vector<2x4x8xf32> to vector<2x1x8xf32>
    %614 = arith.addf %612, %613 : vector<2x1x8xf32>
    %615 = vector.broadcast %614 : vector<2x1x8xf32> to vector<2x3x8xf32>
    %616 = arith.mulf %611, %615 : vector<2x3x8xf32>
    %617 = arith.subf %610, %616 : vector<2x3x8xf32>
    %cst_360 = arith.constant 0.000000e+00 : f32
    %618 = vector.broadcast %cst_360 : f32 to vector<2x3x8xf32>
    %619 = arith.subf %618, %617 : vector<2x3x8xf32>
    %c0_361 = arith.constant 0 : index
    %c0_362 = arith.constant 0 : index
    %c0_363 = arith.constant 0 : index
    %620 = vector.load %arg15[%c0_361, %c0_362, %c0_363] : memref<2x3x8xf32, #tpu.memory_space<vmem>>, vector<2x3x8xf32>
    tpu.vector_store %arg15[%c0_361, %c0_362, %c0_363], %619 {strides = array<i32>} : memref<2x3x8xf32, #tpu.memory_space<vmem>>, vector<2x3x8xf32>,
    return
  }
  func.func @transform_0(%arg0: i32) -> (i32, i32, i32) {
    %c0_i32 = arith.constant 0 : i32
    %c0_i32_0 = arith.constant 0 : i32
    %c0_i32_1 = arith.constant 0 : i32
    return %arg0, %c0_i32, %c0_i32_0 : i32, i32, i32
  }
  func.func @transform_1(%arg0: i32) -> (i32, i32, i32) {
    %c0_i32 = arith.constant 0 : i32
    %c0_i32_0 = arith.constant 0 : i32
    %c0_i32_1 = arith.constant 0 : i32
    return %arg0, %c0_i32, %c0_i32_0 : i32, i32, i32
  }
  func.func @transform_2(%arg0: i32) -> (i32, i32, i32) {
    %c0_i32 = arith.constant 0 : i32
    %c0_i32_0 = arith.constant 0 : i32
    %c0_i32_1 = arith.constant 0 : i32
    return %arg0, %c0_i32, %c0_i32_0 : i32, i32, i32
  }
  func.func @transform_3(%arg0: i32) -> (i32, i32, i32, i32) {
    %c0_i32 = arith.constant 0 : i32
    %c0_i32_0 = arith.constant 0 : i32
    %c0_i32_1 = arith.constant 0 : i32
    %c0_i32_2 = arith.constant 0 : i32
    return %c0_i32, %arg0, %c0_i32_0, %c0_i32_1 : i32, i32, i32, i32
  }
  func.func @transform_4(%arg0: i32) -> (i32, i32, i32) {
    %c0_i32 = arith.constant 0 : i32
    %c0_i32_0 = arith.constant 0 : i32
    %c0_i32_1 = arith.constant 0 : i32
    return %arg0, %c0_i32, %c0_i32_0 : i32, i32, i32
  }
  func.func @transform_5(%arg0: i32) -> (i32, i32) {
    %c0_i32 = arith.constant 0 : i32
    %c0_i32_0 = arith.constant 0 : i32
    %c0_i32_1 = arith.constant 0 : i32
    return %c0_i32, %c0_i32_0 : i32, i32
  }
  func.func @transform_6(%arg0: i32) -> (i32, i32) {
    %c0_i32 = arith.constant 0 : i32
    %c0_i32_0 = arith.constant 0 : i32
    %c0_i32_1 = arith.constant 0 : i32
    return %c0_i32, %c0_i32_0 : i32, i32
  }
  func.func @transform_7(%arg0: i32) -> (i32, i32) {
    %c0_i32 = arith.constant 0 : i32
    %c0_i32_0 = arith.constant 0 : i32
    %c0_i32_1 = arith.constant 0 : i32
    return %c0_i32, %c0_i32_0 : i32, i32
  }
  func.func @transform_8(%arg0: i32) -> (i32, i32) {
    %c0_i32 = arith.constant 0 : i32
    %c0_i32_0 = arith.constant 0 : i32
    %c0_i32_1 = arith.constant 0 : i32
    return %c0_i32, %c0_i32_0 : i32, i32
  }
  func.func @transform_9(%arg0: i32) -> (i32, i32) {
    %c0_i32 = arith.constant 0 : i32
    %c0_i32_0 = arith.constant 0 : i32
    %c0_i32_1 = arith.constant 0 : i32
    return %c0_i32, %c0_i32_0 : i32, i32
  }
  func.func @transform_10(%arg0: i32) -> (i32, i32) {
    %c0_i32 = arith.constant 0 : i32
    %c0_i32_0 = arith.constant 0 : i32
    %c0_i32_1 = arith.constant 0 : i32
    return %c0_i32, %c0_i32_0 : i32, i32
  }
  func.func @transform_11(%arg0: i32) -> (i32, i32) {
    %c0_i32 = arith.constant 0 : i32
    %c0_i32_0 = arith.constant 0 : i32
    %c0_i32_1 = arith.constant 0 : i32
    return %c0_i32, %c0_i32_0 : i32, i32
  }
  func.func @transform_12(%arg0: i32) -> (i32, i32) {
    %c0_i32 = arith.constant 0 : i32
    %c0_i32_0 = arith.constant 0 : i32
    %c0_i32_1 = arith.constant 0 : i32
    return %c0_i32, %c0_i32_0 : i32, i32
  }
  func.func @transform_13(%arg0: i32) -> (i32, i32, i32) {
    %c0_i32 = arith.constant 0 : i32
    %c0_i32_0 = arith.constant 0 : i32
    %c0_i32_1 = arith.constant 0 : i32
    return %arg0, %c0_i32, %c0_i32_0 : i32, i32, i32
  }
  func.func @transform_14(%arg0: i32) -> (i32, i32, i32) {
    %c0_i32 = arith.constant 0 : i32
    %c0_i32_0 = arith.constant 0 : i32
    %c0_i32_1 = arith.constant 0 : i32
    return %arg0, %c0_i32, %c0_i32_0 : i32, i32, i32
  }
}

</mosaic_0001>

<bundles_post_ra>
// kernel: tpu_custom_call.1
= control target key start
LH: loop header
LB: loop body
LE: loop exit
PB: predicated region body
PF: predicated region fallthrough
CT: control target
= control target key end

     0   :  { %v52_v0 = vlaneseq  ;;  %v4245_v2 = vmov 0   ;;  %v4246_v10 = vmov 0.0   ;;  %vm125_vm0 = vcmask 1044480   ;;  %s5049_s1 = inlined_call_operand.vmem [shape: f32[2,5,8], index: 1, kind: input, shape index: {}]   ;;  %s5050_s5 = inlined_call_operand.vmem [shape: f32[1,16], index: 5, kind: input, shape index: {}]   ;;  %s5051_s0 = inlined_call_operand.vmem [shape: f32[2,5,8], index: 0, kind: input, shape index: {}]   ;;  %s5052_s4 = inlined_call_operand.vmem [shape: s32[2,1,1], index: 4, kind: input, shape index: {}]   ;;  %s5053_s2 = inlined_call_operand.vmem [shape: f32[2,5,1], index: 2, kind: input, shape index: {}]   ;;  %s5054_s3 = inlined_call_operand.vmem [shape: f32[16,2,1,8], index: 3, kind: input, shape index: {}]   ;;  %s5055_s11 = inlined_call_operand.vmem [shape: f32[32,1], index: 11, kind: input, shape index: {}]   ;;  %s5056_s8 = inlined_call_operand.vmem [shape: f32[32,16], index: 8, kind: input, shape index: {}]   ;;  %s5057_s9 = inlined_call_operand.vmem [shape: f32[1,32], index: 9, kind: input, shape index: {}]   ;;  %s5058_s10 = inlined_call_operand.vmem [shape: f32[1,32], index: 10, kind: input, shape index: {}]   ;;  %s5059_s7 = inlined_call_operand.vmem [shape: f32[16,32], index: 7, kind: input, shape index: {}]   ;;  %s5060_s12 = inlined_call_operand.vmem [shape: f32[1,32], index: 12, kind: input, shape index: {}]   ;;  %s5061_s13 = inlined_call_operand.vmem [shape: f32[2,1,1], index: 13, kind: output, shape index: {0}]   ;;  %s5062_s6 = inlined_call_operand.vmem [shape: f32[1,16], index: 6, kind: input, shape index: {}]   ;;  %s5063_s14 = inlined_call_operand.vmem [shape: f32[2,3,8], index: 14, kind: output, shape index: {1}]  }
   0x1   :  { %v48_v1 = vld [vmem:[%s5049_s1] sm:$0x1f]  ;;  %4116 = vset.pattern.permute.xlu1 %v4245_v2  ;;  %v49_v7 = vld [vmem:[%s5049_s1 + $0x8] sm:$0x1f]  ;;  %3945 = vmatprep.subr.mxu0 %v4246_v10  ;;  %vm4247_vm1 = vmmov 0   ;;  %v4248_v17 = vmov 1  }
   0x2   :  { %v553_v3 = vld [vmem:[%s5050_s5] sm:$0x1]  ;;  %89 = vxpose.xlu0.b32.start.end [1/1] (short) (narrow) %v48_v1, 8  ;;  %v4347_v4 = vshrl.u32 %v52_v0, 7  ;;  %3950 = vmatprep.subr.mxu1 %v4246_v10  ;;  %v4369_v13 = vld [vmem:[%s5051_s0 + $0x8] sm:$0x1f] }
   0x3   :  { %v554_v5 = vsub.f32 0.0, %v553_v3  ;;  %v691_v6 = vld [vmem:[%s5050_s5] sm:$0x1]  ;;  %3947 = vmatprep.mubr.msk.f32.mxu0 %vm4247_vm1, %v4246_v10  ;;  %3952 = vmatprep.mubr.msk.f32.mxu1 %vm4247_vm1, %v4246_v10  ;;  %v4249_v21 = vmov 3   ;;  %v4250_v25 = vmov 4   ;;  %v4251_v29 = vmov 5  }
   0x4   :  { %v4356_v8 = vsub.s32 0, %v4347_v4  ;;  %v692_v9 = vsub.f32 0.0, %v691_v6  ;;  %v4362_v11 = vld [vmem:[%s5051_s0] sm:$0x1f]  ;;  %3951 = vmatpush3.msk.msra.mxu1 %vm125_vm0, %v4369_v13  ;;  %v4252_v31 = vmov 6   ;;  %v4253_v38 = vmov 7  }
   0x5   :  { %v969_v14 = vld [vmem:[%s5050_s5] sm:$0x1]  ;;  %3946 = vmatpush3.msk.msra.mxu0 %vm125_vm0, %v4362_v11  ;;  %3960 = vmatprep.subr.mxu1 %v4246_v10  ;;  %v4428_v42 = vld [vmem:[%s5052_s4 + $0x1] ss:$0 sm:$0xff]  ;;  %v4254_v46 = vmov 2   ;;  %v4255_v52 = vmov 8  }
   0x6   :  { %199 = vxpose.xlu0.b32.start.end [1/1] (short) (narrow) %v49_v7, 8  ;;  %v559_v12 = vrot.slane %v554_v5, %v4356_v8  ;;  %v697_v15 = vrot.slane %v692_v9, %v4356_v8  ;;  %3955 = vmatprep.subr.mxu0 %v4246_v10  ;;  %v970_v16 = vsub.f32 0.0, %v969_v14  ;;  %v1108_v18 = vld [vmem:[%s5050_s5] sm:$0x1]  ;;  %v4256_v54 = vmov 12  }
   0x7   :  { %v1109_v20 = vsub.f32 0.0, %v1108_v18  ;;  %v1247_v22 = vld [vmem:[%s5050_s5] sm:$0x1]  ;;  %v4257_v58 = vmov 9   ;;  %v4258_v60 = vmov 15   ;;  %v4259_v63 = vmov 10  }
   0x8   :  { %561 = vperm.xlu1 %4116, %v559_v12   ;;  %v975_v19 = vrot.slane %v970_v16, %v4356_v8  ;;  %v1248_v24 = vsub.f32 0.0, %v1247_v22  ;;  %v1386_v26 = vld [vmem:[%s5050_s5] sm:$0x1]  ;;  %v4260_v6 = vmov 11   ;;  %v4261_v14 = vmov 13  }
   0x9   :  { %v1114_v23 = vrot.slane %v1109_v20, %v4356_v8  ;;  %v1387_v28 = vsub.f32 0.0, %v1386_v26  ;;  %v1525_v32 = vld [vmem:[%s5050_s5] sm:$0x1]  ;;  %v4262_v16 = vmov 14   ;;  %vm121_vm2 = vcmask 39936  }
   0xa   :  { %v1253_v27 = vrot.slane %v1248_v24, %v4356_v8  ;;  %v4409_v33 = vld [vmem:[%s5052_s4] ss:$0 sm:$0xff]  ;;  %v1526_v34 = vsub.f32 0.0, %v1525_v32  ;;  %vm588_vm12 = vcmask 64512   ;;  %vm84_vm14 = vcmp.lt.s32.totalorder %v4347_v4, %v4428_v42 }
   0xb   :  { %v1392_v30 = vrot.slane %v1387_v28, %v4356_v8  ;;  %v830_v35 = vld [vmem:[%s5050_s5] sm:$0x1]  ;;  %v55_v28 = vand.u32 127, %v52_v0  ;;  %vm83_vm13 = vcmp.lt.s32.totalorder %v4347_v4, %v4409_v33  ;;  %vm2782_vm15 = vcmask 261120  }
   0xc   :  { %4117 = vset.pattern.permute.xlu1 %v4248_v17  ;;  %v1531_v36 = vrot.slane %v1526_v34, %v4356_v8  ;;  %v831_v37 = vsub.f32 0.0, %v830_v35  ;;  %v1664_v39 = vld [vmem:[%s5050_s5] sm:$0x1]  ;;  %v308_v35 = vld [vmem:[%s5053_s2 + $0x8] sm:$0x1f] }
   0xd   :  { %699 = vperm.xlu1 %4117, %v697_v15   ;;  %v2220_v40 = vld [vmem:[%s5050_s5] sm:$0x1]  ;;  %v1665_v43 = vsub.f32 0.0, %v1664_v39  ;;  %vm76_vm5 = vcmp.ne.s32.totalorder %v4347_v4, %v55_v28 }
   0xe   :  { %v836_v41 = vrot.slane %v831_v37, %v4356_v8  ;;  %v2221_v44 = vsub.f32 0.0, %v2220_v40  ;;  %v1803_v45 = vld [vmem:[%s5050_s5] sm:$0x1] }
   0xf   :  { %v2637_v47 = vld [vmem:[%s5050_s5] sm:$0x1]  ;;  %v1670_v48 = vrot.slane %v1665_v43, %v4356_v8  ;;  %v1804_v50 = vsub.f32 0.0, %v1803_v45 }
  0x10   :  { %v2226_v49 = vrot.slane %v2221_v44, %v4356_v8  ;;  %v2638_v51 = vsub.f32 0.0, %v2637_v47  ;;  %v1942_v53 = vld [vmem:[%s5050_s5] sm:$0x1] }
  0x11   :  { %4119 = vset.pattern.permute.xlu1 %v4249_v21  ;;  %v1809_v55 = vrot.slane %v1804_v50, %v4356_v8  ;;  %v1943_v57 = vsub.f32 0.0, %v1942_v53  ;;  %v2081_v59 = vld [vmem:[%s5050_s5] sm:$0x1] }
  0x12   :  { %977 = vperm.xlu1 %4119, %v975_v19   ;;  %v2643_v56 = vrot.slane %v2638_v51, %v4356_v8  ;;  %v2082_v62 = vsub.f32 0.0, %v2081_v59  ;;  %v2359_v1 = vld [vmem:[%s5050_s5] sm:$0x1] }
  0x13   :  { %v1948_v61 = vrot.slane %v1943_v57, %v4356_v8  ;;  %v2360_v5 = vsub.f32 0.0, %v2359_v1  ;;  %v2498_v7 = vld [vmem:[%s5050_s5] sm:$0x1] }
  0x14   :  { %v2087_v3 = vrot.slane %v2082_v62, %v4356_v8  ;;  %v2499_v12 = vsub.f32 0.0, %v2498_v7  ;;  %v307_v0 = vld [vmem:[%s5053_s2] sm:$0x1f] }
  0x15   :  { %v2365_v9 = vrot.slane %v2360_v5, %v4356_v8 }
  0x16   :  { %4120 = vset.pattern.permute.xlu1 %v4250_v25  ;;  %v2504_v15 = vrot.slane %v2499_v12, %v4356_v8 }
  0x17   :  { %1116 = vperm.xlu1 %4120, %v1114_v23  }
  0x1b   :  { %4121 = vset.pattern.permute.xlu1 %v4251_v29 }
  0x1c   :  { %1255 = vperm.xlu1 %4121, %v1253_v27  }
  0x20   :  { %4122 = vset.pattern.permute.xlu1 %v4252_v31 }
  0x21   :  { %1394 = vperm.xlu1 %4122, %v1392_v30  }
  0x25   :  { %4123 = vset.pattern.permute.xlu1 %v4245_v2 }
  0x26   :  { %65 = vperm.xlu1 %4123, %v4409_v33   ;;  %v2781_v33 = vld [vmem:[%s5055_s11 + $0x18] sm:$0xff] }
  0x2a   :  { %4124 = vset.pattern.permute.xlu1 %v4253_v38 }
  0x2b   :  { %1533 = vperm.xlu1 %4124, %v1531_v36   ;;  %v4263_v36 = vmov 1.0  }
  0x2f   :  { %4125 = vset.pattern.permute.xlu1 %v4245_v2  ;;  %4118 = vset.pattern.permute.xlu0 %v4254_v46 }
  0x30   :  { %68 = vperm.xlu1 %4125, %v4428_v42   ;;  %838 = vperm.xlu0 %4118, %v836_v41   ;;  %v2780_v42 = vld [vmem:[%s5055_s11 + $0x10] sm:$0xff] }
  0x34   :  { %4126 = vset.pattern.permute.xlu1 %v4255_v52  ;;  %4130 = vset.pattern.permute.xlu0 %v4256_v54 }
  0x35   :  { %1672 = vperm.xlu1 %4126, %v1670_v48   ;;  %2228 = vperm.xlu0 %4130, %v2226_v49  }
  0x39   :  { %4127 = vset.pattern.permute.xlu1 %v4257_v58  ;;  %4133 = vset.pattern.permute.xlu0 %v4258_v60 }
  0x3a   :  { %1811 = vperm.xlu1 %4127, %v1809_v55   ;;  %2645 = vperm.xlu0 %4133, %v2643_v56  }
  0x3e   :  { %4128 = vset.pattern.permute.xlu1 %v4259_v63 }
  0x3f   :  { %1950 = vperm.xlu1 %4128, %v1948_v61  }
  0x43   :  { %4129 = vset.pattern.permute.xlu1 %v4260_v6 }
  0x44   :  { %2089 = vperm.xlu1 %4129, %v2087_v3  }
  0x48   :  { %4131 = vset.pattern.permute.xlu1 %v4261_v14 }
  0x49   :  { %2367 = vperm.xlu1 %4131, %v2365_v9  }
  0x4d   :  { %4132 = vset.pattern.permute.xlu1 %v4262_v16 }
  0x4e   :  { %2506 = vperm.xlu1 %4132, %v2504_v15  }
  0x58   :  { %417 = vxpose.xlu0.b32.start.end [1/1] (short) (narrow) %v4369_v13, 8 }
  0x77   :  { %309 = vxpose.xlu1.b32.start.end [1/1] (short) (narrow) %v4362_v11, 8 }
  0x7e   :  { %v105_v18 = vpop.trf.xlu0 }
  0x7f   :  { %3948 = vmatmul.mubr.msk.f32.vlgmr.msra.gmra.mxu0 %vm121_vm2, %v105_v18 }
  0x80   :  { %3957 = vmatprep.mubr.msk.f32.mxu0 %vm4247_vm1, %v4246_v10  ;;  %3956 = vmatpush3.msk.msra.mxu0 %vm125_vm0, %v307_v0 }
  0x81   :  { %4134 = vset.pattern.permute.xlu0 %v4245_v2  ;;  %3965 = vmatprep.subr.mxu0 %v4263_v36 }
  0x82   :  { %v215_v19 = vpop.trf.xlu0 }
  0x83   :  { %3953 = vmatmul.mubr.msk.f32.vlgmr.msra.gmra.mxu1 %vm121_vm2, %v215_v19  ;;  %v562_v20 = vpop.permute.xlu1 %561 }
  0x84   :  { %3962 = vmatprep.mubr.msk.f32.mxu1 %vm4247_vm1, %v4246_v10  ;;  %3961 = vmatpush3.msk.msra.mxu1 %vm125_vm0, %v308_v35  ;;  %vm2866_vm0 = vcmask 7168  }
  0x85   :  { %3970 = vmatprep.subr.mxu1 %v4263_v36 }
  0x88   :  { %v700_v22 = vpop.permute.xlu1 %699 }
  0x8d   :  { %v978_v13 = vpop.permute.xlu1 %977 }
  0x92   :  { %v1117_v23 = vpop.permute.xlu1 %1116 }
  0x95   :  { %4135 = vset.pattern.permute.xlu1 %v4245_v2 }
  0x97   :  { %v4477_v11 = vpop.permute.xlu1 %1255 }
  0x9c   :  { %v4479_v24 = vpop.permute.xlu1 %1394 }
  0xa1   :  { %v66_v26 = vpop.permute.xlu1 %65 }
  0xa2   :  { %vm70_vm8 = vcmp.lt.s32.totalorder %v4347_v4, %v66_v26  ;;  %vm72_vm9 = vcmp.lt.s32.totalorder %v55_v28, %v66_v26 }
  0xa3   :  { %vm74_vm10 = vmand %vm70_vm8, %vm72_vm9 }
  0xa4   :  { %vm77_vm11 = vmand %vm74_vm10, %vm76_vm5 }
  0xa6   :  { %v4481_v27 = vpop.permute.xlu1 %1533 }
  0xab   :  { %v69_v30 = vpop.permute.xlu1 %68  ;;  %v839_v34 = vpop.permute.xlu0 %838 }
  0xac   :  { %vm71_vm3 = vcmp.lt.s32.totalorder %v4347_v4, %v69_v30  ;;  %vm73_vm4 = vcmp.lt.s32.totalorder %v55_v28, %v69_v30  ;;  %v4544_v28 = vsel %vm77_vm11, 1.0, %v4246_v10 }
  0xad   :  { %vm75_vm6 = vmand %vm71_vm3, %vm73_vm4  ;;  %vm3541_vm3 = vcmask 130048  }
  0xae   :  { %vm4488_vm7 = vmand %vm75_vm6, %vm76_vm5 }
  0xb0   :  { %v4502_v37 = vpop.permute.xlu0 %2228  ;;  %v4506_v40 = vpop.permute.xlu1 %1672 }
  0xb5   :  { %v4504_v39 = vpop.permute.xlu0 %2645  ;;  %v1812_v43 = vpop.permute.xlu1 %1811 }
  0xba   :  { %v4511_v44 = vpop.permute.xlu1 %1950 }
  0xbf   :  { %v4513_v45 = vpop.permute.xlu1 %2089 }
  0xc4   :  { %v4515_v47 = vpop.permute.xlu1 %2367 }
  0xc9   :  { %v4517_v48 = vpop.permute.xlu1 %2506 }
  0xd4   :  { %v433_v41 = vpop.trf.xlu0 }
  0xd5   :  { %3963 = vmatmul.mubr.msk.f32.vlgmr.msra.gmra.mxu1 %vm121_vm2, %v433_v41 }
  0xd6   :  { %3971 = vmatpush3.msra.mxu1 %v4263_v36 }
  0xd7   :  { %3980 = vmatprep.subr.mxu1 %v4263_v36 }
  0xf3   :  { %v325_v49 = vpop.trf.xlu1 }
  0xf4   :  { %3958 = vmatmul.mubr.msk.f32.vlgmr.msra.gmra.mxu0 %vm121_vm2, %v325_v49  ;;  %vm2881_vm2 = vcmask 0  }
  0xf5   :  { %3966 = vmatpush3.msra.mxu0 %v4263_v36 }
  0xf6   :  { %3975 = vmatprep.subr.mxu0 %v4263_v36 }
 0x13f   :  { %v4523_v50 = vpop.f32.mrf.mxu0 }
 0x140   :  { %v564_v51 = vmul.f32 %v562_v20, %v4523_v50  ;;  %v702_v53 = vmul.f32 %v700_v22, %v4523_v50  ;;  %v841_v55 = vmul.f32 %v839_v34, %v4523_v50  ;;  %v980_v56 = vmul.f32 %v978_v13, %v4523_v50 }
 0x141   :  { %v3949_v57 = vpop.f32.mrf.mxu0  ;;  %v1119_v5 = vmul.f32 %v1117_v23, %v4523_v50  ;;  %v1258_v19 = vmul.f32 %v4477_v11, %v4523_v50  ;;  %v1536_v49 = vmul.f32 %v4481_v27, %v4523_v50 }
 0x142   :  { %v566_v59 = vmul.f32 1.442695, %v564_v51  ;;  %v704_v61 = vmul.f32 1.442695, %v702_v53  ;;  %v843_v62 = vmul.f32 1.442695, %v841_v55  ;;  %v1675_v53 = vmul.f32 %v4506_v40, %v4523_v50 }
 0x143   :  { %v4529_v1 = vpop.f32.mrf.mxu1  ;;  %v982_v3 = vmul.f32 1.442695, %v980_v56  ;;  %v1121_v0 = vmul.f32 1.442695, %v1119_v5  ;;  %v1260_v41 = vmul.f32 1.442695, %v1258_v19  ;;  %v1814_v56 = vmul.f32 %v1812_v43, %v4523_v50 }
 0x144   :  { %4175 = vpow2.f32 %v566_v59  ;;  %v565_v7 = vmul.f32 %v562_v20, %v4529_v1  ;;  %v703_v9 = vmul.f32 %v700_v22, %v4529_v1  ;;  %v842_v12 = vmul.f32 %v839_v34, %v4529_v1 }
 0x145   :  { %v3954_v15 = vpop.f32.mrf.mxu1  ;;  %4177 = vpow2.f32 %v704_v61  ;;  %v981_v18 = vmul.f32 %v978_v13, %v4529_v1  ;;  %v1120_v26 = vmul.f32 %v1117_v23, %v4529_v1  ;;  %v1259_v34 = vmul.f32 %v4477_v11, %v4529_v1 }
 0x146   :  { %v568_v30 = vmul.f32 1.442695, %v565_v7  ;;  %v706_v35 = vmul.f32 1.442695, %v703_v9  ;;  %4179 = vpow2.f32 %v843_v62  ;;  %v845_v20 = vmul.f32 1.442695, %v842_v12 }
 0x147   :  { %4181 = vpow2.f32 %v982_v3  ;;  %v984_v22 = vmul.f32 1.442695, %v981_v18  ;;  %v1397_v13 = vmul.f32 %v4479_v24, %v4523_v50  ;;  %v4551_v23 = vsel %vm4488_vm7, 1.0, %v4246_v10 }
 0x148   :  { %4183 = vpow2.f32 %v568_v30  ;;  %v1123_v11 = vmul.f32 1.442695, %v1120_v26  ;;  %v1398_v51 = vmul.f32 %v4479_v24, %v4529_v1  ;;  %v1262_v55 = vmul.f32 1.442695, %v1259_v34  ;;  %v3739_v26 = vld [vmem:[%s5054_s3] ss:$0 sm:$0xff] }
 0x149   :  { %4185 = vpow2.f32 %v706_v35  ;;  %v1537_v32 = vmul.f32 %v4481_v27, %v4529_v1  ;;  %v1399_v57 = vmul.f32 1.442695, %v1397_v13  ;;  %v1676_v59 = vmul.f32 %v4506_v40, %v4529_v1 }
 0x14a   :  { %4187 = vpow2.f32 %v845_v20  ;;  %v1815_v61 = vmul.f32 %v1812_v43, %v4529_v1  ;;  %v1538_v24 = vmul.f32 1.442695, %v1536_v49  ;;  %v1953_v62 = vmul.f32 %v4511_v44, %v4523_v50  ;;  %v3753_v49 = vld [vmem:[%s5054_s3 + $0x4] ss:$0 sm:$0xff] }
 0x14b   :  { %4189 = vpow2.f32 %v984_v22  ;;  %v2092_v3 = vmul.f32 %v4513_v45, %v4523_v50  ;;  %v1401_v5 = vmul.f32 1.442695, %v1398_v51  ;;  %v1954_v27 = vmul.f32 %v4511_v44, %v4529_v1  ;;  %v3746_v22 = vld [vmem:[%s5054_s3 + $0x2] ss:$0 sm:$0xff] }
 0x14c   :  { %4191 = vpow2.f32 %v1121_v0  ;;  %v2093_v7 = vmul.f32 %v4513_v45, %v4529_v1  ;;  %v1540_v40 = vmul.f32 1.442695, %v1537_v32  ;;  %v1677_v9 = vmul.f32 1.442695, %v1675_v53 }
 0x14d   :  { %4193 = vpow2.f32 %v1260_v41  ;;  %v1816_v43 = vmul.f32 1.442695, %v1814_v56  ;;  %v1679_v12 = vmul.f32 1.442695, %v1676_v59  ;;  %v1818_v15 = vmul.f32 1.442695, %v1815_v61 }
 0x14e   :  { %4195 = vpow2.f32 %v1123_v11  ;;  %v2231_v18 = vmul.f32 %v4502_v37, %v4523_v50  ;;  %v1955_v44 = vmul.f32 1.442695, %v1953_v62  ;;  %v2094_v30 = vmul.f32 1.442695, %v2092_v3  ;;  %v3760_v56 = vld [vmem:[%s5054_s3 + $0x6] ss:$0 sm:$0xff] }
 0x14f   :  { %4197 = vpow2.f32 %v1262_v55  ;;  %v2370_v45 = vmul.f32 %v4515_v47, %v4523_v50  ;;  %v1957_v34 = vmul.f32 1.442695, %v1954_v27  ;;  %v4584_v0 = vmul.f32 1.442695, %v2093_v7 }
 0x150   :  { %4199 = vpow2.f32 %v1399_v57  ;;  %v2232_v11 = vmul.f32 %v4502_v37, %v4529_v1  ;;  %v2371_v51 = vmul.f32 %v4515_v47, %v4529_v1  ;;  %v2233_v57 = vmul.f32 1.442695, %v2231_v18  ;;  %v3754_v18 = vld [vmem:[%s5054_s3 + $0x5] ss:$0 sm:$0xff] }
 0x151   :  { %v4176_v19 = vpop.eup %4175  ;;  %4201 = vpow2.f32 %v1538_v24  ;;  %v3740_v24 = vld [vmem:[%s5054_s3 + $0x1] ss:$0 sm:$0xff]  ;;  %v4602_v47 = vmul.f32 1.442695, %v2370_v45  ;;  %v2509_v7 = vmul.f32 %v4517_v48, %v4523_v50 }
 0x152   :  { %v4178_v35 = vpop.eup %4177  ;;  %v570_v20 = vmul.f32 %v4176_v19, %v4544_v28  ;;  %4203 = vpow2.f32 %v1401_v5  ;;  %v3747_v5 = vld [vmem:[%s5054_s3 + $0x3] ss:$0 sm:$0xff]  ;;  %v2235_v19 = vmul.f32 1.442695, %v2232_v11 }
 0x153   :  { %v4180_v13 = vpop.eup %4179  ;;  %v708_v41 = vmul.f32 %v4178_v35, %v4544_v28  ;;  %4205 = vpow2.f32 %v1540_v40  ;;  %v3761_v35 = vld [vmem:[%s5054_s3 + $0x7] ss:$0 sm:$0xff] }
 0x154   :  { %v4182_v53 = vpop.eup %4181  ;;  %v586_v55 = vmul.f32 %v3739_v26, %v570_v20  ;;  %v847_v32 = vmul.f32 %v4180_v13, %v4544_v28  ;;  %4207 = vpow2.f32 %v1677_v9  ;;  %v2374_v20 = vmul.f32 1.442695, %v2371_v51 }
 0x155   :  { %v4184_v59 = vpop.eup %4183  ;;  %v725_v61 = vmul.f32 %v3746_v22, %v708_v41  ;;  %v986_v37 = vmul.f32 %v4182_v53, %v4544_v28  ;;  %4209 = vpow2.f32 %v1816_v43  ;;  %v3774_v53 = vld [vmem:[%s5054_s3 + $0xa] ss:$0 sm:$0xff] }
 0x156   :  { %v4186_v62 = vpop.eup %4185  ;;  %589 = vst.msk [vmem:[#allocation2] sm:$0xff] %vm588_vm12, %v586_v55  ;;  %3967 = vmatprep.mubr.msk.f32.mxu0 %vm588_vm12, %v586_v55  ;;  %v571_v3 = vmul.f32 %v4184_v59, %v4551_v23  ;;  %v864_v27 = vmul.f32 %v3753_v49, %v847_v32  ;;  %4211 = vpow2.f32 %v1679_v12  ;;  %v2648_v49 = vmul.f32 %v4504_v39, %v4523_v50 }
 0x157   :  { %v4188_v40 = vpop.eup %4187  ;;  %728 = vst.msk [vmem:[#allocation2 + $0x10] sm:$0xff] %vm588_vm12, %v725_v61  ;;  %3972 = vmatprep.mubr.msk.f32.mxu1 %vm588_vm12, %v725_v61  ;;  %v709_v9 = vmul.f32 %v4186_v62, %v4551_v23  ;;  %v1003_v43 = vmul.f32 %v3760_v56, %v986_v37  ;;  %4213 = vpow2.f32 %v1818_v15  ;;  %v3767_v15 = vld [vmem:[%s5054_s3 + $0x8] ss:$0 sm:$0xff]  ;;  %v2510_v55 = vmul.f32 %v4517_v48, %v4529_v1  ;;  %v3768_v56 = vld [vmem:[%s5054_s3 + $0x9] ss:$0 sm:$0xff] }
 0x158   :  { %v4190_v26 = vpop.eup %4189  ;;  %v587_v45 = vmul.f32 %v3740_v24, %v571_v3  ;;  %867 = vst.msk [vmem:[#allocation2 + $0x20] sm:$0xff] %vm588_vm12, %v864_v27  ;;  %v848_v12 = vmul.f32 %v4188_v40, %v4551_v23  ;;  %4215 = vpow2.f32 %v1955_v44  ;;  %v3775_v24 = vld [vmem:[%s5054_s3 + $0xb] ss:$0 sm:$0xff]  ;;  %v2511_v37 = vmul.f32 1.442695, %v2509_v7 }
 0x159   :  { %v4192_v22 = vpop.eup %4191  ;;  %v726_v13 = vmul.f32 %v3747_v5, %v709_v9  ;;  %1006 = vst.msk [vmem:[#allocation2 + $0x30] sm:$0xff] %vm588_vm12, %v1003_v43  ;;  %v987_v41 = vmul.f32 %v4190_v26, %v4551_v23  ;;  %4217 = vpow2.f32 %v2094_v30  ;;  %v3781_v62 = vld [vmem:[%s5054_s3 + $0xc] ss:$0 sm:$0xff]  ;;  %v2650_v3 = vmul.f32 1.442695, %v2648_v49 }
 0x15a   :  { %v4194_v11 = vpop.eup %4193  ;;  %590 = vst.msk [vmem:[#allocation2 + $0x8] sm:$0xff] %vm588_vm12, %v587_v45  ;;  %3968 = vmatmul.mubr.msk.f32.vlgmr.msra.gmra.mxu0 %vm588_vm12, %v587_v45  ;;  %v865_v44 = vmul.f32 %v3754_v18, %v848_v12  ;;  %v1125_v51 = vmul.f32 %v4192_v22, %v4544_v28  ;;  %4219 = vpow2.f32 %v1957_v34  ;;  %v2649_v34 = vmul.f32 %v4504_v39, %v4529_v1  ;;  %v3788_v7 = vld [vmem:[%s5054_s3 + $0xe] ss:$0 sm:$0xff]  ;;  %v3782_v18 = vld [vmem:[%s5054_s3 + $0xd] ss:$0 sm:$0xff] }
 0x15b   :  { %v4196_v30 = vpop.eup %4195  ;;  %729 = vst.msk [vmem:[#allocation2 + $0x18] sm:$0xff] %vm588_vm12, %v726_v13  ;;  %3973 = vmatmul.mubr.msk.f32.vlgmr.msra.gmra.mxu1 %vm588_vm12, %v726_v13  ;;  %3977 = vmatprep.mubr.msk.f32.mxu0 %vm588_vm12, %v864_v27  ;;  %v1004_v50 = vmul.f32 %v3761_v35, %v987_v41  ;;  %v1264_v32 = vmul.f32 %v4194_v11, %v4544_v28  ;;  %4221 = vpow2.f32 %v4584_v0  ;;  %v2513_v40 = vmul.f32 1.442695, %v2510_v55  ;;  %v3789_v35 = vld [vmem:[%s5054_s3 + $0xf] ss:$0 sm:$0xff] }
 0x15c   :  { %v4198_v48 = vpop.eup %4197  ;;  %3982 = vmatprep.mubr.msk.f32.mxu1 %vm588_vm12, %v1003_v43  ;;  %3976 = vmatpush3.msra.mxu0 %v4263_v36  ;;  %868 = vst.msk [vmem:[#allocation2 + $0x28] sm:$0xff] %vm588_vm12, %v865_v44  ;;  %v1142_v59 = vmul.f32 %v3767_v15, %v1125_v51  ;;  %v1126_v61 = vmul.f32 %v4196_v30, %v4551_v23  ;;  %4223 = vpow2.f32 %v2233_v57  ;;  %v2652_v26 = vmul.f32 1.442695, %v2649_v34  ;;  %v3795_v41 = vld [vmem:[%s5054_s3 + $0x10] ss:$0 sm:$0xff] }
 0x15d   :  { %v4200_v0 = vpop.eup %4199  ;;  %3981 = vmatpush3.msra.mxu1 %v4263_v36  ;;  %1007 = vst.msk [vmem:[#allocation2 + $0x38] sm:$0xff] %vm588_vm12, %v1004_v50  ;;  %v1281_v39 = vmul.f32 %v3774_v53, %v1264_v32  ;;  %3985 = vmatprep.subr.mxu0 %v4263_v36  ;;  %v1265_v1 = vmul.f32 %v4198_v48, %v4551_v23  ;;  %4225 = vpow2.f32 %v4602_v47  ;;  %v3796_v30 = vld [vmem:[%s5054_s3 + $0x11] ss:$0 sm:$0xff]  ;;  %v3803_v34 = vld [vmem:[%s5054_s3 + $0x13] ss:$0 sm:$0xff] }
 0x15e   :  { %v4202_v5 = vpop.eup %4201  ;;  %3978 = vmatmul.mubr.msk.f32.vlgmr.msra.gmra.mxu0 %vm588_vm12, %v865_v44  ;;  %1145 = vst.msk [vmem:[#allocation2 + $0x40] sm:$0xff] %vm588_vm12, %v1142_v59  ;;  %3990 = vmatprep.subr.mxu1 %v4263_v36  ;;  %v1143_v57 = vmul.f32 %v3768_v56, %v1126_v61  ;;  %v1403_v27 = vmul.f32 %v4200_v0, %v4544_v28  ;;  %4227 = vpow2.f32 %v2235_v19  ;;  %v3802_v44 = vld [vmem:[%s5054_s3 + $0x12] ss:$0 sm:$0xff] }
 0x15f   :  { %v4204_v9 = vpop.eup %4203  ;;  %3983 = vmatmul.mubr.msk.f32.vlgmr.msra.gmra.mxu1 %vm588_vm12, %v1004_v50  ;;  %3987 = vmatprep.mubr.msk.f32.mxu0 %vm588_vm12, %v1142_v59  ;;  %1284 = vst.msk [vmem:[#allocation2 + $0x50] sm:$0xff] %vm588_vm12, %v1281_v39  ;;  %v1282_v47 = vmul.f32 %v3775_v24, %v1265_v1  ;;  %v1542_v43 = vmul.f32 %v4202_v5, %v4544_v28  ;;  %4229 = vpow2.f32 %v2374_v20  ;;  %v3809_v24 = vld [vmem:[%s5054_s3 + $0x14] ss:$0 sm:$0xff]  ;;  %v3816_v1 = vld [vmem:[%s5054_s3 + $0x16] ss:$0 sm:$0xff] }
 0x160   :  { %v4206_v45 = vpop.eup %4205  ;;  %3992 = vmatprep.mubr.msk.f32.mxu1 %vm588_vm12, %v1281_v39  ;;  %3986 = vmatpush3.msra.mxu0 %v4263_v36  ;;  %1146 = vst.msk [vmem:[#allocation2 + $0x48] sm:$0xff] %vm588_vm12, %v1143_v57  ;;  %v1420_v19 = vmul.f32 %v3781_v62, %v1403_v27  ;;  %v1404_v12 = vmul.f32 %v4204_v9, %v4551_v23  ;;  %4231 = vpow2.f32 %v2511_v37  ;;  %v3817_v9 = vld [vmem:[%s5054_s3 + $0x17] ss:$0 sm:$0xff] }
 0x161   :  { %v4208_v22 = vpop.eup %4207  ;;  %3991 = vmatpush3.msra.mxu1 %v4263_v36  ;;  %1285 = vst.msk [vmem:[#allocation2 + $0x58] sm:$0xff] %vm588_vm12, %v1282_v47  ;;  %v1559_v20 = vmul.f32 %v3788_v7, %v1542_v43  ;;  %3995 = vmatprep.subr.mxu0 %v4263_v36  ;;  %v1543_v13 = vmul.f32 %v4206_v45, %v4551_v23  ;;  %4233 = vpow2.f32 %v2650_v3 }
 0x162   :  { %v4210_v15 = vpop.eup %4209  ;;  %3988 = vmatmul.mubr.msk.f32.vlgmr.msra.gmra.mxu0 %vm588_vm12, %v1143_v57  ;;  %1423 = vst.msk [vmem:[#allocation2 + $0x60] sm:$0xff] %vm588_vm12, %v1420_v19  ;;  %4000 = vmatprep.subr.mxu1 %v4263_v36  ;;  %v1421_v49 = vmul.f32 %v3782_v18, %v1404_v12  ;;  %v1681_v11 = vmul.f32 %v4208_v22, %v4544_v28  ;;  %4235 = vpow2.f32 %v2513_v40  ;;  %v3810_v57 = vld [vmem:[%s5054_s3 + $0x15] ss:$0 sm:$0xff] }
 0x163   :  { %v4212_v51 = vpop.eup %4211  ;;  %3993 = vmatmul.mubr.msk.f32.vlgmr.msra.gmra.mxu1 %vm588_vm12, %v1282_v47  ;;  %3997 = vmatprep.mubr.msk.f32.mxu0 %vm588_vm12, %v1420_v19  ;;  %1562 = vst.msk [vmem:[#allocation2 + $0x70] sm:$0xff] %vm588_vm12, %v1559_v20  ;;  %v1560_v53 = vmul.f32 %v3789_v35, %v1543_v13  ;;  %v1820_v55 = vmul.f32 %v4210_v15, %v4544_v28  ;;  %4237 = vpow2.f32 %v2652_v26  ;;  %v3823_v26 = vld [vmem:[%s5054_s3 + $0x18] ss:$0 sm:$0xff]  ;;  %v3830_v35 = vld [vmem:[%s5054_s3 + $0x1a] ss:$0 sm:$0xff] }
 0x164   :  { %v4214_v50 = vpop.eup %4213  ;;  %4002 = vmatprep.mubr.msk.f32.mxu1 %vm588_vm12, %v1559_v20  ;;  %3996 = vmatpush3.msra.mxu0 %v4263_v36  ;;  %1424 = vst.msk [vmem:[#allocation2 + $0x68] sm:$0xff] %vm588_vm12, %v1421_v49  ;;  %v1698_v32 = vmul.f32 %v3795_v41, %v1681_v11  ;;  %v1682_v56 = vmul.f32 %v4212_v51, %v4551_v23  ;;  %v3824_v41 = vld [vmem:[%s5054_s3 + $0x19] ss:$0 sm:$0xff] }
 0x165   :  { %v4216_v48 = vpop.eup %4215  ;;  %4001 = vmatpush3.msra.mxu1 %v4263_v36  ;;  %1563 = vst.msk [vmem:[#allocation2 + $0x78] sm:$0xff] %vm588_vm12, %v1560_v53  ;;  %v1837_v59 = vmul.f32 %v3802_v44, %v1820_v55  ;;  %4005 = vmatprep.subr.mxu0 %v4263_v36  ;;  %v1821_v61 = vmul.f32 %v4214_v50, %v4551_v23  ;;  %v3831_v44 = vld [vmem:[%s5054_s3 + $0x1b] ss:$0 sm:$0xff] }
 0x166   :  { %v4218_v37 = vpop.eup %4217  ;;  %3998 = vmatmul.mubr.msk.f32.vlgmr.msra.gmra.mxu0 %vm588_vm12, %v1421_v49  ;;  %1701 = vst.msk [vmem:[#allocation2 + $0x80] sm:$0xff] %vm588_vm12, %v1698_v32  ;;  %4010 = vmatprep.subr.mxu1 %v4263_v36  ;;  %v1699_v0 = vmul.f32 %v3796_v30, %v1682_v56  ;;  %v1959_v39 = vmul.f32 %v4216_v48, %v4544_v28  ;;  %v3837_v30 = vld [vmem:[%s5054_s3 + $0x1c] ss:$0 sm:$0xff] }
 0x167   :  { %v4220_v62 = vpop.eup %4219  ;;  %4003 = vmatmul.mubr.msk.f32.vlgmr.msra.gmra.mxu1 %vm588_vm12, %v1560_v53  ;;  %4007 = vmatprep.mubr.msk.f32.mxu0 %vm588_vm12, %v1698_v32  ;;  %1840 = vst.msk [vmem:[#allocation2 + $0x90] sm:$0xff] %vm588_vm12, %v1837_v59  ;;  %v1838_v3 = vmul.f32 %v3803_v34, %v1821_v61  ;;  %v2098_v5 = vmul.f32 %v4218_v37, %v4544_v28  ;;  %v3844_v34 = vld [vmem:[%s5054_s3 + $0x1e] ss:$0 sm:$0xff] }
 0x168   :  { %v4222_v27 = vpop.eup %4221  ;;  %4012 = vmatprep.mubr.msk.f32.mxu1 %vm588_vm12, %v1837_v59  ;;  %4006 = vmatpush3.msra.mxu0 %v4263_v36  ;;  %1702 = vst.msk [vmem:[#allocation2 + $0x88] sm:$0xff] %vm588_vm12, %v1699_v0  ;;  %v1976_v7 = vmul.f32 %v3809_v24, %v1959_v39  ;;  %v1960_v40 = vmul.f32 %v4220_v62, %v4551_v23  ;;  %v3838_v24 = vld [vmem:[%s5054_s3 + $0x1d] ss:$0 sm:$0xff] }
 0x169   :  { %v4224_v47 = vpop.eup %4223  ;;  %4011 = vmatpush3.msra.mxu1 %v4263_v36  ;;  %1841 = vst.msk [vmem:[#allocation2 + $0x98] sm:$0xff] %vm588_vm12, %v1838_v3  ;;  %v2115_v43 = vmul.f32 %v3816_v1, %v2098_v5  ;;  %4015 = vmatprep.subr.mxu0 %v4263_v36  ;;  %v2099_v18 = vmul.f32 %v4222_v27, %v4551_v23  ;;  %v3845_v1 = vld [vmem:[%s5054_s3 + $0x1f] ss:$0 sm:$0xff] }
 0x16a   :  { %v4226_v45 = vpop.eup %4225  ;;  %4008 = vmatmul.mubr.msk.f32.vlgmr.msra.gmra.mxu0 %vm588_vm12, %v1699_v0  ;;  %1979 = vst.msk [vmem:[#allocation2 + $0xa0] sm:$0xff] %vm588_vm12, %v1976_v7  ;;  %4020 = vmatprep.subr.mxu1 %v4263_v36  ;;  %v1977_v19 = vmul.f32 %v3810_v57, %v1960_v40  ;;  %v2237_v12 = vmul.f32 %v4224_v47, %v4544_v28 }
 0x16b   :  { %v4228_v22 = vpop.eup %4227  ;;  %4013 = vmatmul.mubr.msk.f32.vlgmr.msra.gmra.mxu1 %vm588_vm12, %v1838_v3  ;;  %4017 = vmatprep.mubr.msk.f32.mxu0 %vm588_vm12, %v1976_v7  ;;  %2118 = vst.msk [vmem:[#allocation2 + $0xb0] sm:$0xff] %vm588_vm12, %v2115_v43  ;;  %v2116_v20 = vmul.f32 %v3817_v9, %v2099_v18  ;;  %v2376_v13 = vmul.f32 %v4226_v45, %v4544_v28 }
 0x16c   :  { %v4230_v15 = vpop.eup %4229  ;;  %4022 = vmatprep.mubr.msk.f32.mxu1 %vm588_vm12, %v2115_v43  ;;  %4016 = vmatpush3.msra.mxu0 %v4263_v36  ;;  %1980 = vst.msk [vmem:[#allocation2 + $0xa8] sm:$0xff] %vm588_vm12, %v1977_v19  ;;  %v2254_v49 = vmul.f32 %v3823_v26, %v2237_v12  ;;  %v2238_v11 = vmul.f32 %v4228_v22, %v4551_v23 }
 0x16d   :  { %v4232_v51 = vpop.eup %4231  ;;  %4021 = vmatpush3.msra.mxu1 %v4263_v36  ;;  %2119 = vst.msk [vmem:[#allocation2 + $0xb8] sm:$0xff] %vm588_vm12, %v2116_v20  ;;  %v2393_v53 = vmul.f32 %v3830_v35, %v2376_v13  ;;  %4025 = vmatprep.subr.mxu0 %v4263_v36  ;;  %v2377_v55 = vmul.f32 %v4230_v15, %v4551_v23 }
 0x16e   :  { %v4234_v50 = vpop.eup %4233  ;;  %4018 = vmatmul.mubr.msk.f32.vlgmr.msra.gmra.mxu0 %vm588_vm12, %v1977_v19  ;;  %2257 = vst.msk [vmem:[#allocation2 + $0xc0] sm:$0xff] %vm588_vm12, %v2254_v49  ;;  %4030 = vmatprep.subr.mxu1 %v4263_v36  ;;  %v2255_v32 = vmul.f32 %v3824_v41, %v2238_v11  ;;  %v2515_v56 = vmul.f32 %v4232_v51, %v4544_v28 }
 0x16f   :  { %v4236_v48 = vpop.eup %4235  ;;  %4023 = vmatmul.mubr.msk.f32.vlgmr.msra.gmra.mxu1 %vm588_vm12, %v2116_v20  ;;  %4027 = vmatprep.mubr.msk.f32.mxu0 %vm588_vm12, %v2254_v49  ;;  %2396 = vst.msk [vmem:[#allocation2 + $0xd0] sm:$0xff] %vm588_vm12, %v2393_v53  ;;  %v2394_v59 = vmul.f32 %v3831_v44, %v2377_v55  ;;  %v2654_v61 = vmul.f32 %v4234_v50, %v4544_v28 }
 0x170   :  { %v4238_v37 = vpop.eup %4237  ;;  %4032 = vmatprep.mubr.msk.f32.mxu1 %vm588_vm12, %v2393_v53  ;;  %4026 = vmatpush3.msra.mxu0 %v4263_v36  ;;  %2258 = vst.msk [vmem:[#allocation2 + $0xc8] sm:$0xff] %vm588_vm12, %v2255_v32  ;;  %v2532_v0 = vmul.f32 %v3837_v30, %v2515_v56  ;;  %v2516_v39 = vmul.f32 %v4236_v48, %v4551_v23 }
 0x171   :  { %4031 = vmatpush3.msra.mxu1 %v4263_v36  ;;  %2397 = vst.msk [vmem:[#allocation2 + $0xd8] sm:$0xff] %vm588_vm12, %v2394_v59  ;;  %v2671_v28 = vmul.f32 %v3844_v34, %v2654_v61  ;;  %4035 = vmatprep.subr.mxu0 %v4263_v36  ;;  %v2655_v62 = vmul.f32 %v4238_v37, %v4551_v23  ;;  %v4818_v37 = vsel %vm83_vm13, 1.0, %v4246_v10 }
 0x172   :  { %4028 = vmatmul.mubr.msk.f32.vlgmr.msra.gmra.mxu0 %vm588_vm12, %v2255_v32  ;;  %2535 = vst.msk [vmem:[#allocation2 + $0xe0] sm:$0xff] %vm588_vm12, %v2532_v0  ;;  %4040 = vmatprep.subr.mxu1 %v4263_v36  ;;  %v2533_v3 = vmul.f32 %v3838_v24, %v2516_v39 }
 0x173   :  { %4033 = vmatmul.mubr.msk.f32.vlgmr.msra.gmra.mxu1 %vm588_vm12, %v2394_v59  ;;  %4037 = vmatprep.mubr.msk.f32.mxu0 %vm588_vm12, %v2532_v0  ;;  %2674 = vst.msk [vmem:[#allocation2 + $0xf0] sm:$0xff] %vm588_vm12, %v2671_v28  ;;  %v2672_v5 = vmul.f32 %v3845_v1, %v2655_v62  ;;  %v4821_v0 = vsel %vm84_vm14, 1.0, %v4246_v10  ;;  %v2778_v62 = vld [vmem:[%s5055_s11] sm:$0xff] }
 0x174   :  { %4042 = vmatprep.mubr.msk.f32.mxu1 %vm588_vm12, %v2671_v28  ;;  %4036 = vmatpush3.msra.mxu0 %v4263_v36  ;;  %2536 = vst.msk [vmem:[#allocation2 + $0xe8] sm:$0xff] %vm588_vm12, %v2533_v3  ;;  %v4136_v1 = vpack.i.bf16 %v4821_v0, %v4818_v37  ;;  %v2779_v28 = vld [vmem:[%s5055_s11 + $0x8] sm:$0xff] }
 0x175   :  { %4041 = vmatpush3.msra.mxu1 %v4263_v36  ;;  %2675 = vst.msk [vmem:[#allocation2 + $0xf8] sm:$0xff] %vm588_vm12, %v2672_v5  ;;  %4045 = vmatprep.subr.mxu0 %v2781_v33 }
 0x176   :  { %4038 = vmatmul.mubr.msk.f32.vlgmr.msra.gmra.mxu0 %vm588_vm12, %v2533_v3  ;;  %v2900_v3 = vld [vmem:[%s5056_s8 + $0x18] sm:$0xff] }
 0x177   :  { %4043 = vmatmul.mubr.msk.f32.vlgmr.msra.gmra.mxu1 %vm588_vm12, %v2672_v5  ;;  %4046 = vmatpush3.msra.mxu0 %v2781_v33  ;;  %v2899_v5 = vld [vmem:[%s5056_s8 + $0x10] sm:$0xff] }
 0x178   :  { %4047 = vmatprep.subr.mxu0 %v2780_v42  ;;  %4056 = vmatprep.subr.mxu1 %v2900_v3 }
 0x179   :  { %4048 = vmatpush3.msra.mxu0 %v2780_v42  ;;  %4057 = vmatpush3.msra.mxu1 %v2900_v3  ;;  %v3771_v42 = vld [vmem:[%s5059_s7 + $0x4] ss:$0 sm:$0xff] }
 0x17a   :  { %4049 = vmatprep.subr.mxu0 %v2779_v28  ;;  %4058 = vmatprep.subr.mxu1 %v2899_v5 }
 0x17b   :  { %4050 = vmatpush3.msra.mxu0 %v2779_v28  ;;  %4059 = vmatpush3.msra.mxu1 %v2899_v5  ;;  %v3778_v5 = vld [vmem:[%s5059_s7 + $0x5] ss:$0 sm:$0xff] }
 0x17c   :  { %4051 = vmatprep.subr.mxu0 %v2778_v62 }
 0x17d   :  { %4052 = vmatpush3.msra.mxu0 %v2778_v62 }
 0x17e   :  { %4067 = vmatprep.subr.mxu0 %v4246_v10 }
 0x195   :  { %v521_v23 = vpop.f32.mrf.mxu1 }
 0x196   :  { %533 = vperm.xlu1 %4135, %v521_v23   ;;  %v2898_v23 = vld [vmem:[%s5056_s8 + $0x8] sm:$0xff] }
 0x197   :  { %v3964_v57 = vpop.f32.mrf.mxu1  ;;  %4060 = vmatprep.subr.mxu1 %v2898_v23 }
 0x198   :  { %v2897_v57 = vld [vmem:[%s5056_s8] sm:$0xff]  ;;  %4061 = vmatpush3.msra.mxu1 %v2898_v23 }
 0x199   :  { %4062 = vmatprep.subr.mxu1 %v2897_v57 }
 0x19a   :  { %4063 = vmatpush3.msra.mxu1 %v2897_v57 }
 0x19b   :  { %4072 = vmatprep.subr.mxu1 %v4246_v10 }
 0x1b4   :  { %v413_v27 = vpop.f32.mrf.mxu0 }
 0x1b5   :  { %528 = vperm.xlu0 %4134, %v413_v27  }
 0x1b6   :  { %v3959_v7 = vpop.f32.mrf.mxu0 }
 0x211   :  { %v534_v27 = vpop.permute.xlu1 %533 }
 0x21a   :  { %v3969_v40 = vpop.f32.mrf.mxu0 }
 0x21b   :  { %v3974_v9 = vpop.f32.mrf.mxu1  ;;  %680 = vperm.xlu1 %4135, %v3969_v40  }
 0x21c   :  { %v663_v47 = vpop.f32.mrf.mxu0 }
 0x21d   :  { %v802_v43 = vpop.f32.mrf.mxu1 }
 0x21e   :  { %814 = vperm.xlu0 %4134, %v802_v43   ;;  %v3979_v18 = vpop.f32.mrf.mxu0 }
 0x21f   :  { %819 = vperm.xlu1 %4135, %v3974_v9   ;;  %v3984_v26 = vpop.f32.mrf.mxu1 }
 0x220   :  { %v941_v36 = vpop.f32.mrf.mxu0 }
 0x221   :  { %v1080_v45 = vpop.f32.mrf.mxu1 }
 0x222   :  { %953 = vperm.xlu0 %4134, %v941_v36   ;;  %v3989_v19 = vpop.f32.mrf.mxu0 }
 0x223   :  { %675 = vperm.xlu1 %4135, %v663_v47   ;;  %v3994_v12 = vpop.f32.mrf.mxu1 }
 0x224   :  { %v1219_v35 = vpop.f32.mrf.mxu0 }
 0x225   :  { %v1358_v22 = vpop.f32.mrf.mxu1 }
 0x226   :  { %1092 = vperm.xlu0 %4134, %v1080_v45   ;;  %v3999_v20 = vpop.f32.mrf.mxu0  ;;  %v3737_v45 = vld [vmem:[%s5057_s9] ss:$0 sm:$0xff] }
 0x227   :  { %958 = vperm.xlu1 %4135, %v3979_v18   ;;  %v4004_v13 = vpop.f32.mrf.mxu1 }
 0x228   :  { %v1497_v41 = vpop.f32.mrf.mxu0 }
 0x229   :  { %v1636_v15 = vpop.f32.mrf.mxu1 }
 0x22a   :  { %1231 = vperm.xlu0 %4134, %v1219_v35   ;;  %v4009_v49 = vpop.f32.mrf.mxu0 }
 0x22b   :  { %1097 = vperm.xlu1 %4135, %v3984_v26   ;;  %v4014_v11 = vpop.f32.mrf.mxu1 }
 0x22c   :  { %v1775_v44 = vpop.f32.mrf.mxu0 }
 0x22d   :  { %v1914_v51 = vpop.f32.mrf.mxu1 }
 0x22e   :  { %1370 = vperm.xlu0 %4134, %v1358_v22   ;;  %v4019_v53 = vpop.f32.mrf.mxu0  ;;  %v3738_v22 = vld [vmem:[%s5058_s10] ss:$0 sm:$0xff] }
 0x22f   :  { %1236 = vperm.xlu1 %4135, %v3989_v19   ;;  %v4024_v55 = vpop.f32.mrf.mxu1 }
 0x230   :  { %v2053_v30 = vpop.f32.mrf.mxu0  ;;  %v529_v7 = vpop.permute.xlu0 %528 }
 0x231   :  { %v2192_v50 = vpop.f32.mrf.mxu1 }
 0x232   :  { %1509 = vperm.xlu0 %4134, %v1497_v41   ;;  %v4029_v32 = vpop.f32.mrf.mxu0 }
 0x233   :  { %1375 = vperm.xlu1 %4135, %v3994_v12   ;;  %v4034_v56 = vpop.f32.mrf.mxu1  ;;  %v542_v12 = vmul.f32 %v3737_v45, %v529_v7 }
 0x234   :  { %v2331_v34 = vpop.f32.mrf.mxu0 }
 0x235   :  { %v2470_v48 = vpop.f32.mrf.mxu1 }
 0x236   :  { %1648 = vperm.xlu0 %4134, %v1636_v15   ;;  %v4039_v59 = vpop.f32.mrf.mxu0  ;;  %v551_v15 = vadd.f32 %v3738_v22, %v542_v12 }
 0x237   :  { %1514 = vperm.xlu1 %4135, %v3999_v20   ;;  %v4044_v61 = vpop.f32.mrf.mxu1  ;;  %v3743_v20 = vld [vmem:[%s5059_s7] ss:$0 sm:$0xff] }
 0x238   :  { %v2609_v24 = vpop.f32.mrf.mxu0 }
 0x239   :  { %v2748_v39 = vpop.f32.mrf.mxu1 }
 0x23a   :  { %1787 = vperm.xlu0 %4134, %v1775_v44  }
 0x23b   :  { %1653 = vperm.xlu1 %4135, %v4004_v13  }
 0x23e   :  { %1926 = vperm.xlu0 %4134, %v1914_v51  }
 0x23f   :  { %1792 = vperm.xlu1 %4135, %v4009_v49  }
 0x242   :  { %2065 = vperm.xlu0 %4134, %v2053_v30   ;;  %v3757_v30 = vld [vmem:[%s5059_s7 + $0x2] ss:$0 sm:$0xff] }
 0x243   :  { %1931 = vperm.xlu1 %4135, %v4014_v11   ;;  %v3750_v11 = vld [vmem:[%s5059_s7 + $0x1] ss:$0 sm:$0xff] }
 0x246   :  { %2204 = vperm.xlu0 %4134, %v2192_v50  }
 0x247   :  { %2070 = vperm.xlu1 %4135, %v4019_v53  }
 0x24a   :  { %2343 = vperm.xlu0 %4134, %v2331_v34  }
 0x24b   :  { %2209 = vperm.xlu1 %4135, %v4024_v55  }
 0x24e   :  { %2482 = vperm.xlu0 %4134, %v2470_v48   ;;  %v3764_v48 = vld [vmem:[%s5059_s7 + $0x3] ss:$0 sm:$0xff] }
 0x24f   :  { %2348 = vperm.xlu1 %4135, %v4029_v32  }
 0x252   :  { %2621 = vperm.xlu0 %4134, %v2609_v24  }
 0x253   :  { %2487 = vperm.xlu1 %4135, %v4034_v56  }
 0x256   :  { %2760 = vperm.xlu0 %4134, %v2748_v39  }
 0x257   :  { %2626 = vperm.xlu1 %4135, %v4039_v59  }
 0x25a   :  { %4137 = vperm.xlu0 %4134, %v4136_v1  }
 0x25b   :  { %2765 = vperm.xlu1 %4135, %v4044_v61   ;;  %v543_v61 = vmul.f32 %v3737_v45, %v534_v27 }
 0x25d   :  { %v552_v62 = vadd.f32 %v3738_v22, %v543_v61 }
 0x25f   :  { %4142 = vset.pattern.permute.xlu1 %v4254_v46 }
 0x296   :  { %v681_v40 = vpop.permute.xlu1 %680 }
 0x297   :  { %v688_v33 = vmul.f32 %v3743_v20, %v681_v40  ;;  %v3785_v40 = vld [vmem:[%s5059_s7 + $0x6] ss:$0 sm:$0xff] }
 0x299   :  { %v815_v9 = vpop.permute.xlu0 %814 }
 0x29a   :  { %v820_v47 = vpop.permute.xlu1 %819  ;;  %v826_v53 = vmul.f32 %v3750_v11, %v815_v9  ;;  %v690_v9 = vadd.f32 %v688_v33, %v552_v62 }
 0x29b   :  { %v827_v3 = vmul.f32 %v3750_v11, %v820_v47  ;;  %v3792_v47 = vld [vmem:[%s5059_s7 + $0x7] ss:$0 sm:$0xff] }
 0x29d   :  { %v954_v43 = vpop.permute.xlu0 %953 }
 0x29e   :  { %v676_v18 = vpop.permute.xlu1 %675  ;;  %v965_v56 = vmul.f32 %v3757_v30, %v954_v43 }
 0x29f   :  { %v687_v13 = vmul.f32 %v3743_v20, %v676_v18 }
 0x2a1   :  { %v1093_v36 = vpop.permute.xlu0 %1092  ;;  %v689_v44 = vadd.f32 %v687_v13, %v551_v15 }
 0x2a2   :  { %v959_v26 = vpop.permute.xlu1 %958  ;;  %v1104_v39 = vmul.f32 %v3764_v48, %v1093_v36  ;;  %v829_v36 = vadd.f32 %v827_v3, %v690_v9 }
 0x2a3   :  { %v828_v50 = vadd.f32 %v826_v53, %v689_v44  ;;  %v966_v27 = vmul.f32 %v3757_v30, %v959_v26  ;;  %v3799_v26 = vld [vmem:[%s5059_s7 + $0x8] ss:$0 sm:$0xff] }
 0x2a5   :  { %v1232_v19 = vpop.permute.xlu0 %1231  ;;  %v967_v59 = vadd.f32 %v965_v56, %v828_v50  ;;  %v968_v13 = vadd.f32 %v966_v27, %v829_v36 }
 0x2a6   :  { %v1098_v35 = vpop.permute.xlu1 %1097  ;;  %v1243_v57 = vmul.f32 %v3771_v42, %v1232_v19 }
 0x2a7   :  { %v1106_v28 = vadd.f32 %v1104_v39, %v967_v59  ;;  %v1105_v45 = vmul.f32 %v3764_v48, %v1098_v35  ;;  %v3806_v35 = vld [vmem:[%s5059_s7 + $0x9] ss:$0 sm:$0xff] }
 0x2a9   :  { %v1371_v41 = vpop.permute.xlu0 %1370  ;;  %v1245_v43 = vadd.f32 %v1243_v57, %v1106_v28  ;;  %v1107_v44 = vadd.f32 %v1105_v45, %v968_v13 }
 0x2aa   :  { %v1237_v49 = vpop.permute.xlu1 %1236  ;;  %v1382_v18 = vmul.f32 %v3778_v5, %v1371_v41 }
 0x2ab   :  { %v1244_v19 = vmul.f32 %v3771_v42, %v1237_v49  ;;  %v3813_v49 = vld [vmem:[%s5059_s7 + $0xa] ss:$0 sm:$0xff] }
 0x2ac   :  { %v1384_v15 = vadd.f32 %v1382_v18, %v1245_v43 }
 0x2ad   :  { %v1510_v51 = vpop.permute.xlu0 %1509 }
 0x2ae   :  { %v1376_v55 = vpop.permute.xlu1 %1375  ;;  %v1521_v22 = vmul.f32 %v3785_v40, %v1510_v51  ;;  %v1246_v51 = vadd.f32 %v1244_v19, %v1107_v44 }
 0x2af   :  { %v1383_v53 = vmul.f32 %v3778_v5, %v1376_v55  ;;  %v3820_v55 = vld [vmem:[%s5059_s7 + $0xb] ss:$0 sm:$0xff] }
 0x2b0   :  { %v1523_v30 = vadd.f32 %v1521_v22, %v1384_v15 }
 0x2b1   :  { %v1649_v32 = vpop.permute.xlu0 %1648  ;;  %v1385_v39 = vadd.f32 %v1383_v53, %v1246_v51  ;;  %v3848_v53 = vld [vmem:[%s5059_s7 + $0xf] ss:$0 sm:$0xff] }
 0x2b2   :  { %v1515_v34 = vpop.permute.xlu1 %1514  ;;  %v1660_v11 = vmul.f32 %v3792_v47, %v1649_v32 }
 0x2b3   :  { %v1522_v48 = vmul.f32 %v3785_v40, %v1515_v34  ;;  %v3827_v34 = vld [vmem:[%s5059_s7 + $0xc] ss:$0 sm:$0xff] }
 0x2b4   :  { %v1662_v59 = vadd.f32 %v1660_v11, %v1523_v30 }
 0x2b5   :  { %v1788_v24 = vpop.permute.xlu0 %1787 }
 0x2b6   :  { %v1654_v1 = vpop.permute.xlu1 %1653  ;;  %v1799_v50 = vmul.f32 %v3799_v26, %v1788_v24  ;;  %v1524_v24 = vadd.f32 %v1522_v48, %v1385_v39 }
 0x2b7   :  { %v1661_v32 = vmul.f32 %v3792_v47, %v1654_v1  ;;  %v3834_v1 = vld [vmem:[%s5059_s7 + $0xd] ss:$0 sm:$0xff] }
 0x2b8   :  { %v1801_v42 = vadd.f32 %v1799_v50, %v1662_v59 }
 0x2b9   :  { %v1927_v23 = vpop.permute.xlu0 %1926  ;;  %v1663_v9 = vadd.f32 %v1661_v32, %v1524_v24  ;;  %v3851_v24 = vld [vmem:[%s5060_s12] ss:$0 sm:$0xff] }
 0x2ba   :  { %v1793_v7 = vpop.permute.xlu1 %1792  ;;  %v1938_v61 = vmul.f32 %v3806_v35, %v1927_v23 }
 0x2bb   :  { %v1800_v3 = vmul.f32 %v3799_v26, %v1793_v7  ;;  %v3841_v7 = vld [vmem:[%s5059_s7 + $0xe] ss:$0 sm:$0xff] }
 0x2bc   :  { %v1940_v5 = vadd.f32 %v1938_v61, %v1801_v42 }
 0x2bd   :  { %v2066_v12 = vpop.permute.xlu0 %2065  ;;  %v1802_v36 = vadd.f32 %v1800_v3, %v1663_v9 }
 0x2be   :  { %v1932_v20 = vpop.permute.xlu1 %1931  ;;  %v2077_v28 = vmul.f32 %v3813_v49, %v2066_v12 }
 0x2bf   :  { %v1939_v23 = vmul.f32 %v3806_v35, %v1932_v20 }
 0x2c0   :  { %v2079_v40 = vadd.f32 %v2077_v28, %v1940_v5 }
 0x2c1   :  { %v2205_v41 = vpop.permute.xlu0 %2204  ;;  %v1941_v22 = vadd.f32 %v1939_v23, %v1802_v36 }
 0x2c2   :  { %v2071_v56 = vpop.permute.xlu1 %2070  ;;  %v2216_v57 = vmul.f32 %v3820_v55, %v2205_v41 }
 0x2c3   :  { %v2078_v45 = vmul.f32 %v3813_v49, %v2071_v56 }
 0x2c4   :  { %v2218_v47 = vadd.f32 %v2216_v57, %v2079_v40 }
 0x2c5   :  { %v2344_v33 = vpop.permute.xlu0 %2343  ;;  %v2080_v11 = vadd.f32 %v2078_v45, %v1941_v22 }
 0x2c6   :  { %v2210_v62 = vpop.permute.xlu1 %2209  ;;  %v2355_v43 = vmul.f32 %v3827_v34, %v2344_v33 }
 0x2c7   :  { %v2217_v13 = vmul.f32 %v3820_v55, %v2210_v62 }
 0x2c8   :  { %v2357_v20 = vadd.f32 %v2355_v43, %v2218_v47 }
 0x2c9   :  { %v2483_v27 = vpop.permute.xlu0 %2482  ;;  %v2219_v41 = vadd.f32 %v2217_v13, %v2080_v11 }
 0x2ca   :  { %v2349_v18 = vpop.permute.xlu1 %2348  ;;  %v2494_v12 = vmul.f32 %v3834_v1, %v2483_v27 }
 0x2cb   :  { %v2356_v44 = vmul.f32 %v3827_v34, %v2349_v18 }
 0x2cc   :  { %v2496_v35 = vadd.f32 %v2494_v12, %v2357_v20 }
 0x2cd   :  { %v2622_v19 = vpop.permute.xlu0 %2621  ;;  %v2358_v49 = vadd.f32 %v2356_v44, %v2219_v41 }
 0x2ce   :  { %v2633_v26 = vmul.f32 %v3841_v7, %v2622_v19  ;;  %v2488_v15 = vpop.permute.xlu1 %2487 }
 0x2cf   :  { %v2495_v30 = vmul.f32 %v3834_v1, %v2488_v15  ;;  %v3015_v1 = vld [vmem:[%s5050_s5] sm:$0x1] }
 0x2d0   :  { %v2635_v56 = vadd.f32 %v2633_v26, %v2496_v35  ;;  %v3016_v43 = vmul.f32 2.0, %v3015_v1 }
 0x2d1   :  { %v2761_v50 = vpop.permute.xlu0 %2760  ;;  %v2497_v39 = vadd.f32 %v2495_v30, %v2358_v49 }
 0x2d2   :  { %v2772_v51 = vmul.f32 %v3848_v53, %v2761_v50  ;;  %v2627_v48 = vpop.permute.xlu1 %2626  ;;  %v3021_v13 = vrot.slane %v3016_v43, %v4356_v8 }
 0x2d3   :  { %v2634_v59 = vmul.f32 %v3841_v7, %v2627_v48 }
 0x2d4   :  { %v2774_v61 = vadd.f32 %v2772_v51, %v2635_v56 }
 0x2d5   :  { %v2636_v55 = vadd.f32 %v2634_v59, %v2497_v39  ;;  %v4138_v18 = vpop.permute.xlu0 %4137 }
 0x2d6   :  { %4239 = vtanh.f32 %v2774_v61  ;;  %v2766_v32 = vpop.permute.xlu1 %2765  ;;  %v4140_v12 = vunpack.i.h.bf16 %v4138_v18  ;;  %v4139_v51 = vunpack.i.l.bf16 %v4138_v18  ;;  %v3042_v61 = vld [vmem:[#allocation2 + $0x18] sm:$0xff] }
 0x2d7   :  { %v2773_v33 = vmul.f32 %v3848_v53, %v2766_v32  ;;  %v3026_v32 = vld [vmem:[#allocation2 + $0x8] sm:$0xff]  ;;  %v3070_v18 = vld [vmem:[#allocation2 + $0x38] sm:$0xff] }
 0x2d9   :  { %v2775_v42 = vadd.f32 %v2773_v33, %v2636_v55 }
 0x2db   :  { %4241 = vtanh.f32 %v2775_v42 }
 0x2e3   :  { %v4240_v28 = vpop.eup %4239 }
 0x2e4   :  { %4053 = vmatprep.mubr.msk.f32.mxu0 %vm2782_vm15, %v4240_v28  ;;  %v2884_v62 = vmul.f32 %v4240_v28, %v4240_v28  ;;  %v3041_v28 = vld [vmem:[#allocation2 + $0x10] sm:$0xff] }
 0x2e6   :  { %v2886_v3 = vsub.f32 1.0, %v2884_v62 }
 0x2e8   :  { %v4242_v34 = vpop.eup %4241  ;;  %v2895_v5 = vmul.f32 %v3851_v24, %v2886_v3  ;;  %v3025_v3 = vld [vmem:[#allocation2] sm:$0xff] }
 0x2e9   :  { %4054 = vmatmul.mubr.msk.f32.vlgmr.msra.gmra.mxu0 %vm2782_vm15, %v4242_v34  ;;  %v2885_v57 = vmul.f32 %v4242_v34, %v4242_v34  ;;  %v3056_v34 = vld [vmem:[#allocation2 + $0x28] sm:$0xff] }
 0x2ea   :  { %4064 = vmatprep.mubr.msk.f32.mxu1 %vm2782_vm15, %v2895_v5  ;;  %4069 = vmatprep.mubr.msk.f32.mxu0 %vm4247_vm1, %v4246_v10 }
 0x2eb   :  { %v2887_v9 = vsub.f32 1.0, %v2885_v57 }
 0x2ed   :  { %v2896_v23 = vmul.f32 %v3851_v24, %v2887_v9  ;;  %v3055_v9 = vld [vmem:[#allocation2 + $0x20] sm:$0xff] }
 0x2ef   :  { %4065 = vmatmul.mubr.msk.f32.vlgmr.msra.gmra.mxu1 %vm2782_vm15, %v2896_v23 }
 0x2f0   :  { %4074 = vmatprep.mubr.msk.f32.mxu1 %vm4247_vm1, %v4246_v10 }
 0x3a9   :  { %v4055_v27 = vpop.f32.mrf.mxu0 }
 0x3aa   :  { %v2865_v40 = vmul.f32 %v4055_v27, %v4821_v0 }
 0x3ab   :  { %v2855_v36 = vpop.f32.mrf.mxu0 }
 0x3ac   :  { %v2874_v45 = vsel %vm2866_vm0, %v2865_v40, 0.0  ;;  %v2864_v7 = vmul.f32 %v4818_v37, %v2855_v36 }
 0x3ad   :  { %v2875_v47 = vrot.slane %v2874_v45, 4 }
 0x3ae   :  { %v2867_v22 = vsel %vm2866_vm0, %v2864_v7, 0.0  ;;  %v3069_v7 = vld [vmem:[#allocation2 + $0x30] sm:$0xff] }
 0x3af   :  { %v2876_v19 = vadd.f32 %v2875_v47, %v2874_v45  ;;  %v2868_v20 = vrot.slane %v2867_v22, 4  ;;  %v4066_v26 = vpop.f32.mrf.mxu1  ;;  %v3084_v47 = vld [vmem:[#allocation2 + $0x48] sm:$0xff] }
 0x3b0   :  { %v4919_v15 = vmul.f32 %v4140_v12, %v4066_v26 }
 0x3b1   :  { %v2877_v11 = vrot.slane %v2876_v19, 2  ;;  %v2869_v44 = vadd.f32 %v2868_v20, %v2867_v22  ;;  %v2973_v56 = vpop.f32.mrf.mxu1  ;;  %v3083_v20 = vld [vmem:[#allocation2 + $0x40] sm:$0xff] }
 0x3b2   :  { %v4922_v0 = vmul.f32 %v3021_v13, %v4919_v15  ;;  %v4948_v48 = vmul.f32 %v4139_v51, %v2973_v56 }
 0x3b3   :  { %v2878_v53 = vadd.f32 %v2877_v11, %v2876_v19  ;;  %v2870_v35 = vrot.slane %v2869_v44, 2 }
 0x3b4   :  { %3062 = vperm.xlu1 %4142, %v4922_v0   ;;  %3034 = vperm.xlu0 %4134, %v4922_v0   ;;  %v3023_v49 = vmul.f32 %v3021_v13, %v4948_v48 }
 0x3b5   :  { %v2879_v37 = vrot.slane %v2878_v53, 1  ;;  %v2871_v41 = vadd.f32 %v2870_v35, %v2869_v44  ;;  %v3098_v35 = vld [vmem:[#allocation2 + $0x58] sm:$0xff] }
 0x3b7   :  { %v2880_v8 = vadd.f32 %v2879_v37, %v2878_v53  ;;  %v2872_v30 = vrot.slane %v2871_v41, 1 }
 0x3b8   :  { %4143 = vset.pattern.permute.xlu1 %v4249_v21  ;;  %4141 = vset.pattern.permute.xlu0 %v4248_v17 }
 0x3b9   :  { %2883 = vst.msk [vmem:[%s5061_s13 + $0x1] sm:$0x1] %vm2881_vm2, %v2880_v8  ;;  %v2873_v50 = vadd.f32 %v2872_v30, %v2871_v41  ;;  %3076 = vperm.xlu1 %4143, %v4922_v0   ;;  %3048 = vperm.xlu0 %4141, %v4922_v0  }
 0x3bb   :  { %2882 = vst.msk [vmem:[%s5061_s13] sm:$0x1] %vm2881_vm2, %v2873_v50  ;;  %v3112_v50 = vld [vmem:[#allocation2 + $0x68] sm:$0xff] }
 0x3bd   :  { %4145 = vset.pattern.permute.xlu1 %v4251_v29  ;;  %4144 = vset.pattern.permute.xlu0 %v4250_v25 }
 0x3be   :  { %3104 = vperm.xlu1 %4145, %v4922_v0   ;;  %3090 = vperm.xlu0 %4144, %v4922_v0  }
 0x3c2   :  { %4146 = vset.pattern.permute.xlu1 %v4252_v31  ;;  %4147 = vset.pattern.permute.xlu0 %v4253_v38 }
 0x3c3   :  { %3118 = vperm.xlu1 %4146, %v4922_v0   ;;  %3132 = vperm.xlu0 %4147, %v4922_v0  }
 0x3c7   :  { %4148 = vset.pattern.permute.xlu1 %v4255_v52  ;;  %4150 = vset.pattern.permute.xlu0 %v4259_v63 }
 0x3c8   :  { %3146 = vperm.xlu1 %4148, %v4922_v0   ;;  %3174 = vperm.xlu0 %4150, %v4922_v0  }
 0x3cc   :  { %4149 = vset.pattern.permute.xlu1 %v4257_v58  ;;  %4153 = vset.pattern.permute.xlu0 %v4261_v14 }
 0x3cd   :  { %3160 = vperm.xlu1 %4149, %v4922_v0   ;;  %3216 = vperm.xlu0 %4153, %v4922_v0  }
 0x3d1   :  { %4151 = vset.pattern.permute.xlu1 %v4260_v6  ;;  %4158 = vset.pattern.permute.xlu0 %v4249_v21  ;;  %v2995_v21 = vld [vmem:[%s5053_s2 + $0x8] sm:$0x1f] }
 0x3d2   :  { %3188 = vperm.xlu1 %4151, %v4922_v0   ;;  %3072 = vperm.xlu0 %4158, %v3023_v49  }
 0x3d6   :  { %4152 = vset.pattern.permute.xlu1 %v4256_v54  ;;  %4161 = vset.pattern.permute.xlu0 %v4252_v31 }
 0x3d7   :  { %3202 = vperm.xlu1 %4152, %v4922_v0   ;;  %3114 = vperm.xlu0 %4161, %v3023_v49  }
 0x3db   :  { %4154 = vset.pattern.permute.xlu1 %v4262_v16  ;;  %4164 = vset.pattern.permute.xlu0 %v4257_v58 }
 0x3dc   :  { %3230 = vperm.xlu1 %4154, %v4922_v0   ;;  %3156 = vperm.xlu0 %4164, %v3023_v49  }
 0x3e0   :  { %4155 = vset.pattern.permute.xlu1 %v4245_v2  ;;  %4167 = vset.pattern.permute.xlu0 %v4256_v54 }
 0x3e1   :  { %3198 = vperm.xlu0 %4167, %v3023_v49   ;;  %3029 = vperm.xlu1 %4155, %v3023_v49  }
 0x3e5   :  { %4170 = vset.pattern.permute.xlu0 %v4258_v60  ;;  %4156 = vset.pattern.permute.xlu1 %v4248_v17  ;;  %v2994_v17 = vld [vmem:[%s5053_s2] sm:$0x1f] }
 0x3e6   :  { %3240 = vperm.xlu0 %4170, %v3023_v49   ;;  %3044 = vperm.xlu1 %4156, %v3023_v49  }
 0x3ea   :  { %4157 = vset.pattern.permute.xlu1 %v4254_v46  ;;  %4173 = vset.pattern.permute.xlu0 %v4245_v2 }
 0x3eb   :  { %3058 = vperm.xlu1 %4157, %v3023_v49   ;;  %3004 = vperm.xlu0 %4173, %v2995_v21   ;;  %v3111_v21 = vld [vmem:[#allocation2 + $0x60] sm:$0xff] }
 0x3ef   :  { %4159 = vset.pattern.permute.xlu1 %v4250_v25  ;;  %4174 = vset.pattern.permute.xlu0 %v4258_v60 }
 0x3f0   :  { %3086 = vperm.xlu1 %4159, %v3023_v49  }
 0x3f4   :  { %4160 = vset.pattern.permute.xlu1 %v4251_v29 }
 0x3f5   :  { %3100 = vperm.xlu1 %4160, %v3023_v49  }
 0x3f9   :  { %4162 = vset.pattern.permute.xlu1 %v4253_v38 }
 0x3fa   :  { %3128 = vperm.xlu1 %4162, %v3023_v49  }
 0x3fe   :  { %4163 = vset.pattern.permute.xlu1 %v4255_v52 }
 0x3ff   :  { %3142 = vperm.xlu1 %4163, %v3023_v49  }
 0x403   :  { %4165 = vset.pattern.permute.xlu1 %v4259_v63 }
 0x404   :  { %3170 = vperm.xlu1 %4165, %v3023_v49  }
 0x408   :  { %4166 = vset.pattern.permute.xlu1 %v4260_v6 }
 0x409   :  { %3184 = vperm.xlu1 %4166, %v3023_v49  }
 0x40d   :  { %4168 = vset.pattern.permute.xlu1 %v4261_v14 }
 0x40e   :  { %3212 = vperm.xlu1 %4168, %v3023_v49  }
 0x412   :  { %4169 = vset.pattern.permute.xlu1 %v4262_v16 }
 0x413   :  { %3226 = vperm.xlu1 %4169, %v3023_v49  }
 0x417   :  { %4171 = vset.pattern.permute.xlu1 %v4258_v60 }
 0x418   :  { %3244 = vperm.xlu1 %4171, %v4922_v0   ;;  %v3097_v0 = vld [vmem:[#allocation2 + $0x50] sm:$0xff] }
 0x41c   :  { %4172 = vset.pattern.permute.xlu1 %v4245_v2 }
 0x41d   :  { %2999 = vperm.xlu1 %4172, %v2994_v17  }
 0x42f   :  { %v3063_v25 = vpop.permute.xlu1 %3062  ;;  %v3035_v52 = vpop.permute.xlu0 %3034 }
 0x430   :  { %v3038_v33 = vmul.f32 %v3035_v52, %v3026_v32  ;;  %v3066_v57 = vmul.f32 %v3063_v25, %v3056_v34 }
 0x434   :  { %v3077_v29 = vpop.permute.xlu1 %3076  ;;  %v3049_v58 = vpop.permute.xlu0 %3048 }
 0x435   :  { %v3052_v39 = vmul.f32 %v3049_v58, %v3042_v61  ;;  %v3080_v45 = vmul.f32 %v3077_v29, %v3070_v18  ;;  %v3125_v29 = vld [vmem:[#allocation2 + $0x70] sm:$0xff] }
 0x437   :  { %v3054_v24 = vadd.f32 %v3052_v39, %v3038_v33  ;;  %v3139_v39 = vld [vmem:[#allocation2 + $0x80] sm:$0xff] }
 0x439   :  { %v3105_v31 = vpop.permute.xlu1 %3104  ;;  %v3091_v63 = vpop.permute.xlu0 %3090  ;;  %v3068_v40 = vadd.f32 %v3066_v57, %v3054_v24 }
 0x43a   :  { %v3094_v19 = vmul.f32 %v3091_v63, %v3084_v47  ;;  %v3108_v8 = vmul.f32 %v3105_v31, %v3098_v35 }
 0x43b   :  { %v3082_v13 = vadd.f32 %v3080_v45, %v3068_v40 }
 0x43d   :  { %v3096_v44 = vadd.f32 %v3094_v19, %v3082_v13  ;;  %v3196_v13 = vld [vmem:[#allocation2 + $0xc8] sm:$0xff] }
 0x43e   :  { %v3119_v38 = vpop.permute.xlu1 %3118  ;;  %v3133_v14 = vpop.permute.xlu0 %3132 }
 0x43f   :  { %v3110_v51 = vadd.f32 %v3108_v8, %v3096_v44  ;;  %v3122_v49 = vmul.f32 %v3119_v38, %v3112_v50  ;;  %v3223_v50 = vld [vmem:[#allocation2 + $0xe0] sm:$0xff] }
 0x441   :  { %v3124_v63 = vadd.f32 %v3122_v49, %v3110_v51 }
 0x443   :  { %v4988_v46 = vpop.permute.xlu1 %3146  ;;  %v4998_v2 = vpop.permute.xlu0 %3174 }
 0x448   :  { %v4990_v54 = vpop.permute.xlu1 %3160  ;;  %v5000_v42 = vpop.permute.xlu0 %3216 }
 0x44d   :  { %v4992_v60 = vpop.permute.xlu1 %3188  ;;  %v3073_v43 = vpop.permute.xlu0 %3072 }
 0x44e   :  { %v3079_v12 = vmul.f32 %v3073_v43, %v3069_v7  ;;  %v3168_v43 = vld [vmem:[#allocation2 + $0xa8] sm:$0xff]  ;;  %v3182_v7 = vld [vmem:[#allocation2 + $0xb8] sm:$0xff] }
 0x44f   :  { %v3178_v18 = vmul.f32 %v4998_v2, %v3168_v43 }
 0x452   :  { %v4994_v6 = vpop.permute.xlu1 %3202  ;;  %v3115_v30 = vpop.permute.xlu0 %3114 }
 0x453   :  { %v3121_v17 = vmul.f32 %v3115_v30, %v3111_v21 }
 0x457   :  { %v4996_v16 = vpop.permute.xlu1 %3230  ;;  %v3157_v24 = vpop.permute.xlu0 %3156 }
 0x45c   :  { %v3030_v59 = vpop.permute.xlu1 %3029 }
 0x45d   :  { %v3037_v5 = vmul.f32 %v3030_v59, %v3025_v3  ;;  %v3126_v59 = vld [vmem:[#allocation2 + $0x78] sm:$0xff] }
 0x45e   :  { %v3136_v61 = vmul.f32 %v3133_v14, %v3126_v59  ;;  %v3154_v3 = vld [vmem:[#allocation2 + $0x98] sm:$0xff] }
 0x45f   :  { %v3164_v34 = vmul.f32 %v4990_v54, %v3154_v3  ;;  %v3199_v54 = vpop.permute.xlu0 %3198  ;;  %v3700_v3 = vsub.s32 3, %v4347_v4 }
 0x460   :  { %v3138_v31 = vadd.f32 %v3136_v61, %v3124_v63 }
 0x461   :  { %v3045_v55 = vpop.permute.xlu1 %3044 }
 0x462   :  { %v3051_v62 = vmul.f32 %v3045_v55, %v3041_v28  ;;  %v3140_v55 = vld [vmem:[#allocation2 + $0x88] sm:$0xff] }
 0x463   :  { %v3241_v30 = vpop.permute.xlu0 %3240 }
 0x464   :  { %v3053_v1 = vadd.f32 %v3051_v62, %v3037_v5  ;;  %v3150_v62 = vmul.f32 %v4988_v46, %v3140_v55  ;;  %v3153_v5 = vld [vmem:[#allocation2 + $0x90] sm:$0xff]  ;;  %v4244_v55 = vld [vmem:[%s5051_s0 + $0x8] sm:$0x1f] }
 0x465   :  { %v3163_v57 = vmul.f32 %v3157_v24, %v3153_v5 }
 0x466   :  { %v3059_v23 = vpop.permute.xlu1 %3058 }
 0x467   :  { %v3065_v27 = vmul.f32 %v3059_v23, %v3055_v9  ;;  %v3152_v23 = vadd.f32 %v3150_v62, %v3138_v31 }
 0x469   :  { %v3067_v36 = vadd.f32 %v3065_v27, %v3053_v1  ;;  %v3167_v1 = vld [vmem:[#allocation2 + $0xa0] sm:$0xff]  ;;  %v3166_v40 = vadd.f32 %v3164_v34, %v3152_v23 }
 0x46b   :  { %v3087_v22 = vpop.permute.xlu1 %3086  ;;  %v3081_v26 = vadd.f32 %v3079_v12, %v3067_v36  ;;  %v3181_v36 = vld [vmem:[#allocation2 + $0xb0] sm:$0xff]  ;;  %v3180_v12 = vadd.f32 %v3178_v18, %v3166_v40 }
 0x46c   :  { %v3093_v11 = vmul.f32 %v3087_v22, %v3083_v20  ;;  %v3192_v22 = vmul.f32 %v4992_v60, %v3182_v7  ;;  %v3206_v20 = vmul.f32 %v4994_v6, %v3196_v13  ;;  %v3224_v60 = vld [vmem:[#allocation2 + $0xe8] sm:$0xff] }
 0x46d   :  { %v3234_v6 = vmul.f32 %v4996_v16, %v3224_v60  ;;  %v3854_v16 = vld [vmem:[%s5062_s6] ss:$0 sm:$0xff] }
 0x46e   :  { %v3095_v37 = vadd.f32 %v3093_v11, %v3081_v26  ;;  %v3195_v26 = vld [vmem:[#allocation2 + $0xc0] sm:$0xff] }
 0x46f   :  { %v3205_v11 = vmul.f32 %v3199_v54, %v3195_v26 }
 0x470   :  { %v3101_v53 = vpop.permute.xlu1 %3100 }
 0x471   :  { %v3107_v41 = vmul.f32 %v3101_v53, %v3097_v0  ;;  %v3194_v0 = vadd.f32 %v3192_v22, %v3180_v12  ;;  %v3209_v53 = vld [vmem:[#allocation2 + $0xd0] sm:$0xff] }
 0x473   :  { %v3109_v56 = vadd.f32 %v3107_v41, %v3095_v37  ;;  %v3208_v37 = vadd.f32 %v3206_v20, %v3194_v0  ;;  %v3210_v41 = vld [vmem:[#allocation2 + $0xd8] sm:$0xff] }
 0x474   :  { %v3220_v8 = vmul.f32 %v5000_v42, %v3210_v41 }
 0x475   :  { %v3129_v25 = vpop.permute.xlu1 %3128  ;;  %v3123_v52 = vadd.f32 %v3121_v17, %v3109_v56  ;;  %v3237_v17 = vld [vmem:[#allocation2 + $0xf0] sm:$0xff] }
 0x476   :  { %v3135_v58 = vmul.f32 %v3129_v25, %v3125_v29  ;;  %v3222_v21 = vadd.f32 %v3220_v8, %v3208_v37  ;;  %v3247_v25 = vmul.f32 %v3241_v30, %v3237_v17 }
 0x478   :  { %v3137_v33 = vadd.f32 %v3135_v58, %v3123_v52  ;;  %v3238_v58 = vld [vmem:[#allocation2 + $0xf8] sm:$0xff]  ;;  %v3236_v59 = vadd.f32 %v3234_v6, %v3222_v21 }
 0x47a   :  { %v3143_v32 = vpop.permute.xlu1 %3142 }
 0x47b   :  { %v3149_v28 = vmul.f32 %v3143_v32, %v3139_v39  ;;  %v4243_v39 = vld [vmem:[%s5051_s0] sm:$0x1f] }
 0x47d   :  { %v3151_v38 = vadd.f32 %v3149_v28, %v3137_v33  ;;  %v3005_v28 = vpop.permute.xlu0 %3004 }
 0x47e   :  { %v3014_v31 = vmul.f32 %v3854_v16, %v3005_v28 }
 0x47f   :  { %v3171_v9 = vpop.permute.xlu1 %3170  ;;  %v3165_v27 = vadd.f32 %v3163_v57, %v3151_v38 }
 0x480   :  { %v3177_v14 = vmul.f32 %v3171_v9, %v3167_v1 }
 0x482   :  { %v3179_v46 = vadd.f32 %v3177_v14, %v3165_v27 }
 0x484   :  { %v3185_v45 = vpop.permute.xlu1 %3184 }
 0x485   :  { %v3191_v47 = vmul.f32 %v3185_v45, %v3181_v36 }
 0x487   :  { %v3193_v19 = vadd.f32 %v3191_v47, %v3179_v46 }
 0x489   :  { %v3213_v44 = vpop.permute.xlu1 %3212  ;;  %v3207_v35 = vadd.f32 %v3205_v11, %v3193_v19 }
 0x48a   :  { %v3219_v2 = vmul.f32 %v3213_v44, %v3209_v53 }
 0x48c   :  { %v3221_v51 = vadd.f32 %v3219_v2, %v3207_v35 }
 0x48e   :  { %v3227_v56 = vpop.permute.xlu1 %3226 }
 0x48f   :  { %v3233_v49 = vmul.f32 %v3227_v56, %v3223_v50 }
 0x491   :  { %v3235_v29 = vadd.f32 %v3233_v49, %v3221_v51 }
 0x493   :  { %v3249_v52 = vadd.f32 %v3247_v25, %v3235_v29  ;;  %v3245_v63 = vpop.permute.xlu1 %3244 }
 0x494   :  { %v3248_v61 = vmul.f32 %v3245_v63, %v3238_v58 }
 0x495   :  { %4068 = vmatpush3.xpose.msk.msra.mxu0 %vm588_vm12, %v3249_v52 }
 0x496   :  { %v3250_v42 = vadd.f32 %v3248_v61, %v3236_v59  ;;  %4077 = vmatprep.subr.mxu0 %v4246_v10 }
 0x498   :  { %4070 = vmatmul.mubr.msk.f32.vlgmr.msra.gmra.mxu0 %vm588_vm12, %v4243_v39  ;;  %4073 = vmatpush3.xpose.msk.msra.mxu1 %vm588_vm12, %v3250_v42  ;;  %v3000_v32 = vpop.permute.xlu1 %2999 }
 0x499   :  { %4078 = vmatpush3.msra.mxu0 %v3249_v52  ;;  %4079 = vmatprep.mubr.msk.f32.mxu0 %vm4247_vm1, %v4246_v10  ;;  %v3013_v33 = vmul.f32 %v3854_v16, %v3000_v32 }
 0x49a   :  { %4082 = vmatprep.subr.mxu1 %v4246_v10  ;;  %4087 = vmatprep.subr.mxu0 %v4246_v10 }
 0x49b   :  { %4075 = vmatmul.mubr.msk.f32.vlgmr.msra.gmra.mxu1 %vm588_vm12, %v4244_v55 }
 0x49c   :  { %4080 = vmatmul.mubr.msk.f32.vlgmr.msra.gmra.mxu0 %vm588_vm12, %v4243_v39  ;;  %4083 = vmatpush3.msra.mxu1 %v3250_v42 }
 0x49d   :  { %4088 = vmatpush3.xpose.msk.msra.mxu0 %vm3541_vm3, %v4948_v48  ;;  %4084 = vmatprep.mubr.msk.f32.mxu1 %vm4247_vm1, %v4246_v10 }
 0x49e   :  { %4092 = vmatprep.subr.mxu1 %v4246_v10  ;;  %4089 = vmatprep.mubr.msk.f32.mxu0 %vm4247_vm1, %v4246_v10 }
 0x49f   :  { %4085 = vmatmul.mubr.msk.f32.vlgmr.msra.gmra.mxu1 %vm588_vm12, %v4244_v55 }
 0x4a0   :  { %4093 = vmatpush3.xpose.msk.msra.mxu1 %vm3541_vm3, %v4919_v15  ;;  %4090 = vmatmul.mubr.msk.f32.vlgmr.msra.gmra.mxu0 %vm3541_vm3, %v3013_v33 }
 0x4a1   :  { %4094 = vmatprep.mubr.msk.f32.mxu1 %vm4247_vm1, %v4246_v10  ;;  %vm3712_vm1 = vcmask 59392  }
 0x4a3   :  { %4095 = vmatmul.mubr.msk.f32.vlgmr.msra.gmra.mxu1 %vm3541_vm3, %v3014_v31 }
 0x558   :  { %v3322_v48 = vpop.f32.mrf.mxu0 }
 0x55a   :  { %v4071_v62 = vpop.f32.mrf.mxu0 }
 0x55b   :  { %v3397_v24 = vpop.f32.mrf.mxu1 }
 0x55c   :  { %v3467_v38 = vpop.f32.mrf.mxu0 }
 0x55d   :  { %v3696_v34 = vadd.f32 %v3467_v38, %v3322_v48  ;;  %v4076_v5 = vpop.f32.mrf.mxu1 }
 0x55e   :  { %v4081_v57 = vpop.f32.mrf.mxu0 }
 0x55f   :  { %v3701_v9 = vrot.slane %v3696_v34, %v3700_v3  ;;  %v3537_v23 = vpop.f32.mrf.mxu1 }
 0x560   :  { %v3697_v1 = vadd.f32 %v3537_v23, %v3397_v24  ;;  %v3614_v15 = vpop.f32.mrf.mxu0 }
 0x561   :  { %v3615_v27 = vadd.f32 %v3614_v15, %v3322_v48  ;;  %v4086_v14 = vpop.f32.mrf.mxu1  ;;  %v3706_v10 = vmul.f32 %v4243_v39, %v3701_v9 }
 0x562   :  { %v3705_v40 = vrot.slane %v3697_v1, %v3700_v3  ;;  %v4091_v43 = vpop.f32.mrf.mxu0 }
 0x563   :  { %v3694_v18 = vadd.f32 %v3615_v27, %v3467_v38  ;;  %v3690_v36 = vpop.f32.mrf.mxu1 }
 0x564   :  { %v3691_v45 = vadd.f32 %v3690_v36, %v3397_v24  ;;  %v3707_v47 = vmul.f32 %v4244_v55, %v3705_v40 }
 0x565   :  { %v3708_v7 = vsub.f32 %v3694_v18, %v3706_v10  ;;  %v4096_v46 = vpop.f32.mrf.mxu1 }
 0x566   :  { %v3695_v4 = vadd.f32 %v3691_v45, %v3537_v23 }
 0x567   :  { %v3710_v12 = vsub.f32 0.0, %v3708_v7 }
 0x568   :  { %v3709_v22 = vsub.f32 %v3695_v4, %v3707_v47 }
 0x569   :  { %3713 = vst.msk [vmem:[%s5063_s14] sm:$0x7] %vm3712_vm1, %v3710_v12 }
 0x56a   :  { %v3711_v54 = vsub.f32 0.0, %v3709_v22 }
 0x56c   :  { %3714 = vst.msk [vmem:[%s5063_s14 + $0x4] sm:$0x7] %vm3712_vm1, %v3711_v54 }

</bundles_post_ra>
